<compile_context>
chip_gen: v7x
topology: tpu7x:2x2x1
jax: 0.10.0
libtpu: 0.0.40
codegen_flags: <defaults>
</compile_context>

<pallas_src>
import functools
import math

import jax
import jax.numpy as jnp
from jax.experimental import pallas as pl
from jax.experimental.pallas import tpu as pltpu


_VMEM = pl.BlockSpec(memory_space=pltpu.MemorySpace.VMEM)


# -----------------------------------------------------------------------------
# Fused model kernel.
#   refs = [x,
#           (wih_t, whh, b) per layer,
#           ln_gamma, ln_beta, att_w, att_b, wfc, bfc,
#           out]
# Gate order follows PyTorch: [i, f, g, o] along the 4H axis.
# Dropout (between LSTM layers and before FC) is identity (eval semantics).
# -----------------------------------------------------------------------------
def _fused_model_kernel(*refs, T, B, H, num_dirs, num_layers):
    f32 = jnp.float32
    G = 4 * H
    D = num_dirs * H

    x_ref = refs[0]
    layer_refs = refs[1:1 + 3 * num_layers]
    (ln_g_ref, ln_b_ref, att_w_ref, att_b_ref,
     wfc_ref, bfc_ref) = refs[1 + 3 * num_layers:-1]
    out_ref = refs[-1]

    # --- one (bi)LSTM layer given precomputed x-projections per timestep ----
    def recurrence(gx, whh_ref):
        # gx: list over t of (B, num_dirs*4H) = x_t @ Wih^T + (b_ih + b_hh)
        hs = [[None] * T for _ in range(num_dirs)]
        h = [jnp.zeros((B, H), f32) for _ in range(num_dirs)]
        c = [jnp.zeros((B, H), f32) for _ in range(num_dirs)]
        for t in range(T):
            for d in range(num_dirs):
                td = t if d == 0 else T - 1 - t        # reverse dir walks backwards
                g = gx[td][:, d * G:(d + 1) * G] + jnp.dot(
                    h[d], whh_ref[d], preferred_element_type=f32)
                i_g = jax.nn.sigmoid(g[:, 0 * H:1 * H])
                f_g = jax.nn.sigmoid(g[:, 1 * H:2 * H])
                g_g = jnp.tanh(g[:, 2 * H:3 * H])
                o_g = jax.nn.sigmoid(g[:, 3 * H:4 * H])
                c[d] = f_g * c[d] + i_g * g_g
                h[d] = o_g * jnp.tanh(c[d])
                hs[d][td] = h[d]
        return hs

    # ---- layer 0: hoisted input projection, then recurrence -----------------
    wih0_ref, whh0_ref, b0_ref = layer_refs[0:3]
    wih0 = wih0_ref[...]
    b0 = b0_ref[...]
    gx = [jnp.dot(x_ref[t], wih0, preferred_element_type=f32) + b0
          for t in range(T)]
    hs = recurrence(gx, whh0_ref)

    # ---- layers 1..L-1: projection decomposed per input direction -----------
    for l in range(1, num_layers):
        wih_ref, whh_ref, b_ref = layer_refs[3 * l:3 * l + 3]
        b_l = b_ref[...]
        w_in = [wih_ref[d_in * H:(d_in + 1) * H, :] for d_in in range(num_dirs)]
        gx = []
        for t in range(T):
            acc = b_l
            for d_in in range(num_dirs):
                acc = acc + jnp.dot(hs[d_in][t], w_in[d_in],
                                    preferred_element_type=f32)
            gx.append(acc)
        hs = recurrence(gx, whh_ref)

    # ---- head: LayerNorm (eps=1e-5) -> attention over time -> FC ------------
    gamma = ln_g_ref[...]            # (1, D)
    beta = ln_b_ref[...]             # (1, D)
    att_w = att_w_ref[...]           # (1, D)
    att_b = att_b_ref[...]           # (1, 1)
    inv_D = 1.0 / D

    yn = [[None] * T for _ in range(num_dirs)]
    scores = [None] * T
    for t in range(T):
        s = jnp.zeros((B, 1), f32)
        for d in range(num_dirs):
            s = s + jnp.sum(hs[d][t], axis=-1, keepdims=True)
        mu = s * inv_D
        cen = [hs[d][t] - mu for d in range(num_dirs)]
        v = jnp.zeros((B, 1), f32)
        for d in range(num_dirs):
            v = v + jnp.sum(jnp.square(cen[d]), axis=-1, keepdims=True)
        rstd = jax.lax.rsqrt(v * inv_D + 1e-5)
        sc = att_b
        for d in range(num_dirs):
            y = cen[d] * rstd * gamma[:, d * H:(d + 1) * H] \
                + beta[:, d * H:(d + 1) * H]
            yn[d][t] = y
            sc = sc + jnp.sum(y * att_w[:, d * H:(d + 1) * H],
                              axis=-1, keepdims=True)
        scores[t] = sc                                   # (B, 1)

    m = scores[0]
    for t in range(1, T):
        m = jnp.maximum(m, scores[t])
    e = [jnp.exp(scores[t] - m) for t in range(T)]
    denom = e[0]
    for t in range(1, T):
        denom = denom + e[t]
    inv_denom = pl.reciprocal(denom, approx=True)
    attn = [e[t] * inv_denom for t in range(T)]          # softmax over T

    logits = bfc_ref[...]                                # (1, Cp)
    for d in range(num_dirs):
        ctx_d = attn[0] * yn[d][0]
        for t in range(1, T):
            ctx_d = ctx_d + attn[t] * yn[d][t]           # (B, H)
        logits = logits + jnp.dot(ctx_d, wfc_ref[d * H:(d + 1) * H, :],
                                  preferred_element_type=f32)
    out_ref[...] = logits                                # (B, Cp) lane-dense


# -----------------------------------------------------------------------------
# Full forward pass (matches LSTMModel.forward, eval semantics).
# -----------------------------------------------------------------------------
def lstm_model_forward(x, params, hidden_size, num_layers, bidirectional):
    num_dirs = 2 if bidirectional else 1
    B, T, _ = x.shape
    H = hidden_size
    D = H * num_dirs
    C = params["fc_w"].shape[0]
    Cp = ((C + 127) // 128) * 128      # lane-dense FC output slab, sliced after

    x_tbi = jnp.transpose(x, (1, 0, 2))                 # (T, B, I) time-major
    wfc = jnp.zeros((D, Cp), jnp.float32).at[:, :C].set(params["fc_w"].T)
    bfc = jnp.zeros((1, Cp), jnp.float32).at[0, :C].set(params["fc_b"])

    inputs = [x_tbi]
    for layer in range(num_layers):
        p = params["layers"][layer]
        inputs += [p["wih_t"], p["whh"], p["b"]]
    inputs += [params["ln_gamma"].reshape(1, D),
               params["ln_beta"].reshape(1, D),
               params["att_w"].reshape(1, D),
               params["att_b"].reshape(1, 1),
               wfc, bfc]

    kernel = functools.partial(_fused_model_kernel, T=T, B=B, H=H,
                               num_dirs=num_dirs, num_layers=num_layers)
    out = pl.pallas_call(
        kernel,
        out_shape=jax.ShapeDtypeStruct((B, Cp), jnp.float32),
        in_specs=[_VMEM] * len(inputs),
        out_specs=_VMEM,
    )(*inputs)
    # TODO(synk): nn.LSTM inter-layer dropout and the final nn.Dropout are
    # stochastic (train-mode only); eval-mode identity is used here.
    return out[:, :C]


# -----------------------------------------------------------------------------
# Deterministic parameter init (PyTorch-style shapes, uniform init), packed for
# the kernel: Wih of all directions concatenated along the 4H axis, Whh stacked
# per direction, biases (bih + bhh) fused.
# -----------------------------------------------------------------------------
def init_params(key, input_size, hidden_size, num_layers, num_dirs, num_classes):
    H = hidden_size
    k = 1.0 / math.sqrt(H)
    keys = jax.random.split(key, num_layers * num_dirs * 4 + 4)
    idx = 0
    layers = []
    for layer in range(num_layers):
        in_size = input_size if layer == 0 else H * num_dirs
        wih_cols, whh_list, b_list = [], [], []
        for _ in range(num_dirs):
            wih = jax.random.uniform(keys[idx], (4 * H, in_size), jnp.float32, -k, k); idx += 1
            whh = jax.random.uniform(keys[idx], (4 * H, H), jnp.float32, -k, k); idx += 1
            bih = jax.random.uniform(keys[idx], (4 * H,), jnp.float32, -k, k); idx += 1
            bhh = jax.random.uniform(keys[idx], (4 * H,), jnp.float32, -k, k); idx += 1
            wih_cols.append(wih.T)            # (in, 4H)  (x @ Wih^T layout)
            whh_list.append(whh.T)            # (H, 4H)   (h @ Whh^T layout)
            b_list.append(bih + bhh)          # fused bias
        layers.append({
            "wih_t": jnp.concatenate(wih_cols, axis=1),                 # (in, nd*4H)
            "whh": jnp.stack(whh_list, axis=0),                         # (nd, H, 4H)
            "b": jnp.concatenate(b_list, axis=0).reshape(1, num_dirs * 4 * H),
        })
    D = H * num_dirs
    ka = 1.0 / math.sqrt(D)
    params = {"layers": layers}
    params["ln_gamma"] = jnp.ones((D,), jnp.float32)
    params["ln_beta"] = jnp.zeros((D,), jnp.float32)
    params["att_w"] = jax.random.uniform(keys[idx], (1, D), jnp.float32, -ka, ka); idx += 1
    params["att_b"] = jax.random.uniform(keys[idx], (1,), jnp.float32, -ka, ka); idx += 1
    params["fc_w"] = jax.random.uniform(keys[idx], (num_classes, D), jnp.float32, -ka, ka); idx += 1
    params["fc_b"] = jax.random.uniform(keys[idx], (num_classes,), jnp.float32, -ka, ka); idx += 1
    return params


# -----------------------------------------------------------------------------
# Pure-JAX reference (same math) for a correctness check.
# -----------------------------------------------------------------------------
def reference_forward(x, params, H, num_layers, bidirectional):
    B, T, _ = x.shape
    num_dirs = 2 if bidirectional else 1
    G = 4 * H
    inp = x
    for layer in range(num_layers):
        p = params["layers"][layer]
        outs = []
        for d in range(num_dirs):
            wih_t = p["wih_t"][:, d * G:(d + 1) * G]
            whh_t = p["whh"][d]
            b = p["b"][0, d * G:(d + 1) * G]

            def step(carry, xt, wih_t=wih_t, whh_t=whh_t, b=b):
                h, c = carry
                gates = xt @ wih_t + h @ whh_t + b
                i_g = jax.nn.sigmoid(gates[:, :H])
                f_g = jax.nn.sigmoid(gates[:, H:2 * H])
                g_g = jnp.tanh(gates[:, 2 * H:3 * H])
                o_g = jax.nn.sigmoid(gates[:, 3 * H:])
                c = f_g * c + i_g * g_g
                h = o_g * jnp.tanh(c)
                return (h, c), h

            xs = jnp.transpose(inp, (1, 0, 2))
            if d == 1:
                xs = xs[::-1]
            (_, _), hs = jax.lax.scan(
                step,
                (jnp.zeros((B, H), jnp.float32), jnp.zeros((B, H), jnp.float32)),
                xs)
            if d == 1:
                hs = hs[::-1]
            outs.append(jnp.transpose(hs, (1, 0, 2)))
        inp = jnp.concatenate(outs, axis=-1) if num_dirs == 2 else outs[0]
    y = inp
    mu = jnp.mean(y, -1, keepdims=True)
    var = jnp.mean((y - mu) ** 2, -1, keepdims=True)
    yn = (y - mu) / jnp.sqrt(var + 1e-5) * params["ln_gamma"] + params["ln_beta"]
    scores = jnp.sum(yn * params["att_w"][0], -1) + params["att_b"][0]
    attn = jax.nn.softmax(scores, axis=1)
    ctx = jnp.sum(attn[..., None] * yn, axis=1)
    return ctx @ params["fc_w"].T + params["fc_b"]


if __name__ == "__main__":
    # Small shapes consistent with the module: (batch, seq, input_size)
    B, T, I = 2, 8, 16
    hidden_size = 32
    num_layers = 2
    num_classes = 4
    bidirectional = True
    num_dirs = 2 if bidirectional else 1

    key = jax.random.PRNGKey(0)
    kx, kp = jax.random.split(key)
    x = jax.random.normal(kx, (B, T, I), jnp.float32)
    params = init_params(kp, I, hidden_size, num_layers, num_dirs, num_classes)

    fwd = jax.jit(functools.partial(
        lstm_model_forward, hidden_size=hidden_size,
        num_layers=num_layers, bidirectional=bidirectional))
    logits = jax.block_until_ready(fwd(x, params))

    ref = jax.block_until_ready(
        reference_forward(x, params, hidden_size, num_layers, bidirectional))
    assert logits.shape == (B, num_classes)
    assert jnp.allclose(logits, ref, atol=3e-3, rtol=3e-3), (logits, ref)

    print("KERNEL_OK")
</pallas_src>

<mosaic_0001>
module attributes {stable_mosaic.version = 11 : i64} {
  func.func @_fused_model_kernel(%arg0: memref<8x2x16xf32, #tpu.memory_space<vmem>>, %arg1: memref<16x256xf32, #tpu.memory_space<vmem>>, %arg2: memref<2x32x128xf32, #tpu.memory_space<vmem>>, %arg3: memref<1x256xf32, #tpu.memory_space<vmem>>, %arg4: memref<64x256xf32, #tpu.memory_space<vmem>>, %arg5: memref<2x32x128xf32, #tpu.memory_space<vmem>>, %arg6: memref<1x256xf32, #tpu.memory_space<vmem>>, %arg7: memref<1x64xf32, #tpu.memory_space<vmem>>, %arg8: memref<1x64xf32, #tpu.memory_space<vmem>>, %arg9: memref<1x64xf32, #tpu.memory_space<vmem>>, %arg10: memref<1x1xf32, #tpu.memory_space<vmem>>, %arg11: memref<64x128xf32, #tpu.memory_space<vmem>>, %arg12: memref<1x128xf32, #tpu.memory_space<vmem>>, %arg13: memref<2x128xf32, #tpu.memory_space<vmem>>) attributes {dimension_semantics = [], scalar_prefetch = 0 : i64, scratch_operands = 0 : i64, tpu.core_type = #tpu.core_type<tc>} {
    %c0 = arith.constant 0 : index
    %c0_0 = arith.constant 0 : index
    %0 = vector.load %arg1[%c0, %c0_0] : memref<16x256xf32, #tpu.memory_space<vmem>>, vector<16x256xf32>
    %c0_1 = arith.constant 0 : index
    %c0_2 = arith.constant 0 : index
    %1 = vector.load %arg3[%c0_1, %c0_2] : memref<1x256xf32, #tpu.memory_space<vmem>>, vector<1x256xf32>
    %c0_3 = arith.constant 0 : index
    %c0_4 = arith.constant 0 : index
    %c0_5 = arith.constant 0 : index
    %2 = vector.load %arg0[%c0_3, %c0_4, %c0_5] : memref<8x2x16xf32, #tpu.memory_space<vmem>>, vector<1x2x16xf32>
    %3 = vector.shape_cast %2 : vector<1x2x16xf32> to vector<2x16xf32>
    %cst = arith.constant dense<0.000000e+00> : vector<2x256xf32>
    %4 = tpu.matmul %3, %0, %cst {dimension_numbers = #tpu.dot_dimension_numbers<[1], [0], [0], [1], [0, 0, 1, 1], [], []>} : vector<2x16xf32>, vector<16x256xf32>, vector<2x256xf32> -> vector<2x256xf32>
    %5 = vector.broadcast %1 : vector<1x256xf32> to vector<2x256xf32>
    %6 = arith.addf %4, %5 : vector<2x256xf32>
    %c1 = arith.constant 1 : index
    %c0_6 = arith.constant 0 : index
    %c0_7 = arith.constant 0 : index
    %7 = vector.load %arg0[%c1, %c0_6, %c0_7] : memref<8x2x16xf32, #tpu.memory_space<vmem>>, vector<1x2x16xf32>
    %8 = vector.shape_cast %7 : vector<1x2x16xf32> to vector<2x16xf32>
    %cst_8 = arith.constant dense<0.000000e+00> : vector<2x256xf32>
    %9 = tpu.matmul %8, %0, %cst_8 {dimension_numbers = #tpu.dot_dimension_numbers<[1], [0], [0], [1], [0, 0, 1, 1], [], []>} : vector<2x16xf32>, vector<16x256xf32>, vector<2x256xf32> -> vector<2x256xf32>
    %10 = vector.broadcast %1 : vector<1x256xf32> to vector<2x256xf32>
    %11 = arith.addf %9, %10 : vector<2x256xf32>
    %c2 = arith.constant 2 : index
    %c0_9 = arith.constant 0 : index
    %c0_10 = arith.constant 0 : index
    %12 = vector.load %arg0[%c2, %c0_9, %c0_10] : memref<8x2x16xf32, #tpu.memory_space<vmem>>, vector<1x2x16xf32>
    %13 = vector.shape_cast %12 : vector<1x2x16xf32> to vector<2x16xf32>
    %cst_11 = arith.constant dense<0.000000e+00> : vector<2x256xf32>
    %14 = tpu.matmul %13, %0, %cst_11 {dimension_numbers = #tpu.dot_dimension_numbers<[1], [0], [0], [1], [0, 0, 1, 1], [], []>} : vector<2x16xf32>, vector<16x256xf32>, vector<2x256xf32> -> vector<2x256xf32>
    %15 = vector.broadcast %1 : vector<1x256xf32> to vector<2x256xf32>
    %16 = arith.addf %14, %15 : vector<2x256xf32>
    %c3 = arith.constant 3 : index
    %c0_12 = arith.constant 0 : index
    %c0_13 = arith.constant 0 : index
    %17 = vector.load %arg0[%c3, %c0_12, %c0_13] : memref<8x2x16xf32, #tpu.memory_space<vmem>>, vector<1x2x16xf32>
    %18 = vector.shape_cast %17 : vector<1x2x16xf32> to vector<2x16xf32>
    %cst_14 = arith.constant dense<0.000000e+00> : vector<2x256xf32>
    %19 = tpu.matmul %18, %0, %cst_14 {dimension_numbers = #tpu.dot_dimension_numbers<[1], [0], [0], [1], [0, 0, 1, 1], [], []>} : vector<2x16xf32>, vector<16x256xf32>, vector<2x256xf32> -> vector<2x256xf32>
    %20 = vector.broadcast %1 : vector<1x256xf32> to vector<2x256xf32>
    %21 = arith.addf %19, %20 : vector<2x256xf32>
    %c4 = arith.constant 4 : index
    %c0_15 = arith.constant 0 : index
    %c0_16 = arith.constant 0 : index
    %22 = vector.load %arg0[%c4, %c0_15, %c0_16] : memref<8x2x16xf32, #tpu.memory_space<vmem>>, vector<1x2x16xf32>
    %23 = vector.shape_cast %22 : vector<1x2x16xf32> to vector<2x16xf32>
    %cst_17 = arith.constant dense<0.000000e+00> : vector<2x256xf32>
    %24 = tpu.matmul %23, %0, %cst_17 {dimension_numbers = #tpu.dot_dimension_numbers<[1], [0], [0], [1], [0, 0, 1, 1], [], []>} : vector<2x16xf32>, vector<16x256xf32>, vector<2x256xf32> -> vector<2x256xf32>
    %25 = vector.broadcast %1 : vector<1x256xf32> to vector<2x256xf32>
    %26 = arith.addf %24, %25 : vector<2x256xf32>
    %c5 = arith.constant 5 : index
    %c0_18 = arith.constant 0 : index
    %c0_19 = arith.constant 0 : index
    %27 = vector.load %arg0[%c5, %c0_18, %c0_19] : memref<8x2x16xf32, #tpu.memory_space<vmem>>, vector<1x2x16xf32>
    %28 = vector.shape_cast %27 : vector<1x2x16xf32> to vector<2x16xf32>
    %cst_20 = arith.constant dense<0.000000e+00> : vector<2x256xf32>
    %29 = tpu.matmul %28, %0, %cst_20 {dimension_numbers = #tpu.dot_dimension_numbers<[1], [0], [0], [1], [0, 0, 1, 1], [], []>} : vector<2x16xf32>, vector<16x256xf32>, vector<2x256xf32> -> vector<2x256xf32>
    %30 = vector.broadcast %1 : vector<1x256xf32> to vector<2x256xf32>
    %31 = arith.addf %29, %30 : vector<2x256xf32>
    %c6 = arith.constant 6 : index
    %c0_21 = arith.constant 0 : index
    %c0_22 = arith.constant 0 : index
    %32 = vector.load %arg0[%c6, %c0_21, %c0_22] : memref<8x2x16xf32, #tpu.memory_space<vmem>>, vector<1x2x16xf32>
    %33 = vector.shape_cast %32 : vector<1x2x16xf32> to vector<2x16xf32>
    %cst_23 = arith.constant dense<0.000000e+00> : vector<2x256xf32>
    %34 = tpu.matmul %33, %0, %cst_23 {dimension_numbers = #tpu.dot_dimension_numbers<[1], [0], [0], [1], [0, 0, 1, 1], [], []>} : vector<2x16xf32>, vector<16x256xf32>, vector<2x256xf32> -> vector<2x256xf32>
    %35 = vector.broadcast %1 : vector<1x256xf32> to vector<2x256xf32>
    %36 = arith.addf %34, %35 : vector<2x256xf32>
    %c7 = arith.constant 7 : index
    %c0_24 = arith.constant 0 : index
    %c0_25 = arith.constant 0 : index
    %37 = vector.load %arg0[%c7, %c0_24, %c0_25] : memref<8x2x16xf32, #tpu.memory_space<vmem>>, vector<1x2x16xf32>
    %38 = vector.shape_cast %37 : vector<1x2x16xf32> to vector<2x16xf32>
    %cst_26 = arith.constant dense<0.000000e+00> : vector<2x256xf32>
    %39 = tpu.matmul %38, %0, %cst_26 {dimension_numbers = #tpu.dot_dimension_numbers<[1], [0], [0], [1], [0, 0, 1, 1], [], []>} : vector<2x16xf32>, vector<16x256xf32>, vector<2x256xf32> -> vector<2x256xf32>
    %40 = vector.broadcast %1 : vector<1x256xf32> to vector<2x256xf32>
    %41 = arith.addf %39, %40 : vector<2x256xf32>
    %cst_27 = arith.constant 0.000000e+00 : f32
    %42 = vector.broadcast %cst_27 : f32 to vector<2x32xf32>
    %cst_28 = arith.constant 0.000000e+00 : f32
    %43 = vector.broadcast %cst_28 : f32 to vector<2x32xf32>
    %cst_29 = arith.constant 0.000000e+00 : f32
    %44 = vector.broadcast %cst_29 : f32 to vector<2x32xf32>
    %cst_30 = arith.constant 0.000000e+00 : f32
    %45 = vector.broadcast %cst_30 : f32 to vector<2x32xf32>
    %46 = vector.extract_strided_slice %6 {offsets = [0, 0], sizes = [2, 128], strides = [1, 1]} : vector<2x256xf32> to vector<2x128xf32>
    %c0_31 = arith.constant 0 : index
    %c0_32 = arith.constant 0 : index
    %c0_33 = arith.constant 0 : index
    %47 = vector.load %arg2[%c0_31, %c0_32, %c0_33] : memref<2x32x128xf32, #tpu.memory_space<vmem>>, vector<1x32x128xf32>
    %48 = vector.shape_cast %47 : vector<1x32x128xf32> to vector<32x128xf32>
    %cst_34 = arith.constant dense<0.000000e+00> : vector<2x128xf32>
    %49 = tpu.matmul %42, %48, %cst_34 {dimension_numbers = #tpu.dot_dimension_numbers<[1], [0], [0], [1], [0, 0, 1, 1], [], []>} : vector<2x32xf32>, vector<32x128xf32>, vector<2x128xf32> -> vector<2x128xf32>
    %50 = arith.addf %46, %49 : vector<2x128xf32>
    %51 = vector.extract_strided_slice %50 {offsets = [0, 0], sizes = [2, 32], strides = [1, 1]} : vector<2x128xf32> to vector<2x32xf32>
    %52 = arith.negf %51 : vector<2x32xf32>
    %53 = math.exp %52 : vector<2x32xf32>
    %cst_35 = arith.constant 1.000000e+00 : f32
    %54 = vector.broadcast %cst_35 : f32 to vector<2x32xf32>
    %55 = arith.addf %54, %53 : vector<2x32xf32>
    %56 = arith.divf %54, %55 : vector<2x32xf32>
    %57 = vector.extract_strided_slice %50 {offsets = [0, 32], sizes = [2, 32], strides = [1, 1]} : vector<2x128xf32> to vector<2x32xf32>
    %58 = arith.negf %57 : vector<2x32xf32>
    %59 = math.exp %58 : vector<2x32xf32>
    %cst_36 = arith.constant 1.000000e+00 : f32
    %60 = vector.broadcast %cst_36 : f32 to vector<2x32xf32>
    %61 = arith.addf %60, %59 : vector<2x32xf32>
    %62 = arith.divf %60, %61 : vector<2x32xf32>
    %63 = vector.extract_strided_slice %50 {offsets = [0, 64], sizes = [2, 32], strides = [1, 1]} : vector<2x128xf32> to vector<2x32xf32>
    %64 = math.tanh %63 : vector<2x32xf32>
    %65 = vector.extract_strided_slice %50 {offsets = [0, 96], sizes = [2, 32], strides = [1, 1]} : vector<2x128xf32> to vector<2x32xf32>
    %66 = arith.negf %65 : vector<2x32xf32>
    %67 = math.exp %66 : vector<2x32xf32>
    %cst_37 = arith.constant 1.000000e+00 : f32
    %68 = vector.broadcast %cst_37 : f32 to vector<2x32xf32>
    %69 = arith.addf %68, %67 : vector<2x32xf32>
    %70 = arith.divf %68, %69 : vector<2x32xf32>
    %71 = arith.mulf %62, %44 : vector<2x32xf32>
    %72 = arith.mulf %56, %64 : vector<2x32xf32>
    %73 = arith.addf %71, %72 : vector<2x32xf32>
    %74 = math.tanh %73 : vector<2x32xf32>
    %75 = arith.mulf %70, %74 : vector<2x32xf32>
    %76 = vector.extract_strided_slice %41 {offsets = [0, 128], sizes = [2, 128], strides = [1, 1]} : vector<2x256xf32> to vector<2x128xf32>
    %c1_38 = arith.constant 1 : index
    %c0_39 = arith.constant 0 : index
    %c0_40 = arith.constant 0 : index
    %77 = vector.load %arg2[%c1_38, %c0_39, %c0_40] : memref<2x32x128xf32, #tpu.memory_space<vmem>>, vector<1x32x128xf32>
    %78 = vector.shape_cast %77 : vector<1x32x128xf32> to vector<32x128xf32>
    %cst_41 = arith.constant dense<0.000000e+00> : vector<2x128xf32>
    %79 = tpu.matmul %43, %78, %cst_41 {dimension_numbers = #tpu.dot_dimension_numbers<[1], [0], [0], [1], [0, 0, 1, 1], [], []>} : vector<2x32xf32>, vector<32x128xf32>, vector<2x128xf32> -> vector<2x128xf32>
    %80 = arith.addf %76, %79 : vector<2x128xf32>
    %81 = vector.extract_strided_slice %80 {offsets = [0, 0], sizes = [2, 32], strides = [1, 1]} : vector<2x128xf32> to vector<2x32xf32>
    %82 = arith.negf %81 : vector<2x32xf32>
    %83 = math.exp %82 : vector<2x32xf32>
    %cst_42 = arith.constant 1.000000e+00 : f32
    %84 = vector.broadcast %cst_42 : f32 to vector<2x32xf32>
    %85 = arith.addf %84, %83 : vector<2x32xf32>
    %86 = arith.divf %84, %85 : vector<2x32xf32>
    %87 = vector.extract_strided_slice %80 {offsets = [0, 32], sizes = [2, 32], strides = [1, 1]} : vector<2x128xf32> to vector<2x32xf32>
    %88 = arith.negf %87 : vector<2x32xf32>
    %89 = math.exp %88 : vector<2x32xf32>
    %cst_43 = arith.constant 1.000000e+00 : f32
    %90 = vector.broadcast %cst_43 : f32 to vector<2x32xf32>
    %91 = arith.addf %90, %89 : vector<2x32xf32>
    %92 = arith.divf %90, %91 : vector<2x32xf32>
    %93 = vector.extract_strided_slice %80 {offsets = [0, 64], sizes = [2, 32], strides = [1, 1]} : vector<2x128xf32> to vector<2x32xf32>
    %94 = math.tanh %93 : vector<2x32xf32>
    %95 = vector.extract_strided_slice %80 {offsets = [0, 96], sizes = [2, 32], strides = [1, 1]} : vector<2x128xf32> to vector<2x32xf32>
    %96 = arith.negf %95 : vector<2x32xf32>
    %97 = math.exp %96 : vector<2x32xf32>
    %cst_44 = arith.constant 1.000000e+00 : f32
    %98 = vector.broadcast %cst_44 : f32 to vector<2x32xf32>
    %99 = arith.addf %98, %97 : vector<2x32xf32>
    %100 = arith.divf %98, %99 : vector<2x32xf32>
    %101 = arith.mulf %92, %45 : vector<2x32xf32>
    %102 = arith.mulf %86, %94 : vector<2x32xf32>
    %103 = arith.addf %101, %102 : vector<2x32xf32>
    %104 = math.tanh %103 : vector<2x32xf32>
    %105 = arith.mulf %100, %104 : vector<2x32xf32>
    %106 = vector.extract_strided_slice %11 {offsets = [0, 0], sizes = [2, 128], strides = [1, 1]} : vector<2x256xf32> to vector<2x128xf32>
    %c0_45 = arith.constant 0 : index
    %c0_46 = arith.constant 0 : index
    %c0_47 = arith.constant 0 : index
    %107 = vector.load %arg2[%c0_45, %c0_46, %c0_47] : memref<2x32x128xf32, #tpu.memory_space<vmem>>, vector<1x32x128xf32>
    %108 = vector.shape_cast %107 : vector<1x32x128xf32> to vector<32x128xf32>
    %cst_48 = arith.constant dense<0.000000e+00> : vector<2x128xf32>
    %109 = tpu.matmul %75, %108, %cst_48 {dimension_numbers = #tpu.dot_dimension_numbers<[1], [0], [0], [1], [0, 0, 1, 1], [], []>} : vector<2x32xf32>, vector<32x128xf32>, vector<2x128xf32> -> vector<2x128xf32>
    %110 = arith.addf %106, %109 : vector<2x128xf32>
    %111 = vector.extract_strided_slice %110 {offsets = [0, 0], sizes = [2, 32], strides = [1, 1]} : vector<2x128xf32> to vector<2x32xf32>
    %112 = arith.negf %111 : vector<2x32xf32>
    %113 = math.exp %112 : vector<2x32xf32>
    %cst_49 = arith.constant 1.000000e+00 : f32
    %114 = vector.broadcast %cst_49 : f32 to vector<2x32xf32>
    %115 = arith.addf %114, %113 : vector<2x32xf32>
    %116 = arith.divf %114, %115 : vector<2x32xf32>
    %117 = vector.extract_strided_slice %110 {offsets = [0, 32], sizes = [2, 32], strides = [1, 1]} : vector<2x128xf32> to vector<2x32xf32>
    %118 = arith.negf %117 : vector<2x32xf32>
    %119 = math.exp %118 : vector<2x32xf32>
    %cst_50 = arith.constant 1.000000e+00 : f32
    %120 = vector.broadcast %cst_50 : f32 to vector<2x32xf32>
    %121 = arith.addf %120, %119 : vector<2x32xf32>
    %122 = arith.divf %120, %121 : vector<2x32xf32>
    %123 = vector.extract_strided_slice %110 {offsets = [0, 64], sizes = [2, 32], strides = [1, 1]} : vector<2x128xf32> to vector<2x32xf32>
    %124 = math.tanh %123 : vector<2x32xf32>
    %125 = vector.extract_strided_slice %110 {offsets = [0, 96], sizes = [2, 32], strides = [1, 1]} : vector<2x128xf32> to vector<2x32xf32>
    %126 = arith.negf %125 : vector<2x32xf32>
    %127 = math.exp %126 : vector<2x32xf32>
    %cst_51 = arith.constant 1.000000e+00 : f32
    %128 = vector.broadcast %cst_51 : f32 to vector<2x32xf32>
    %129 = arith.addf %128, %127 : vector<2x32xf32>
    %130 = arith.divf %128, %129 : vector<2x32xf32>
    %131 = arith.mulf %122, %73 : vector<2x32xf32>
    %132 = arith.mulf %116, %124 : vector<2x32xf32>
    %133 = arith.addf %131, %132 : vector<2x32xf32>
    %134 = math.tanh %133 : vector<2x32xf32>
    %135 = arith.mulf %130, %134 : vector<2x32xf32>
    %136 = vector.extract_strided_slice %36 {offsets = [0, 128], sizes = [2, 128], strides = [1, 1]} : vector<2x256xf32> to vector<2x128xf32>
    %c1_52 = arith.constant 1 : index
    %c0_53 = arith.constant 0 : index
    %c0_54 = arith.constant 0 : index
    %137 = vector.load %arg2[%c1_52, %c0_53, %c0_54] : memref<2x32x128xf32, #tpu.memory_space<vmem>>, vector<1x32x128xf32>
    %138 = vector.shape_cast %137 : vector<1x32x128xf32> to vector<32x128xf32>
    %cst_55 = arith.constant dense<0.000000e+00> : vector<2x128xf32>
    %139 = tpu.matmul %105, %138, %cst_55 {dimension_numbers = #tpu.dot_dimension_numbers<[1], [0], [0], [1], [0, 0, 1, 1], [], []>} : vector<2x32xf32>, vector<32x128xf32>, vector<2x128xf32> -> vector<2x128xf32>
    %140 = arith.addf %136, %139 : vector<2x128xf32>
    %141 = vector.extract_strided_slice %140 {offsets = [0, 0], sizes = [2, 32], strides = [1, 1]} : vector<2x128xf32> to vector<2x32xf32>
    %142 = arith.negf %141 : vector<2x32xf32>
    %143 = math.exp %142 : vector<2x32xf32>
    %cst_56 = arith.constant 1.000000e+00 : f32
    %144 = vector.broadcast %cst_56 : f32 to vector<2x32xf32>
    %145 = arith.addf %144, %143 : vector<2x32xf32>
    %146 = arith.divf %144, %145 : vector<2x32xf32>
    %147 = vector.extract_strided_slice %140 {offsets = [0, 32], sizes = [2, 32], strides = [1, 1]} : vector<2x128xf32> to vector<2x32xf32>
    %148 = arith.negf %147 : vector<2x32xf32>
    %149 = math.exp %148 : vector<2x32xf32>
    %cst_57 = arith.constant 1.000000e+00 : f32
    %150 = vector.broadcast %cst_57 : f32 to vector<2x32xf32>
    %151 = arith.addf %150, %149 : vector<2x32xf32>
    %152 = arith.divf %150, %151 : vector<2x32xf32>
    %153 = vector.extract_strided_slice %140 {offsets = [0, 64], sizes = [2, 32], strides = [1, 1]} : vector<2x128xf32> to vector<2x32xf32>
    %154 = math.tanh %153 : vector<2x32xf32>
    %155 = vector.extract_strided_slice %140 {offsets = [0, 96], sizes = [2, 32], strides = [1, 1]} : vector<2x128xf32> to vector<2x32xf32>
    %156 = arith.negf %155 : vector<2x32xf32>
    %157 = math.exp %156 : vector<2x32xf32>
    %cst_58 = arith.constant 1.000000e+00 : f32
    %158 = vector.broadcast %cst_58 : f32 to vector<2x32xf32>
    %159 = arith.addf %158, %157 : vector<2x32xf32>
    %160 = arith.divf %158, %159 : vector<2x32xf32>
    %161 = arith.mulf %152, %103 : vector<2x32xf32>
    %162 = arith.mulf %146, %154 : vector<2x32xf32>
    %163 = arith.addf %161, %162 : vector<2x32xf32>
    %164 = math.tanh %163 : vector<2x32xf32>
    %165 = arith.mulf %160, %164 : vector<2x32xf32>
    %166 = vector.extract_strided_slice %16 {offsets = [0, 0], sizes = [2, 128], strides = [1, 1]} : vector<2x256xf32> to vector<2x128xf32>
    %c0_59 = arith.constant 0 : index
    %c0_60 = arith.constant 0 : index
    %c0_61 = arith.constant 0 : index
    %167 = vector.load %arg2[%c0_59, %c0_60, %c0_61] : memref<2x32x128xf32, #tpu.memory_space<vmem>>, vector<1x32x128xf32>
    %168 = vector.shape_cast %167 : vector<1x32x128xf32> to vector<32x128xf32>
    %cst_62 = arith.constant dense<0.000000e+00> : vector<2x128xf32>
    %169 = tpu.matmul %135, %168, %cst_62 {dimension_numbers = #tpu.dot_dimension_numbers<[1], [0], [0], [1], [0, 0, 1, 1], [], []>} : vector<2x32xf32>, vector<32x128xf32>, vector<2x128xf32> -> vector<2x128xf32>
    %170 = arith.addf %166, %169 : vector<2x128xf32>
    %171 = vector.extract_strided_slice %170 {offsets = [0, 0], sizes = [2, 32], strides = [1, 1]} : vector<2x128xf32> to vector<2x32xf32>
    %172 = arith.negf %171 : vector<2x32xf32>
    %173 = math.exp %172 : vector<2x32xf32>
    %cst_63 = arith.constant 1.000000e+00 : f32
    %174 = vector.broadcast %cst_63 : f32 to vector<2x32xf32>
    %175 = arith.addf %174, %173 : vector<2x32xf32>
    %176 = arith.divf %174, %175 : vector<2x32xf32>
    %177 = vector.extract_strided_slice %170 {offsets = [0, 32], sizes = [2, 32], strides = [1, 1]} : vector<2x128xf32> to vector<2x32xf32>
    %178 = arith.negf %177 : vector<2x32xf32>
    %179 = math.exp %178 : vector<2x32xf32>
    %cst_64 = arith.constant 1.000000e+00 : f32
    %180 = vector.broadcast %cst_64 : f32 to vector<2x32xf32>
    %181 = arith.addf %180, %179 : vector<2x32xf32>
    %182 = arith.divf %180, %181 : vector<2x32xf32>
    %183 = vector.extract_strided_slice %170 {offsets = [0, 64], sizes = [2, 32], strides = [1, 1]} : vector<2x128xf32> to vector<2x32xf32>
    %184 = math.tanh %183 : vector<2x32xf32>
    %185 = vector.extract_strided_slice %170 {offsets = [0, 96], sizes = [2, 32], strides = [1, 1]} : vector<2x128xf32> to vector<2x32xf32>
    %186 = arith.negf %185 : vector<2x32xf32>
    %187 = math.exp %186 : vector<2x32xf32>
    %cst_65 = arith.constant 1.000000e+00 : f32
    %188 = vector.broadcast %cst_65 : f32 to vector<2x32xf32>
    %189 = arith.addf %188, %187 : vector<2x32xf32>
    %190 = arith.divf %188, %189 : vector<2x32xf32>
    %191 = arith.mulf %182, %133 : vector<2x32xf32>
    %192 = arith.mulf %176, %184 : vector<2x32xf32>
    %193 = arith.addf %191, %192 : vector<2x32xf32>
    %194 = math.tanh %193 : vector<2x32xf32>
    %195 = arith.mulf %190, %194 : vector<2x32xf32>
    %196 = vector.extract_strided_slice %31 {offsets = [0, 128], sizes = [2, 128], strides = [1, 1]} : vector<2x256xf32> to vector<2x128xf32>
    %c1_66 = arith.constant 1 : index
    %c0_67 = arith.constant 0 : index
    %c0_68 = arith.constant 0 : index
    %197 = vector.load %arg2[%c1_66, %c0_67, %c0_68] : memref<2x32x128xf32, #tpu.memory_space<vmem>>, vector<1x32x128xf32>
    %198 = vector.shape_cast %197 : vector<1x32x128xf32> to vector<32x128xf32>
    %cst_69 = arith.constant dense<0.000000e+00> : vector<2x128xf32>
    %199 = tpu.matmul %165, %198, %cst_69 {dimension_numbers = #tpu.dot_dimension_numbers<[1], [0], [0], [1], [0, 0, 1, 1], [], []>} : vector<2x32xf32>, vector<32x128xf32>, vector<2x128xf32> -> vector<2x128xf32>
    %200 = arith.addf %196, %199 : vector<2x128xf32>
    %201 = vector.extract_strided_slice %200 {offsets = [0, 0], sizes = [2, 32], strides = [1, 1]} : vector<2x128xf32> to vector<2x32xf32>
    %202 = arith.negf %201 : vector<2x32xf32>
    %203 = math.exp %202 : vector<2x32xf32>
    %cst_70 = arith.constant 1.000000e+00 : f32
    %204 = vector.broadcast %cst_70 : f32 to vector<2x32xf32>
    %205 = arith.addf %204, %203 : vector<2x32xf32>
    %206 = arith.divf %204, %205 : vector<2x32xf32>
    %207 = vector.extract_strided_slice %200 {offsets = [0, 32], sizes = [2, 32], strides = [1, 1]} : vector<2x128xf32> to vector<2x32xf32>
    %208 = arith.negf %207 : vector<2x32xf32>
    %209 = math.exp %208 : vector<2x32xf32>
    %cst_71 = arith.constant 1.000000e+00 : f32
    %210 = vector.broadcast %cst_71 : f32 to vector<2x32xf32>
    %211 = arith.addf %210, %209 : vector<2x32xf32>
    %212 = arith.divf %210, %211 : vector<2x32xf32>
    %213 = vector.extract_strided_slice %200 {offsets = [0, 64], sizes = [2, 32], strides = [1, 1]} : vector<2x128xf32> to vector<2x32xf32>
    %214 = math.tanh %213 : vector<2x32xf32>
    %215 = vector.extract_strided_slice %200 {offsets = [0, 96], sizes = [2, 32], strides = [1, 1]} : vector<2x128xf32> to vector<2x32xf32>
    %216 = arith.negf %215 : vector<2x32xf32>
    %217 = math.exp %216 : vector<2x32xf32>
    %cst_72 = arith.constant 1.000000e+00 : f32
    %218 = vector.broadcast %cst_72 : f32 to vector<2x32xf32>
    %219 = arith.addf %218, %217 : vector<2x32xf32>
    %220 = arith.divf %218, %219 : vector<2x32xf32>
    %221 = arith.mulf %212, %163 : vector<2x32xf32>
    %222 = arith.mulf %206, %214 : vector<2x32xf32>
    %223 = arith.addf %221, %222 : vector<2x32xf32>
    %224 = math.tanh %223 : vector<2x32xf32>
    %225 = arith.mulf %220, %224 : vector<2x32xf32>
    %226 = vector.extract_strided_slice %21 {offsets = [0, 0], sizes = [2, 128], strides = [1, 1]} : vector<2x256xf32> to vector<2x128xf32>
    %c0_73 = arith.constant 0 : index
    %c0_74 = arith.constant 0 : index
    %c0_75 = arith.constant 0 : index
    %227 = vector.load %arg2[%c0_73, %c0_74, %c0_75] : memref<2x32x128xf32, #tpu.memory_space<vmem>>, vector<1x32x128xf32>
    %228 = vector.shape_cast %227 : vector<1x32x128xf32> to vector<32x128xf32>
    %cst_76 = arith.constant dense<0.000000e+00> : vector<2x128xf32>
    %229 = tpu.matmul %195, %228, %cst_76 {dimension_numbers = #tpu.dot_dimension_numbers<[1], [0], [0], [1], [0, 0, 1, 1], [], []>} : vector<2x32xf32>, vector<32x128xf32>, vector<2x128xf32> -> vector<2x128xf32>
    %230 = arith.addf %226, %229 : vector<2x128xf32>
    %231 = vector.extract_strided_slice %230 {offsets = [0, 0], sizes = [2, 32], strides = [1, 1]} : vector<2x128xf32> to vector<2x32xf32>
    %232 = arith.negf %231 : vector<2x32xf32>
    %233 = math.exp %232 : vector<2x32xf32>
    %cst_77 = arith.constant 1.000000e+00 : f32
    %234 = vector.broadcast %cst_77 : f32 to vector<2x32xf32>
    %235 = arith.addf %234, %233 : vector<2x32xf32>
    %236 = arith.divf %234, %235 : vector<2x32xf32>
    %237 = vector.extract_strided_slice %230 {offsets = [0, 32], sizes = [2, 32], strides = [1, 1]} : vector<2x128xf32> to vector<2x32xf32>
    %238 = arith.negf %237 : vector<2x32xf32>
    %239 = math.exp %238 : vector<2x32xf32>
    %cst_78 = arith.constant 1.000000e+00 : f32
    %240 = vector.broadcast %cst_78 : f32 to vector<2x32xf32>
    %241 = arith.addf %240, %239 : vector<2x32xf32>
    %242 = arith.divf %240, %241 : vector<2x32xf32>
    %243 = vector.extract_strided_slice %230 {offsets = [0, 64], sizes = [2, 32], strides = [1, 1]} : vector<2x128xf32> to vector<2x32xf32>
    %244 = math.tanh %243 : vector<2x32xf32>
    %245 = vector.extract_strided_slice %230 {offsets = [0, 96], sizes = [2, 32], strides = [1, 1]} : vector<2x128xf32> to vector<2x32xf32>
    %246 = arith.negf %245 : vector<2x32xf32>
    %247 = math.exp %246 : vector<2x32xf32>
    %cst_79 = arith.constant 1.000000e+00 : f32
    %248 = vector.broadcast %cst_79 : f32 to vector<2x32xf32>
    %249 = arith.addf %248, %247 : vector<2x32xf32>
    %250 = arith.divf %248, %249 : vector<2x32xf32>
    %251 = arith.mulf %242, %193 : vector<2x32xf32>
    %252 = arith.mulf %236, %244 : vector<2x32xf32>
    %253 = arith.addf %251, %252 : vector<2x32xf32>
    %254 = math.tanh %253 : vector<2x32xf32>
    %255 = arith.mulf %250, %254 : vector<2x32xf32>
    %256 = vector.extract_strided_slice %26 {offsets = [0, 128], sizes = [2, 128], strides = [1, 1]} : vector<2x256xf32> to vector<2x128xf32>
    %c1_80 = arith.constant 1 : index
    %c0_81 = arith.constant 0 : index
    %c0_82 = arith.constant 0 : index
    %257 = vector.load %arg2[%c1_80, %c0_81, %c0_82] : memref<2x32x128xf32, #tpu.memory_space<vmem>>, vector<1x32x128xf32>
    %258 = vector.shape_cast %257 : vector<1x32x128xf32> to vector<32x128xf32>
    %cst_83 = arith.constant dense<0.000000e+00> : vector<2x128xf32>
    %259 = tpu.matmul %225, %258, %cst_83 {dimension_numbers = #tpu.dot_dimension_numbers<[1], [0], [0], [1], [0, 0, 1, 1], [], []>} : vector<2x32xf32>, vector<32x128xf32>, vector<2x128xf32> -> vector<2x128xf32>
    %260 = arith.addf %256, %259 : vector<2x128xf32>
    %261 = vector.extract_strided_slice %260 {offsets = [0, 0], sizes = [2, 32], strides = [1, 1]} : vector<2x128xf32> to vector<2x32xf32>
    %262 = arith.negf %261 : vector<2x32xf32>
    %263 = math.exp %262 : vector<2x32xf32>
    %cst_84 = arith.constant 1.000000e+00 : f32
    %264 = vector.broadcast %cst_84 : f32 to vector<2x32xf32>
    %265 = arith.addf %264, %263 : vector<2x32xf32>
    %266 = arith.divf %264, %265 : vector<2x32xf32>
    %267 = vector.extract_strided_slice %260 {offsets = [0, 32], sizes = [2, 32], strides = [1, 1]} : vector<2x128xf32> to vector<2x32xf32>
    %268 = arith.negf %267 : vector<2x32xf32>
    %269 = math.exp %268 : vector<2x32xf32>
    %cst_85 = arith.constant 1.000000e+00 : f32
    %270 = vector.broadcast %cst_85 : f32 to vector<2x32xf32>
    %271 = arith.addf %270, %269 : vector<2x32xf32>
    %272 = arith.divf %270, %271 : vector<2x32xf32>
    %273 = vector.extract_strided_slice %260 {offsets = [0, 64], sizes = [2, 32], strides = [1, 1]} : vector<2x128xf32> to vector<2x32xf32>
    %274 = math.tanh %273 : vector<2x32xf32>
    %275 = vector.extract_strided_slice %260 {offsets = [0, 96], sizes = [2, 32], strides = [1, 1]} : vector<2x128xf32> to vector<2x32xf32>
    %276 = arith.negf %275 : vector<2x32xf32>
    %277 = math.exp %276 : vector<2x32xf32>
    %cst_86 = arith.constant 1.000000e+00 : f32
    %278 = vector.broadcast %cst_86 : f32 to vector<2x32xf32>
    %279 = arith.addf %278, %277 : vector<2x32xf32>
    %280 = arith.divf %278, %279 : vector<2x32xf32>
    %281 = arith.mulf %272, %223 : vector<2x32xf32>
    %282 = arith.mulf %266, %274 : vector<2x32xf32>
    %283 = arith.addf %281, %282 : vector<2x32xf32>
    %284 = math.tanh %283 : vector<2x32xf32>
    %285 = arith.mulf %280, %284 : vector<2x32xf32>
    %286 = vector.extract_strided_slice %26 {offsets = [0, 0], sizes = [2, 128], strides = [1, 1]} : vector<2x256xf32> to vector<2x128xf32>
    %c0_87 = arith.constant 0 : index
    %c0_88 = arith.constant 0 : index
    %c0_89 = arith.constant 0 : index
    %287 = vector.load %arg2[%c0_87, %c0_88, %c0_89] : memref<2x32x128xf32, #tpu.memory_space<vmem>>, vector<1x32x128xf32>
    %288 = vector.shape_cast %287 : vector<1x32x128xf32> to vector<32x128xf32>
    %cst_90 = arith.constant dense<0.000000e+00> : vector<2x128xf32>
    %289 = tpu.matmul %255, %288, %cst_90 {dimension_numbers = #tpu.dot_dimension_numbers<[1], [0], [0], [1], [0, 0, 1, 1], [], []>} : vector<2x32xf32>, vector<32x128xf32>, vector<2x128xf32> -> vector<2x128xf32>
    %290 = arith.addf %286, %289 : vector<2x128xf32>
    %291 = vector.extract_strided_slice %290 {offsets = [0, 0], sizes = [2, 32], strides = [1, 1]} : vector<2x128xf32> to vector<2x32xf32>
    %292 = arith.negf %291 : vector<2x32xf32>
    %293 = math.exp %292 : vector<2x32xf32>
    %cst_91 = arith.constant 1.000000e+00 : f32
    %294 = vector.broadcast %cst_91 : f32 to vector<2x32xf32>
    %295 = arith.addf %294, %293 : vector<2x32xf32>
    %296 = arith.divf %294, %295 : vector<2x32xf32>
    %297 = vector.extract_strided_slice %290 {offsets = [0, 32], sizes = [2, 32], strides = [1, 1]} : vector<2x128xf32> to vector<2x32xf32>
    %298 = arith.negf %297 : vector<2x32xf32>
    %299 = math.exp %298 : vector<2x32xf32>
    %cst_92 = arith.constant 1.000000e+00 : f32
    %300 = vector.broadcast %cst_92 : f32 to vector<2x32xf32>
    %301 = arith.addf %300, %299 : vector<2x32xf32>
    %302 = arith.divf %300, %301 : vector<2x32xf32>
    %303 = vector.extract_strided_slice %290 {offsets = [0, 64], sizes = [2, 32], strides = [1, 1]} : vector<2x128xf32> to vector<2x32xf32>
    %304 = math.tanh %303 : vector<2x32xf32>
    %305 = vector.extract_strided_slice %290 {offsets = [0, 96], sizes = [2, 32], strides = [1, 1]} : vector<2x128xf32> to vector<2x32xf32>
    %306 = arith.negf %305 : vector<2x32xf32>
    %307 = math.exp %306 : vector<2x32xf32>
    %cst_93 = arith.constant 1.000000e+00 : f32
    %308 = vector.broadcast %cst_93 : f32 to vector<2x32xf32>
    %309 = arith.addf %308, %307 : vector<2x32xf32>
    %310 = arith.divf %308, %309 : vector<2x32xf32>
    %311 = arith.mulf %302, %253 : vector<2x32xf32>
    %312 = arith.mulf %296, %304 : vector<2x32xf32>
    %313 = arith.addf %311, %312 : vector<2x32xf32>
    %314 = math.tanh %313 : vector<2x32xf32>
    %315 = arith.mulf %310, %314 : vector<2x32xf32>
    %316 = vector.extract_strided_slice %21 {offsets = [0, 128], sizes = [2, 128], strides = [1, 1]} : vector<2x256xf32> to vector<2x128xf32>
    %c1_94 = arith.constant 1 : index
    %c0_95 = arith.constant 0 : index
    %c0_96 = arith.constant 0 : index
    %317 = vector.load %arg2[%c1_94, %c0_95, %c0_96] : memref<2x32x128xf32, #tpu.memory_space<vmem>>, vector<1x32x128xf32>
    %318 = vector.shape_cast %317 : vector<1x32x128xf32> to vector<32x128xf32>
    %cst_97 = arith.constant dense<0.000000e+00> : vector<2x128xf32>
    %319 = tpu.matmul %285, %318, %cst_97 {dimension_numbers = #tpu.dot_dimension_numbers<[1], [0], [0], [1], [0, 0, 1, 1], [], []>} : vector<2x32xf32>, vector<32x128xf32>, vector<2x128xf32> -> vector<2x128xf32>
    %320 = arith.addf %316, %319 : vector<2x128xf32>
    %321 = vector.extract_strided_slice %320 {offsets = [0, 0], sizes = [2, 32], strides = [1, 1]} : vector<2x128xf32> to vector<2x32xf32>
    %322 = arith.negf %321 : vector<2x32xf32>
    %323 = math.exp %322 : vector<2x32xf32>
    %cst_98 = arith.constant 1.000000e+00 : f32
    %324 = vector.broadcast %cst_98 : f32 to vector<2x32xf32>
    %325 = arith.addf %324, %323 : vector<2x32xf32>
    %326 = arith.divf %324, %325 : vector<2x32xf32>
    %327 = vector.extract_strided_slice %320 {offsets = [0, 32], sizes = [2, 32], strides = [1, 1]} : vector<2x128xf32> to vector<2x32xf32>
    %328 = arith.negf %327 : vector<2x32xf32>
    %329 = math.exp %328 : vector<2x32xf32>
    %cst_99 = arith.constant 1.000000e+00 : f32
    %330 = vector.broadcast %cst_99 : f32 to vector<2x32xf32>
    %331 = arith.addf %330, %329 : vector<2x32xf32>
    %332 = arith.divf %330, %331 : vector<2x32xf32>
    %333 = vector.extract_strided_slice %320 {offsets = [0, 64], sizes = [2, 32], strides = [1, 1]} : vector<2x128xf32> to vector<2x32xf32>
    %334 = math.tanh %333 : vector<2x32xf32>
    %335 = vector.extract_strided_slice %320 {offsets = [0, 96], sizes = [2, 32], strides = [1, 1]} : vector<2x128xf32> to vector<2x32xf32>
    %336 = arith.negf %335 : vector<2x32xf32>
    %337 = math.exp %336 : vector<2x32xf32>
    %cst_100 = arith.constant 1.000000e+00 : f32
    %338 = vector.broadcast %cst_100 : f32 to vector<2x32xf32>
    %339 = arith.addf %338, %337 : vector<2x32xf32>
    %340 = arith.divf %338, %339 : vector<2x32xf32>
    %341 = arith.mulf %332, %283 : vector<2x32xf32>
    %342 = arith.mulf %326, %334 : vector<2x32xf32>
    %343 = arith.addf %341, %342 : vector<2x32xf32>
    %344 = math.tanh %343 : vector<2x32xf32>
    %345 = arith.mulf %340, %344 : vector<2x32xf32>
    %346 = vector.extract_strided_slice %31 {offsets = [0, 0], sizes = [2, 128], strides = [1, 1]} : vector<2x256xf32> to vector<2x128xf32>
    %c0_101 = arith.constant 0 : index
    %c0_102 = arith.constant 0 : index
    %c0_103 = arith.constant 0 : index
    %347 = vector.load %arg2[%c0_101, %c0_102, %c0_103] : memref<2x32x128xf32, #tpu.memory_space<vmem>>, vector<1x32x128xf32>
    %348 = vector.shape_cast %347 : vector<1x32x128xf32> to vector<32x128xf32>
    %cst_104 = arith.constant dense<0.000000e+00> : vector<2x128xf32>
    %349 = tpu.matmul %315, %348, %cst_104 {dimension_numbers = #tpu.dot_dimension_numbers<[1], [0], [0], [1], [0, 0, 1, 1], [], []>} : vector<2x32xf32>, vector<32x128xf32>, vector<2x128xf32> -> vector<2x128xf32>
    %350 = arith.addf %346, %349 : vector<2x128xf32>
    %351 = vector.extract_strided_slice %350 {offsets = [0, 0], sizes = [2, 32], strides = [1, 1]} : vector<2x128xf32> to vector<2x32xf32>
    %352 = arith.negf %351 : vector<2x32xf32>
    %353 = math.exp %352 : vector<2x32xf32>
    %cst_105 = arith.constant 1.000000e+00 : f32
    %354 = vector.broadcast %cst_105 : f32 to vector<2x32xf32>
    %355 = arith.addf %354, %353 : vector<2x32xf32>
    %356 = arith.divf %354, %355 : vector<2x32xf32>
    %357 = vector.extract_strided_slice %350 {offsets = [0, 32], sizes = [2, 32], strides = [1, 1]} : vector<2x128xf32> to vector<2x32xf32>
    %358 = arith.negf %357 : vector<2x32xf32>
    %359 = math.exp %358 : vector<2x32xf32>
    %cst_106 = arith.constant 1.000000e+00 : f32
    %360 = vector.broadcast %cst_106 : f32 to vector<2x32xf32>
    %361 = arith.addf %360, %359 : vector<2x32xf32>
    %362 = arith.divf %360, %361 : vector<2x32xf32>
    %363 = vector.extract_strided_slice %350 {offsets = [0, 64], sizes = [2, 32], strides = [1, 1]} : vector<2x128xf32> to vector<2x32xf32>
    %364 = math.tanh %363 : vector<2x32xf32>
    %365 = vector.extract_strided_slice %350 {offsets = [0, 96], sizes = [2, 32], strides = [1, 1]} : vector<2x128xf32> to vector<2x32xf32>
    %366 = arith.negf %365 : vector<2x32xf32>
    %367 = math.exp %366 : vector<2x32xf32>
    %cst_107 = arith.constant 1.000000e+00 : f32
    %368 = vector.broadcast %cst_107 : f32 to vector<2x32xf32>
    %369 = arith.addf %368, %367 : vector<2x32xf32>
    %370 = arith.divf %368, %369 : vector<2x32xf32>
    %371 = arith.mulf %362, %313 : vector<2x32xf32>
    %372 = arith.mulf %356, %364 : vector<2x32xf32>
    %373 = arith.addf %371, %372 : vector<2x32xf32>
    %374 = math.tanh %373 : vector<2x32xf32>
    %375 = arith.mulf %370, %374 : vector<2x32xf32>
    %376 = vector.extract_strided_slice %16 {offsets = [0, 128], sizes = [2, 128], strides = [1, 1]} : vector<2x256xf32> to vector<2x128xf32>
    %c1_108 = arith.constant 1 : index
    %c0_109 = arith.constant 0 : index
    %c0_110 = arith.constant 0 : index
    %377 = vector.load %arg2[%c1_108, %c0_109, %c0_110] : memref<2x32x128xf32, #tpu.memory_space<vmem>>, vector<1x32x128xf32>
    %378 = vector.shape_cast %377 : vector<1x32x128xf32> to vector<32x128xf32>
    %cst_111 = arith.constant dense<0.000000e+00> : vector<2x128xf32>
    %379 = tpu.matmul %345, %378, %cst_111 {dimension_numbers = #tpu.dot_dimension_numbers<[1], [0], [0], [1], [0, 0, 1, 1], [], []>} : vector<2x32xf32>, vector<32x128xf32>, vector<2x128xf32> -> vector<2x128xf32>
    %380 = arith.addf %376, %379 : vector<2x128xf32>
    %381 = vector.extract_strided_slice %380 {offsets = [0, 0], sizes = [2, 32], strides = [1, 1]} : vector<2x128xf32> to vector<2x32xf32>
    %382 = arith.negf %381 : vector<2x32xf32>
    %383 = math.exp %382 : vector<2x32xf32>
    %cst_112 = arith.constant 1.000000e+00 : f32
    %384 = vector.broadcast %cst_112 : f32 to vector<2x32xf32>
    %385 = arith.addf %384, %383 : vector<2x32xf32>
    %386 = arith.divf %384, %385 : vector<2x32xf32>
    %387 = vector.extract_strided_slice %380 {offsets = [0, 32], sizes = [2, 32], strides = [1, 1]} : vector<2x128xf32> to vector<2x32xf32>
    %388 = arith.negf %387 : vector<2x32xf32>
    %389 = math.exp %388 : vector<2x32xf32>
    %cst_113 = arith.constant 1.000000e+00 : f32
    %390 = vector.broadcast %cst_113 : f32 to vector<2x32xf32>
    %391 = arith.addf %390, %389 : vector<2x32xf32>
    %392 = arith.divf %390, %391 : vector<2x32xf32>
    %393 = vector.extract_strided_slice %380 {offsets = [0, 64], sizes = [2, 32], strides = [1, 1]} : vector<2x128xf32> to vector<2x32xf32>
    %394 = math.tanh %393 : vector<2x32xf32>
    %395 = vector.extract_strided_slice %380 {offsets = [0, 96], sizes = [2, 32], strides = [1, 1]} : vector<2x128xf32> to vector<2x32xf32>
    %396 = arith.negf %395 : vector<2x32xf32>
    %397 = math.exp %396 : vector<2x32xf32>
    %cst_114 = arith.constant 1.000000e+00 : f32
    %398 = vector.broadcast %cst_114 : f32 to vector<2x32xf32>
    %399 = arith.addf %398, %397 : vector<2x32xf32>
    %400 = arith.divf %398, %399 : vector<2x32xf32>
    %401 = arith.mulf %392, %343 : vector<2x32xf32>
    %402 = arith.mulf %386, %394 : vector<2x32xf32>
    %403 = arith.addf %401, %402 : vector<2x32xf32>
    %404 = math.tanh %403 : vector<2x32xf32>
    %405 = arith.mulf %400, %404 : vector<2x32xf32>
    %406 = vector.extract_strided_slice %36 {offsets = [0, 0], sizes = [2, 128], strides = [1, 1]} : vector<2x256xf32> to vector<2x128xf32>
    %c0_115 = arith.constant 0 : index
    %c0_116 = arith.constant 0 : index
    %c0_117 = arith.constant 0 : index
    %407 = vector.load %arg2[%c0_115, %c0_116, %c0_117] : memref<2x32x128xf32, #tpu.memory_space<vmem>>, vector<1x32x128xf32>
    %408 = vector.shape_cast %407 : vector<1x32x128xf32> to vector<32x128xf32>
    %cst_118 = arith.constant dense<0.000000e+00> : vector<2x128xf32>
    %409 = tpu.matmul %375, %408, %cst_118 {dimension_numbers = #tpu.dot_dimension_numbers<[1], [0], [0], [1], [0, 0, 1, 1], [], []>} : vector<2x32xf32>, vector<32x128xf32>, vector<2x128xf32> -> vector<2x128xf32>
    %410 = arith.addf %406, %409 : vector<2x128xf32>
    %411 = vector.extract_strided_slice %410 {offsets = [0, 0], sizes = [2, 32], strides = [1, 1]} : vector<2x128xf32> to vector<2x32xf32>
    %412 = arith.negf %411 : vector<2x32xf32>
    %413 = math.exp %412 : vector<2x32xf32>
    %cst_119 = arith.constant 1.000000e+00 : f32
    %414 = vector.broadcast %cst_119 : f32 to vector<2x32xf32>
    %415 = arith.addf %414, %413 : vector<2x32xf32>
    %416 = arith.divf %414, %415 : vector<2x32xf32>
    %417 = vector.extract_strided_slice %410 {offsets = [0, 32], sizes = [2, 32], strides = [1, 1]} : vector<2x128xf32> to vector<2x32xf32>
    %418 = arith.negf %417 : vector<2x32xf32>
    %419 = math.exp %418 : vector<2x32xf32>
    %cst_120 = arith.constant 1.000000e+00 : f32
    %420 = vector.broadcast %cst_120 : f32 to vector<2x32xf32>
    %421 = arith.addf %420, %419 : vector<2x32xf32>
    %422 = arith.divf %420, %421 : vector<2x32xf32>
    %423 = vector.extract_strided_slice %410 {offsets = [0, 64], sizes = [2, 32], strides = [1, 1]} : vector<2x128xf32> to vector<2x32xf32>
    %424 = math.tanh %423 : vector<2x32xf32>
    %425 = vector.extract_strided_slice %410 {offsets = [0, 96], sizes = [2, 32], strides = [1, 1]} : vector<2x128xf32> to vector<2x32xf32>
    %426 = arith.negf %425 : vector<2x32xf32>
    %427 = math.exp %426 : vector<2x32xf32>
    %cst_121 = arith.constant 1.000000e+00 : f32
    %428 = vector.broadcast %cst_121 : f32 to vector<2x32xf32>
    %429 = arith.addf %428, %427 : vector<2x32xf32>
    %430 = arith.divf %428, %429 : vector<2x32xf32>
    %431 = arith.mulf %422, %373 : vector<2x32xf32>
    %432 = arith.mulf %416, %424 : vector<2x32xf32>
    %433 = arith.addf %431, %432 : vector<2x32xf32>
    %434 = math.tanh %433 : vector<2x32xf32>
    %435 = arith.mulf %430, %434 : vector<2x32xf32>
    %436 = vector.extract_strided_slice %11 {offsets = [0, 128], sizes = [2, 128], strides = [1, 1]} : vector<2x256xf32> to vector<2x128xf32>
    %c1_122 = arith.constant 1 : index
    %c0_123 = arith.constant 0 : index
    %c0_124 = arith.constant 0 : index
    %437 = vector.load %arg2[%c1_122, %c0_123, %c0_124] : memref<2x32x128xf32, #tpu.memory_space<vmem>>, vector<1x32x128xf32>
    %438 = vector.shape_cast %437 : vector<1x32x128xf32> to vector<32x128xf32>
    %cst_125 = arith.constant dense<0.000000e+00> : vector<2x128xf32>
    %439 = tpu.matmul %405, %438, %cst_125 {dimension_numbers = #tpu.dot_dimension_numbers<[1], [0], [0], [1], [0, 0, 1, 1], [], []>} : vector<2x32xf32>, vector<32x128xf32>, vector<2x128xf32> -> vector<2x128xf32>
    %440 = arith.addf %436, %439 : vector<2x128xf32>
    %441 = vector.extract_strided_slice %440 {offsets = [0, 0], sizes = [2, 32], strides = [1, 1]} : vector<2x128xf32> to vector<2x32xf32>
    %442 = arith.negf %441 : vector<2x32xf32>
    %443 = math.exp %442 : vector<2x32xf32>
    %cst_126 = arith.constant 1.000000e+00 : f32
    %444 = vector.broadcast %cst_126 : f32 to vector<2x32xf32>
    %445 = arith.addf %444, %443 : vector<2x32xf32>
    %446 = arith.divf %444, %445 : vector<2x32xf32>
    %447 = vector.extract_strided_slice %440 {offsets = [0, 32], sizes = [2, 32], strides = [1, 1]} : vector<2x128xf32> to vector<2x32xf32>
    %448 = arith.negf %447 : vector<2x32xf32>
    %449 = math.exp %448 : vector<2x32xf32>
    %cst_127 = arith.constant 1.000000e+00 : f32
    %450 = vector.broadcast %cst_127 : f32 to vector<2x32xf32>
    %451 = arith.addf %450, %449 : vector<2x32xf32>
    %452 = arith.divf %450, %451 : vector<2x32xf32>
    %453 = vector.extract_strided_slice %440 {offsets = [0, 64], sizes = [2, 32], strides = [1, 1]} : vector<2x128xf32> to vector<2x32xf32>
    %454 = math.tanh %453 : vector<2x32xf32>
    %455 = vector.extract_strided_slice %440 {offsets = [0, 96], sizes = [2, 32], strides = [1, 1]} : vector<2x128xf32> to vector<2x32xf32>
    %456 = arith.negf %455 : vector<2x32xf32>
    %457 = math.exp %456 : vector<2x32xf32>
    %cst_128 = arith.constant 1.000000e+00 : f32
    %458 = vector.broadcast %cst_128 : f32 to vector<2x32xf32>
    %459 = arith.addf %458, %457 : vector<2x32xf32>
    %460 = arith.divf %458, %459 : vector<2x32xf32>
    %461 = arith.mulf %452, %403 : vector<2x32xf32>
    %462 = arith.mulf %446, %454 : vector<2x32xf32>
    %463 = arith.addf %461, %462 : vector<2x32xf32>
    %464 = math.tanh %463 : vector<2x32xf32>
    %465 = arith.mulf %460, %464 : vector<2x32xf32>
    %466 = vector.extract_strided_slice %41 {offsets = [0, 0], sizes = [2, 128], strides = [1, 1]} : vector<2x256xf32> to vector<2x128xf32>
    %c0_129 = arith.constant 0 : index
    %c0_130 = arith.constant 0 : index
    %c0_131 = arith.constant 0 : index
    %467 = vector.load %arg2[%c0_129, %c0_130, %c0_131] : memref<2x32x128xf32, #tpu.memory_space<vmem>>, vector<1x32x128xf32>
    %468 = vector.shape_cast %467 : vector<1x32x128xf32> to vector<32x128xf32>
    %cst_132 = arith.constant dense<0.000000e+00> : vector<2x128xf32>
    %469 = tpu.matmul %435, %468, %cst_132 {dimension_numbers = #tpu.dot_dimension_numbers<[1], [0], [0], [1], [0, 0, 1, 1], [], []>} : vector<2x32xf32>, vector<32x128xf32>, vector<2x128xf32> -> vector<2x128xf32>
    %470 = arith.addf %466, %469 : vector<2x128xf32>
    %471 = vector.extract_strided_slice %470 {offsets = [0, 0], sizes = [2, 32], strides = [1, 1]} : vector<2x128xf32> to vector<2x32xf32>
    %472 = arith.negf %471 : vector<2x32xf32>
    %473 = math.exp %472 : vector<2x32xf32>
    %cst_133 = arith.constant 1.000000e+00 : f32
    %474 = vector.broadcast %cst_133 : f32 to vector<2x32xf32>
    %475 = arith.addf %474, %473 : vector<2x32xf32>
    %476 = arith.divf %474, %475 : vector<2x32xf32>
    %477 = vector.extract_strided_slice %470 {offsets = [0, 32], sizes = [2, 32], strides = [1, 1]} : vector<2x128xf32> to vector<2x32xf32>
    %478 = arith.negf %477 : vector<2x32xf32>
    %479 = math.exp %478 : vector<2x32xf32>
    %cst_134 = arith.constant 1.000000e+00 : f32
    %480 = vector.broadcast %cst_134 : f32 to vector<2x32xf32>
    %481 = arith.addf %480, %479 : vector<2x32xf32>
    %482 = arith.divf %480, %481 : vector<2x32xf32>
    %483 = vector.extract_strided_slice %470 {offsets = [0, 64], sizes = [2, 32], strides = [1, 1]} : vector<2x128xf32> to vector<2x32xf32>
    %484 = math.tanh %483 : vector<2x32xf32>
    %485 = vector.extract_strided_slice %470 {offsets = [0, 96], sizes = [2, 32], strides = [1, 1]} : vector<2x128xf32> to vector<2x32xf32>
    %486 = arith.negf %485 : vector<2x32xf32>
    %487 = math.exp %486 : vector<2x32xf32>
    %cst_135 = arith.constant 1.000000e+00 : f32
    %488 = vector.broadcast %cst_135 : f32 to vector<2x32xf32>
    %489 = arith.addf %488, %487 : vector<2x32xf32>
    %490 = arith.divf %488, %489 : vector<2x32xf32>
    %491 = arith.mulf %482, %433 : vector<2x32xf32>
    %492 = arith.mulf %476, %484 : vector<2x32xf32>
    %493 = arith.addf %491, %492 : vector<2x32xf32>
    %494 = math.tanh %493 : vector<2x32xf32>
    %495 = arith.mulf %490, %494 : vector<2x32xf32>
    %496 = vector.extract_strided_slice %6 {offsets = [0, 128], sizes = [2, 128], strides = [1, 1]} : vector<2x256xf32> to vector<2x128xf32>
    %c1_136 = arith.constant 1 : index
    %c0_137 = arith.constant 0 : index
    %c0_138 = arith.constant 0 : index
    %497 = vector.load %arg2[%c1_136, %c0_137, %c0_138] : memref<2x32x128xf32, #tpu.memory_space<vmem>>, vector<1x32x128xf32>
    %498 = vector.shape_cast %497 : vector<1x32x128xf32> to vector<32x128xf32>
    %cst_139 = arith.constant dense<0.000000e+00> : vector<2x128xf32>
    %499 = tpu.matmul %465, %498, %cst_139 {dimension_numbers = #tpu.dot_dimension_numbers<[1], [0], [0], [1], [0, 0, 1, 1], [], []>} : vector<2x32xf32>, vector<32x128xf32>, vector<2x128xf32> -> vector<2x128xf32>
    %500 = arith.addf %496, %499 : vector<2x128xf32>
    %501 = vector.extract_strided_slice %500 {offsets = [0, 0], sizes = [2, 32], strides = [1, 1]} : vector<2x128xf32> to vector<2x32xf32>
    %502 = arith.negf %501 : vector<2x32xf32>
    %503 = math.exp %502 : vector<2x32xf32>
    %cst_140 = arith.constant 1.000000e+00 : f32
    %504 = vector.broadcast %cst_140 : f32 to vector<2x32xf32>
    %505 = arith.addf %504, %503 : vector<2x32xf32>
    %506 = arith.divf %504, %505 : vector<2x32xf32>
    %507 = vector.extract_strided_slice %500 {offsets = [0, 32], sizes = [2, 32], strides = [1, 1]} : vector<2x128xf32> to vector<2x32xf32>
    %508 = arith.negf %507 : vector<2x32xf32>
    %509 = math.exp %508 : vector<2x32xf32>
    %cst_141 = arith.constant 1.000000e+00 : f32
    %510 = vector.broadcast %cst_141 : f32 to vector<2x32xf32>
    %511 = arith.addf %510, %509 : vector<2x32xf32>
    %512 = arith.divf %510, %511 : vector<2x32xf32>
    %513 = vector.extract_strided_slice %500 {offsets = [0, 64], sizes = [2, 32], strides = [1, 1]} : vector<2x128xf32> to vector<2x32xf32>
    %514 = math.tanh %513 : vector<2x32xf32>
    %515 = vector.extract_strided_slice %500 {offsets = [0, 96], sizes = [2, 32], strides = [1, 1]} : vector<2x128xf32> to vector<2x32xf32>
    %516 = arith.negf %515 : vector<2x32xf32>
    %517 = math.exp %516 : vector<2x32xf32>
    %cst_142 = arith.constant 1.000000e+00 : f32
    %518 = vector.broadcast %cst_142 : f32 to vector<2x32xf32>
    %519 = arith.addf %518, %517 : vector<2x32xf32>
    %520 = arith.divf %518, %519 : vector<2x32xf32>
    %521 = arith.mulf %512, %463 : vector<2x32xf32>
    %522 = arith.mulf %506, %514 : vector<2x32xf32>
    %523 = arith.addf %521, %522 : vector<2x32xf32>
    %524 = math.tanh %523 : vector<2x32xf32>
    %525 = arith.mulf %520, %524 : vector<2x32xf32>
    %c0_143 = arith.constant 0 : index
    %c0_144 = arith.constant 0 : index
    %526 = vector.load %arg6[%c0_143, %c0_144] : memref<1x256xf32, #tpu.memory_space<vmem>>, vector<1x256xf32>
    %c0_145 = arith.constant 0 : index
    %c0_146 = arith.constant 0 : index
    %527 = vector.load %arg4[%c0_145, %c0_146] : memref<64x256xf32, #tpu.memory_space<vmem>>, vector<32x256xf32>
    %c32 = arith.constant 32 : index
    %c0_147 = arith.constant 0 : index
    %528 = vector.load %arg4[%c32, %c0_147] : memref<64x256xf32, #tpu.memory_space<vmem>>, vector<32x256xf32>
    %cst_148 = arith.constant dense<0.000000e+00> : vector<2x256xf32>
    %529 = tpu.matmul %75, %527, %cst_148 {dimension_numbers = #tpu.dot_dimension_numbers<[1], [0], [0], [1], [0, 0, 1, 1], [], []>} : vector<2x32xf32>, vector<32x256xf32>, vector<2x256xf32> -> vector<2x256xf32>
    %530 = vector.broadcast %526 : vector<1x256xf32> to vector<2x256xf32>
    %531 = arith.addf %530, %529 : vector<2x256xf32>
    %cst_149 = arith.constant dense<0.000000e+00> : vector<2x256xf32>
    %532 = tpu.matmul %525, %528, %cst_149 {dimension_numbers = #tpu.dot_dimension_numbers<[1], [0], [0], [1], [0, 0, 1, 1], [], []>} : vector<2x32xf32>, vector<32x256xf32>, vector<2x256xf32> -> vector<2x256xf32>
    %533 = arith.addf %531, %532 : vector<2x256xf32>
    %cst_150 = arith.constant dense<0.000000e+00> : vector<2x256xf32>
    %534 = tpu.matmul %135, %527, %cst_150 {dimension_numbers = #tpu.dot_dimension_numbers<[1], [0], [0], [1], [0, 0, 1, 1], [], []>} : vector<2x32xf32>, vector<32x256xf32>, vector<2x256xf32> -> vector<2x256xf32>
    %535 = vector.broadcast %526 : vector<1x256xf32> to vector<2x256xf32>
    %536 = arith.addf %535, %534 : vector<2x256xf32>
    %cst_151 = arith.constant dense<0.000000e+00> : vector<2x256xf32>
    %537 = tpu.matmul %465, %528, %cst_151 {dimension_numbers = #tpu.dot_dimension_numbers<[1], [0], [0], [1], [0, 0, 1, 1], [], []>} : vector<2x32xf32>, vector<32x256xf32>, vector<2x256xf32> -> vector<2x256xf32>
    %538 = arith.addf %536, %537 : vector<2x256xf32>
    %cst_152 = arith.constant dense<0.000000e+00> : vector<2x256xf32>
    %539 = tpu.matmul %195, %527, %cst_152 {dimension_numbers = #tpu.dot_dimension_numbers<[1], [0], [0], [1], [0, 0, 1, 1], [], []>} : vector<2x32xf32>, vector<32x256xf32>, vector<2x256xf32> -> vector<2x256xf32>
    %540 = vector.broadcast %526 : vector<1x256xf32> to vector<2x256xf32>
    %541 = arith.addf %540, %539 : vector<2x256xf32>
    %cst_153 = arith.constant dense<0.000000e+00> : vector<2x256xf32>
    %542 = tpu.matmul %405, %528, %cst_153 {dimension_numbers = #tpu.dot_dimension_numbers<[1], [0], [0], [1], [0, 0, 1, 1], [], []>} : vector<2x32xf32>, vector<32x256xf32>, vector<2x256xf32> -> vector<2x256xf32>
    %543 = arith.addf %541, %542 : vector<2x256xf32>
    %cst_154 = arith.constant dense<0.000000e+00> : vector<2x256xf32>
    %544 = tpu.matmul %255, %527, %cst_154 {dimension_numbers = #tpu.dot_dimension_numbers<[1], [0], [0], [1], [0, 0, 1, 1], [], []>} : vector<2x32xf32>, vector<32x256xf32>, vector<2x256xf32> -> vector<2x256xf32>
    %545 = vector.broadcast %526 : vector<1x256xf32> to vector<2x256xf32>
    %546 = arith.addf %545, %544 : vector<2x256xf32>
    %cst_155 = arith.constant dense<0.000000e+00> : vector<2x256xf32>
    %547 = tpu.matmul %345, %528, %cst_155 {dimension_numbers = #tpu.dot_dimension_numbers<[1], [0], [0], [1], [0, 0, 1, 1], [], []>} : vector<2x32xf32>, vector<32x256xf32>, vector<2x256xf32> -> vector<2x256xf32>
    %548 = arith.addf %546, %547 : vector<2x256xf32>
    %cst_156 = arith.constant dense<0.000000e+00> : vector<2x256xf32>
    %549 = tpu.matmul %315, %527, %cst_156 {dimension_numbers = #tpu.dot_dimension_numbers<[1], [0], [0], [1], [0, 0, 1, 1], [], []>} : vector<2x32xf32>, vector<32x256xf32>, vector<2x256xf32> -> vector<2x256xf32>
    %550 = vector.broadcast %526 : vector<1x256xf32> to vector<2x256xf32>
    %551 = arith.addf %550, %549 : vector<2x256xf32>
    %cst_157 = arith.constant dense<0.000000e+00> : vector<2x256xf32>
    %552 = tpu.matmul %285, %528, %cst_157 {dimension_numbers = #tpu.dot_dimension_numbers<[1], [0], [0], [1], [0, 0, 1, 1], [], []>} : vector<2x32xf32>, vector<32x256xf32>, vector<2x256xf32> -> vector<2x256xf32>
    %553 = arith.addf %551, %552 : vector<2x256xf32>
    %cst_158 = arith.constant dense<0.000000e+00> : vector<2x256xf32>
    %554 = tpu.matmul %375, %527, %cst_158 {dimension_numbers = #tpu.dot_dimension_numbers<[1], [0], [0], [1], [0, 0, 1, 1], [], []>} : vector<2x32xf32>, vector<32x256xf32>, vector<2x256xf32> -> vector<2x256xf32>
    %555 = vector.broadcast %526 : vector<1x256xf32> to vector<2x256xf32>
    %556 = arith.addf %555, %554 : vector<2x256xf32>
    %cst_159 = arith.constant dense<0.000000e+00> : vector<2x256xf32>
    %557 = tpu.matmul %225, %528, %cst_159 {dimension_numbers = #tpu.dot_dimension_numbers<[1], [0], [0], [1], [0, 0, 1, 1], [], []>} : vector<2x32xf32>, vector<32x256xf32>, vector<2x256xf32> -> vector<2x256xf32>
    %558 = arith.addf %556, %557 : vector<2x256xf32>
    %cst_160 = arith.constant dense<0.000000e+00> : vector<2x256xf32>
    %559 = tpu.matmul %435, %527, %cst_160 {dimension_numbers = #tpu.dot_dimension_numbers<[1], [0], [0], [1], [0, 0, 1, 1], [], []>} : vector<2x32xf32>, vector<32x256xf32>, vector<2x256xf32> -> vector<2x256xf32>
    %560 = vector.broadcast %526 : vector<1x256xf32> to vector<2x256xf32>
    %561 = arith.addf %560, %559 : vector<2x256xf32>
    %cst_161 = arith.constant dense<0.000000e+00> : vector<2x256xf32>
    %562 = tpu.matmul %165, %528, %cst_161 {dimension_numbers = #tpu.dot_dimension_numbers<[1], [0], [0], [1], [0, 0, 1, 1], [], []>} : vector<2x32xf32>, vector<32x256xf32>, vector<2x256xf32> -> vector<2x256xf32>
    %563 = arith.addf %561, %562 : vector<2x256xf32>
    %cst_162 = arith.constant dense<0.000000e+00> : vector<2x256xf32>
    %564 = tpu.matmul %495, %527, %cst_162 {dimension_numbers = #tpu.dot_dimension_numbers<[1], [0], [0], [1], [0, 0, 1, 1], [], []>} : vector<2x32xf32>, vector<32x256xf32>, vector<2x256xf32> -> vector<2x256xf32>
    %565 = vector.broadcast %526 : vector<1x256xf32> to vector<2x256xf32>
    %566 = arith.addf %565, %564 : vector<2x256xf32>
    %cst_163 = arith.constant dense<0.000000e+00> : vector<2x256xf32>
    %567 = tpu.matmul %105, %528, %cst_163 {dimension_numbers = #tpu.dot_dimension_numbers<[1], [0], [0], [1], [0, 0, 1, 1], [], []>} : vector<2x32xf32>, vector<32x256xf32>, vector<2x256xf32> -> vector<2x256xf32>
    %568 = arith.addf %566, %567 : vector<2x256xf32>
    %cst_164 = arith.constant 0.000000e+00 : f32
    %569 = vector.broadcast %cst_164 : f32 to vector<2x32xf32>
    %cst_165 = arith.constant 0.000000e+00 : f32
    %570 = vector.broadcast %cst_165 : f32 to vector<2x32xf32>
    %cst_166 = arith.constant 0.000000e+00 : f32
    %571 = vector.broadcast %cst_166 : f32 to vector<2x32xf32>
    %cst_167 = arith.constant 0.000000e+00 : f32
    %572 = vector.broadcast %cst_167 : f32 to vector<2x32xf32>
    %573 = vector.extract_strided_slice %533 {offsets = [0, 0], sizes = [2, 128], strides = [1, 1]} : vector<2x256xf32> to vector<2x128xf32>
    %c0_168 = arith.constant 0 : index
    %c0_169 = arith.constant 0 : index
    %c0_170 = arith.constant 0 : index
    %574 = vector.load %arg5[%c0_168, %c0_169, %c0_170] : memref<2x32x128xf32, #tpu.memory_space<vmem>>, vector<1x32x128xf32>
    %575 = vector.shape_cast %574 : vector<1x32x128xf32> to vector<32x128xf32>
    %cst_171 = arith.constant dense<0.000000e+00> : vector<2x128xf32>
    %576 = tpu.matmul %569, %575, %cst_171 {dimension_numbers = #tpu.dot_dimension_numbers<[1], [0], [0], [1], [0, 0, 1, 1], [], []>} : vector<2x32xf32>, vector<32x128xf32>, vector<2x128xf32> -> vector<2x128xf32>
    %577 = arith.addf %573, %576 : vector<2x128xf32>
    %578 = vector.extract_strided_slice %577 {offsets = [0, 0], sizes = [2, 32], strides = [1, 1]} : vector<2x128xf32> to vector<2x32xf32>
    %579 = arith.negf %578 : vector<2x32xf32>
    %580 = math.exp %579 : vector<2x32xf32>
    %cst_172 = arith.constant 1.000000e+00 : f32
    %581 = vector.broadcast %cst_172 : f32 to vector<2x32xf32>
    %582 = arith.addf %581, %580 : vector<2x32xf32>
    %583 = arith.divf %581, %582 : vector<2x32xf32>
    %584 = vector.extract_strided_slice %577 {offsets = [0, 32], sizes = [2, 32], strides = [1, 1]} : vector<2x128xf32> to vector<2x32xf32>
    %585 = arith.negf %584 : vector<2x32xf32>
    %586 = math.exp %585 : vector<2x32xf32>
    %cst_173 = arith.constant 1.000000e+00 : f32
    %587 = vector.broadcast %cst_173 : f32 to vector<2x32xf32>
    %588 = arith.addf %587, %586 : vector<2x32xf32>
    %589 = arith.divf %587, %588 : vector<2x32xf32>
    %590 = vector.extract_strided_slice %577 {offsets = [0, 64], sizes = [2, 32], strides = [1, 1]} : vector<2x128xf32> to vector<2x32xf32>
    %591 = math.tanh %590 : vector<2x32xf32>
    %592 = vector.extract_strided_slice %577 {offsets = [0, 96], sizes = [2, 32], strides = [1, 1]} : vector<2x128xf32> to vector<2x32xf32>
    %593 = arith.negf %592 : vector<2x32xf32>
    %594 = math.exp %593 : vector<2x32xf32>
    %cst_174 = arith.constant 1.000000e+00 : f32
    %595 = vector.broadcast %cst_174 : f32 to vector<2x32xf32>
    %596 = arith.addf %595, %594 : vector<2x32xf32>
    %597 = arith.divf %595, %596 : vector<2x32xf32>
    %598 = arith.mulf %589, %571 : vector<2x32xf32>
    %599 = arith.mulf %583, %591 : vector<2x32xf32>
    %600 = arith.addf %598, %599 : vector<2x32xf32>
    %601 = math.tanh %600 : vector<2x32xf32>
    %602 = arith.mulf %597, %601 : vector<2x32xf32>
    %603 = vector.extract_strided_slice %568 {offsets = [0, 128], sizes = [2, 128], strides = [1, 1]} : vector<2x256xf32> to vector<2x128xf32>
    %c1_175 = arith.constant 1 : index
    %c0_176 = arith.constant 0 : index
    %c0_177 = arith.constant 0 : index
    %604 = vector.load %arg5[%c1_175, %c0_176, %c0_177] : memref<2x32x128xf32, #tpu.memory_space<vmem>>, vector<1x32x128xf32>
    %605 = vector.shape_cast %604 : vector<1x32x128xf32> to vector<32x128xf32>
    %cst_178 = arith.constant dense<0.000000e+00> : vector<2x128xf32>
    %606 = tpu.matmul %570, %605, %cst_178 {dimension_numbers = #tpu.dot_dimension_numbers<[1], [0], [0], [1], [0, 0, 1, 1], [], []>} : vector<2x32xf32>, vector<32x128xf32>, vector<2x128xf32> -> vector<2x128xf32>
    %607 = arith.addf %603, %606 : vector<2x128xf32>
    %608 = vector.extract_strided_slice %607 {offsets = [0, 0], sizes = [2, 32], strides = [1, 1]} : vector<2x128xf32> to vector<2x32xf32>
    %609 = arith.negf %608 : vector<2x32xf32>
    %610 = math.exp %609 : vector<2x32xf32>
    %cst_179 = arith.constant 1.000000e+00 : f32
    %611 = vector.broadcast %cst_179 : f32 to vector<2x32xf32>
    %612 = arith.addf %611, %610 : vector<2x32xf32>
    %613 = arith.divf %611, %612 : vector<2x32xf32>
    %614 = vector.extract_strided_slice %607 {offsets = [0, 32], sizes = [2, 32], strides = [1, 1]} : vector<2x128xf32> to vector<2x32xf32>
    %615 = arith.negf %614 : vector<2x32xf32>
    %616 = math.exp %615 : vector<2x32xf32>
    %cst_180 = arith.constant 1.000000e+00 : f32
    %617 = vector.broadcast %cst_180 : f32 to vector<2x32xf32>
    %618 = arith.addf %617, %616 : vector<2x32xf32>
    %619 = arith.divf %617, %618 : vector<2x32xf32>
    %620 = vector.extract_strided_slice %607 {offsets = [0, 64], sizes = [2, 32], strides = [1, 1]} : vector<2x128xf32> to vector<2x32xf32>
    %621 = math.tanh %620 : vector<2x32xf32>
    %622 = vector.extract_strided_slice %607 {offsets = [0, 96], sizes = [2, 32], strides = [1, 1]} : vector<2x128xf32> to vector<2x32xf32>
    %623 = arith.negf %622 : vector<2x32xf32>
    %624 = math.exp %623 : vector<2x32xf32>
    %cst_181 = arith.constant 1.000000e+00 : f32
    %625 = vector.broadcast %cst_181 : f32 to vector<2x32xf32>
    %626 = arith.addf %625, %624 : vector<2x32xf32>
    %627 = arith.divf %625, %626 : vector<2x32xf32>
    %628 = arith.mulf %619, %572 : vector<2x32xf32>
    %629 = arith.mulf %613, %621 : vector<2x32xf32>
    %630 = arith.addf %628, %629 : vector<2x32xf32>
    %631 = math.tanh %630 : vector<2x32xf32>
    %632 = arith.mulf %627, %631 : vector<2x32xf32>
    %633 = vector.extract_strided_slice %538 {offsets = [0, 0], sizes = [2, 128], strides = [1, 1]} : vector<2x256xf32> to vector<2x128xf32>
    %c0_182 = arith.constant 0 : index
    %c0_183 = arith.constant 0 : index
    %c0_184 = arith.constant 0 : index
    %634 = vector.load %arg5[%c0_182, %c0_183, %c0_184] : memref<2x32x128xf32, #tpu.memory_space<vmem>>, vector<1x32x128xf32>
    %635 = vector.shape_cast %634 : vector<1x32x128xf32> to vector<32x128xf32>
    %cst_185 = arith.constant dense<0.000000e+00> : vector<2x128xf32>
    %636 = tpu.matmul %602, %635, %cst_185 {dimension_numbers = #tpu.dot_dimension_numbers<[1], [0], [0], [1], [0, 0, 1, 1], [], []>} : vector<2x32xf32>, vector<32x128xf32>, vector<2x128xf32> -> vector<2x128xf32>
    %637 = arith.addf %633, %636 : vector<2x128xf32>
    %638 = vector.extract_strided_slice %637 {offsets = [0, 0], sizes = [2, 32], strides = [1, 1]} : vector<2x128xf32> to vector<2x32xf32>
    %639 = arith.negf %638 : vector<2x32xf32>
    %640 = math.exp %639 : vector<2x32xf32>
    %cst_186 = arith.constant 1.000000e+00 : f32
    %641 = vector.broadcast %cst_186 : f32 to vector<2x32xf32>
    %642 = arith.addf %641, %640 : vector<2x32xf32>
    %643 = arith.divf %641, %642 : vector<2x32xf32>
    %644 = vector.extract_strided_slice %637 {offsets = [0, 32], sizes = [2, 32], strides = [1, 1]} : vector<2x128xf32> to vector<2x32xf32>
    %645 = arith.negf %644 : vector<2x32xf32>
    %646 = math.exp %645 : vector<2x32xf32>
    %cst_187 = arith.constant 1.000000e+00 : f32
    %647 = vector.broadcast %cst_187 : f32 to vector<2x32xf32>
    %648 = arith.addf %647, %646 : vector<2x32xf32>
    %649 = arith.divf %647, %648 : vector<2x32xf32>
    %650 = vector.extract_strided_slice %637 {offsets = [0, 64], sizes = [2, 32], strides = [1, 1]} : vector<2x128xf32> to vector<2x32xf32>
    %651 = math.tanh %650 : vector<2x32xf32>
    %652 = vector.extract_strided_slice %637 {offsets = [0, 96], sizes = [2, 32], strides = [1, 1]} : vector<2x128xf32> to vector<2x32xf32>
    %653 = arith.negf %652 : vector<2x32xf32>
    %654 = math.exp %653 : vector<2x32xf32>
    %cst_188 = arith.constant 1.000000e+00 : f32
    %655 = vector.broadcast %cst_188 : f32 to vector<2x32xf32>
    %656 = arith.addf %655, %654 : vector<2x32xf32>
    %657 = arith.divf %655, %656 : vector<2x32xf32>
    %658 = arith.mulf %649, %600 : vector<2x32xf32>
    %659 = arith.mulf %643, %651 : vector<2x32xf32>
    %660 = arith.addf %658, %659 : vector<2x32xf32>
    %661 = math.tanh %660 : vector<2x32xf32>
    %662 = arith.mulf %657, %661 : vector<2x32xf32>
    %663 = vector.extract_strided_slice %563 {offsets = [0, 128], sizes = [2, 128], strides = [1, 1]} : vector<2x256xf32> to vector<2x128xf32>
    %c1_189 = arith.constant 1 : index
    %c0_190 = arith.constant 0 : index
    %c0_191 = arith.constant 0 : index
    %664 = vector.load %arg5[%c1_189, %c0_190, %c0_191] : memref<2x32x128xf32, #tpu.memory_space<vmem>>, vector<1x32x128xf32>
    %665 = vector.shape_cast %664 : vector<1x32x128xf32> to vector<32x128xf32>
    %cst_192 = arith.constant dense<0.000000e+00> : vector<2x128xf32>
    %666 = tpu.matmul %632, %665, %cst_192 {dimension_numbers = #tpu.dot_dimension_numbers<[1], [0], [0], [1], [0, 0, 1, 1], [], []>} : vector<2x32xf32>, vector<32x128xf32>, vector<2x128xf32> -> vector<2x128xf32>
    %667 = arith.addf %663, %666 : vector<2x128xf32>
    %668 = vector.extract_strided_slice %667 {offsets = [0, 0], sizes = [2, 32], strides = [1, 1]} : vector<2x128xf32> to vector<2x32xf32>
    %669 = arith.negf %668 : vector<2x32xf32>
    %670 = math.exp %669 : vector<2x32xf32>
    %cst_193 = arith.constant 1.000000e+00 : f32
    %671 = vector.broadcast %cst_193 : f32 to vector<2x32xf32>
    %672 = arith.addf %671, %670 : vector<2x32xf32>
    %673 = arith.divf %671, %672 : vector<2x32xf32>
    %674 = vector.extract_strided_slice %667 {offsets = [0, 32], sizes = [2, 32], strides = [1, 1]} : vector<2x128xf32> to vector<2x32xf32>
    %675 = arith.negf %674 : vector<2x32xf32>
    %676 = math.exp %675 : vector<2x32xf32>
    %cst_194 = arith.constant 1.000000e+00 : f32
    %677 = vector.broadcast %cst_194 : f32 to vector<2x32xf32>
    %678 = arith.addf %677, %676 : vector<2x32xf32>
    %679 = arith.divf %677, %678 : vector<2x32xf32>
    %680 = vector.extract_strided_slice %667 {offsets = [0, 64], sizes = [2, 32], strides = [1, 1]} : vector<2x128xf32> to vector<2x32xf32>
    %681 = math.tanh %680 : vector<2x32xf32>
    %682 = vector.extract_strided_slice %667 {offsets = [0, 96], sizes = [2, 32], strides = [1, 1]} : vector<2x128xf32> to vector<2x32xf32>
    %683 = arith.negf %682 : vector<2x32xf32>
    %684 = math.exp %683 : vector<2x32xf32>
    %cst_195 = arith.constant 1.000000e+00 : f32
    %685 = vector.broadcast %cst_195 : f32 to vector<2x32xf32>
    %686 = arith.addf %685, %684 : vector<2x32xf32>
    %687 = arith.divf %685, %686 : vector<2x32xf32>
    %688 = arith.mulf %679, %630 : vector<2x32xf32>
    %689 = arith.mulf %673, %681 : vector<2x32xf32>
    %690 = arith.addf %688, %689 : vector<2x32xf32>
    %691 = math.tanh %690 : vector<2x32xf32>
    %692 = arith.mulf %687, %691 : vector<2x32xf32>
    %693 = vector.extract_strided_slice %543 {offsets = [0, 0], sizes = [2, 128], strides = [1, 1]} : vector<2x256xf32> to vector<2x128xf32>
    %c0_196 = arith.constant 0 : index
    %c0_197 = arith.constant 0 : index
    %c0_198 = arith.constant 0 : index
    %694 = vector.load %arg5[%c0_196, %c0_197, %c0_198] : memref<2x32x128xf32, #tpu.memory_space<vmem>>, vector<1x32x128xf32>
    %695 = vector.shape_cast %694 : vector<1x32x128xf32> to vector<32x128xf32>
    %cst_199 = arith.constant dense<0.000000e+00> : vector<2x128xf32>
    %696 = tpu.matmul %662, %695, %cst_199 {dimension_numbers = #tpu.dot_dimension_numbers<[1], [0], [0], [1], [0, 0, 1, 1], [], []>} : vector<2x32xf32>, vector<32x128xf32>, vector<2x128xf32> -> vector<2x128xf32>
    %697 = arith.addf %693, %696 : vector<2x128xf32>
    %698 = vector.extract_strided_slice %697 {offsets = [0, 0], sizes = [2, 32], strides = [1, 1]} : vector<2x128xf32> to vector<2x32xf32>
    %699 = arith.negf %698 : vector<2x32xf32>
    %700 = math.exp %699 : vector<2x32xf32>
    %cst_200 = arith.constant 1.000000e+00 : f32
    %701 = vector.broadcast %cst_200 : f32 to vector<2x32xf32>
    %702 = arith.addf %701, %700 : vector<2x32xf32>
    %703 = arith.divf %701, %702 : vector<2x32xf32>
    %704 = vector.extract_strided_slice %697 {offsets = [0, 32], sizes = [2, 32], strides = [1, 1]} : vector<2x128xf32> to vector<2x32xf32>
    %705 = arith.negf %704 : vector<2x32xf32>
    %706 = math.exp %705 : vector<2x32xf32>
    %cst_201 = arith.constant 1.000000e+00 : f32
    %707 = vector.broadcast %cst_201 : f32 to vector<2x32xf32>
    %708 = arith.addf %707, %706 : vector<2x32xf32>
    %709 = arith.divf %707, %708 : vector<2x32xf32>
    %710 = vector.extract_strided_slice %697 {offsets = [0, 64], sizes = [2, 32], strides = [1, 1]} : vector<2x128xf32> to vector<2x32xf32>
    %711 = math.tanh %710 : vector<2x32xf32>
    %712 = vector.extract_strided_slice %697 {offsets = [0, 96], sizes = [2, 32], strides = [1, 1]} : vector<2x128xf32> to vector<2x32xf32>
    %713 = arith.negf %712 : vector<2x32xf32>
    %714 = math.exp %713 : vector<2x32xf32>
    %cst_202 = arith.constant 1.000000e+00 : f32
    %715 = vector.broadcast %cst_202 : f32 to vector<2x32xf32>
    %716 = arith.addf %715, %714 : vector<2x32xf32>
    %717 = arith.divf %715, %716 : vector<2x32xf32>
    %718 = arith.mulf %709, %660 : vector<2x32xf32>
    %719 = arith.mulf %703, %711 : vector<2x32xf32>
    %720 = arith.addf %718, %719 : vector<2x32xf32>
    %721 = math.tanh %720 : vector<2x32xf32>
    %722 = arith.mulf %717, %721 : vector<2x32xf32>
    %723 = vector.extract_strided_slice %558 {offsets = [0, 128], sizes = [2, 128], strides = [1, 1]} : vector<2x256xf32> to vector<2x128xf32>
    %c1_203 = arith.constant 1 : index
    %c0_204 = arith.constant 0 : index
    %c0_205 = arith.constant 0 : index
    %724 = vector.load %arg5[%c1_203, %c0_204, %c0_205] : memref<2x32x128xf32, #tpu.memory_space<vmem>>, vector<1x32x128xf32>
    %725 = vector.shape_cast %724 : vector<1x32x128xf32> to vector<32x128xf32>
    %cst_206 = arith.constant dense<0.000000e+00> : vector<2x128xf32>
    %726 = tpu.matmul %692, %725, %cst_206 {dimension_numbers = #tpu.dot_dimension_numbers<[1], [0], [0], [1], [0, 0, 1, 1], [], []>} : vector<2x32xf32>, vector<32x128xf32>, vector<2x128xf32> -> vector<2x128xf32>
    %727 = arith.addf %723, %726 : vector<2x128xf32>
    %728 = vector.extract_strided_slice %727 {offsets = [0, 0], sizes = [2, 32], strides = [1, 1]} : vector<2x128xf32> to vector<2x32xf32>
    %729 = arith.negf %728 : vector<2x32xf32>
    %730 = math.exp %729 : vector<2x32xf32>
    %cst_207 = arith.constant 1.000000e+00 : f32
    %731 = vector.broadcast %cst_207 : f32 to vector<2x32xf32>
    %732 = arith.addf %731, %730 : vector<2x32xf32>
    %733 = arith.divf %731, %732 : vector<2x32xf32>
    %734 = vector.extract_strided_slice %727 {offsets = [0, 32], sizes = [2, 32], strides = [1, 1]} : vector<2x128xf32> to vector<2x32xf32>
    %735 = arith.negf %734 : vector<2x32xf32>
    %736 = math.exp %735 : vector<2x32xf32>
    %cst_208 = arith.constant 1.000000e+00 : f32
    %737 = vector.broadcast %cst_208 : f32 to vector<2x32xf32>
    %738 = arith.addf %737, %736 : vector<2x32xf32>
    %739 = arith.divf %737, %738 : vector<2x32xf32>
    %740 = vector.extract_strided_slice %727 {offsets = [0, 64], sizes = [2, 32], strides = [1, 1]} : vector<2x128xf32> to vector<2x32xf32>
    %741 = math.tanh %740 : vector<2x32xf32>
    %742 = vector.extract_strided_slice %727 {offsets = [0, 96], sizes = [2, 32], strides = [1, 1]} : vector<2x128xf32> to vector<2x32xf32>
    %743 = arith.negf %742 : vector<2x32xf32>
    %744 = math.exp %743 : vector<2x32xf32>
    %cst_209 = arith.constant 1.000000e+00 : f32
    %745 = vector.broadcast %cst_209 : f32 to vector<2x32xf32>
    %746 = arith.addf %745, %744 : vector<2x32xf32>
    %747 = arith.divf %745, %746 : vector<2x32xf32>
    %748 = arith.mulf %739, %690 : vector<2x32xf32>
    %749 = arith.mulf %733, %741 : vector<2x32xf32>
    %750 = arith.addf %748, %749 : vector<2x32xf32>
    %751 = math.tanh %750 : vector<2x32xf32>
    %752 = arith.mulf %747, %751 : vector<2x32xf32>
    %753 = vector.extract_strided_slice %548 {offsets = [0, 0], sizes = [2, 128], strides = [1, 1]} : vector<2x256xf32> to vector<2x128xf32>
    %c0_210 = arith.constant 0 : index
    %c0_211 = arith.constant 0 : index
    %c0_212 = arith.constant 0 : index
    %754 = vector.load %arg5[%c0_210, %c0_211, %c0_212] : memref<2x32x128xf32, #tpu.memory_space<vmem>>, vector<1x32x128xf32>
    %755 = vector.shape_cast %754 : vector<1x32x128xf32> to vector<32x128xf32>
    %cst_213 = arith.constant dense<0.000000e+00> : vector<2x128xf32>
    %756 = tpu.matmul %722, %755, %cst_213 {dimension_numbers = #tpu.dot_dimension_numbers<[1], [0], [0], [1], [0, 0, 1, 1], [], []>} : vector<2x32xf32>, vector<32x128xf32>, vector<2x128xf32> -> vector<2x128xf32>
    %757 = arith.addf %753, %756 : vector<2x128xf32>
    %758 = vector.extract_strided_slice %757 {offsets = [0, 0], sizes = [2, 32], strides = [1, 1]} : vector<2x128xf32> to vector<2x32xf32>
    %759 = arith.negf %758 : vector<2x32xf32>
    %760 = math.exp %759 : vector<2x32xf32>
    %cst_214 = arith.constant 1.000000e+00 : f32
    %761 = vector.broadcast %cst_214 : f32 to vector<2x32xf32>
    %762 = arith.addf %761, %760 : vector<2x32xf32>
    %763 = arith.divf %761, %762 : vector<2x32xf32>
    %764 = vector.extract_strided_slice %757 {offsets = [0, 32], sizes = [2, 32], strides = [1, 1]} : vector<2x128xf32> to vector<2x32xf32>
    %765 = arith.negf %764 : vector<2x32xf32>
    %766 = math.exp %765 : vector<2x32xf32>
    %cst_215 = arith.constant 1.000000e+00 : f32
    %767 = vector.broadcast %cst_215 : f32 to vector<2x32xf32>
    %768 = arith.addf %767, %766 : vector<2x32xf32>
    %769 = arith.divf %767, %768 : vector<2x32xf32>
    %770 = vector.extract_strided_slice %757 {offsets = [0, 64], sizes = [2, 32], strides = [1, 1]} : vector<2x128xf32> to vector<2x32xf32>
    %771 = math.tanh %770 : vector<2x32xf32>
    %772 = vector.extract_strided_slice %757 {offsets = [0, 96], sizes = [2, 32], strides = [1, 1]} : vector<2x128xf32> to vector<2x32xf32>
    %773 = arith.negf %772 : vector<2x32xf32>
    %774 = math.exp %773 : vector<2x32xf32>
    %cst_216 = arith.constant 1.000000e+00 : f32
    %775 = vector.broadcast %cst_216 : f32 to vector<2x32xf32>
    %776 = arith.addf %775, %774 : vector<2x32xf32>
    %777 = arith.divf %775, %776 : vector<2x32xf32>
    %778 = arith.mulf %769, %720 : vector<2x32xf32>
    %779 = arith.mulf %763, %771 : vector<2x32xf32>
    %780 = arith.addf %778, %779 : vector<2x32xf32>
    %781 = math.tanh %780 : vector<2x32xf32>
    %782 = arith.mulf %777, %781 : vector<2x32xf32>
    %783 = vector.extract_strided_slice %553 {offsets = [0, 128], sizes = [2, 128], strides = [1, 1]} : vector<2x256xf32> to vector<2x128xf32>
    %c1_217 = arith.constant 1 : index
    %c0_218 = arith.constant 0 : index
    %c0_219 = arith.constant 0 : index
    %784 = vector.load %arg5[%c1_217, %c0_218, %c0_219] : memref<2x32x128xf32, #tpu.memory_space<vmem>>, vector<1x32x128xf32>
    %785 = vector.shape_cast %784 : vector<1x32x128xf32> to vector<32x128xf32>
    %cst_220 = arith.constant dense<0.000000e+00> : vector<2x128xf32>
    %786 = tpu.matmul %752, %785, %cst_220 {dimension_numbers = #tpu.dot_dimension_numbers<[1], [0], [0], [1], [0, 0, 1, 1], [], []>} : vector<2x32xf32>, vector<32x128xf32>, vector<2x128xf32> -> vector<2x128xf32>
    %787 = arith.addf %783, %786 : vector<2x128xf32>
    %788 = vector.extract_strided_slice %787 {offsets = [0, 0], sizes = [2, 32], strides = [1, 1]} : vector<2x128xf32> to vector<2x32xf32>
    %789 = arith.negf %788 : vector<2x32xf32>
    %790 = math.exp %789 : vector<2x32xf32>
    %cst_221 = arith.constant 1.000000e+00 : f32
    %791 = vector.broadcast %cst_221 : f32 to vector<2x32xf32>
    %792 = arith.addf %791, %790 : vector<2x32xf32>
    %793 = arith.divf %791, %792 : vector<2x32xf32>
    %794 = vector.extract_strided_slice %787 {offsets = [0, 32], sizes = [2, 32], strides = [1, 1]} : vector<2x128xf32> to vector<2x32xf32>
    %795 = arith.negf %794 : vector<2x32xf32>
    %796 = math.exp %795 : vector<2x32xf32>
    %cst_222 = arith.constant 1.000000e+00 : f32
    %797 = vector.broadcast %cst_222 : f32 to vector<2x32xf32>
    %798 = arith.addf %797, %796 : vector<2x32xf32>
    %799 = arith.divf %797, %798 : vector<2x32xf32>
    %800 = vector.extract_strided_slice %787 {offsets = [0, 64], sizes = [2, 32], strides = [1, 1]} : vector<2x128xf32> to vector<2x32xf32>
    %801 = math.tanh %800 : vector<2x32xf32>
    %802 = vector.extract_strided_slice %787 {offsets = [0, 96], sizes = [2, 32], strides = [1, 1]} : vector<2x128xf32> to vector<2x32xf32>
    %803 = arith.negf %802 : vector<2x32xf32>
    %804 = math.exp %803 : vector<2x32xf32>
    %cst_223 = arith.constant 1.000000e+00 : f32
    %805 = vector.broadcast %cst_223 : f32 to vector<2x32xf32>
    %806 = arith.addf %805, %804 : vector<2x32xf32>
    %807 = arith.divf %805, %806 : vector<2x32xf32>
    %808 = arith.mulf %799, %750 : vector<2x32xf32>
    %809 = arith.mulf %793, %801 : vector<2x32xf32>
    %810 = arith.addf %808, %809 : vector<2x32xf32>
    %811 = math.tanh %810 : vector<2x32xf32>
    %812 = arith.mulf %807, %811 : vector<2x32xf32>
    %813 = vector.extract_strided_slice %553 {offsets = [0, 0], sizes = [2, 128], strides = [1, 1]} : vector<2x256xf32> to vector<2x128xf32>
    %c0_224 = arith.constant 0 : index
    %c0_225 = arith.constant 0 : index
    %c0_226 = arith.constant 0 : index
    %814 = vector.load %arg5[%c0_224, %c0_225, %c0_226] : memref<2x32x128xf32, #tpu.memory_space<vmem>>, vector<1x32x128xf32>
    %815 = vector.shape_cast %814 : vector<1x32x128xf32> to vector<32x128xf32>
    %cst_227 = arith.constant dense<0.000000e+00> : vector<2x128xf32>
    %816 = tpu.matmul %782, %815, %cst_227 {dimension_numbers = #tpu.dot_dimension_numbers<[1], [0], [0], [1], [0, 0, 1, 1], [], []>} : vector<2x32xf32>, vector<32x128xf32>, vector<2x128xf32> -> vector<2x128xf32>
    %817 = arith.addf %813, %816 : vector<2x128xf32>
    %818 = vector.extract_strided_slice %817 {offsets = [0, 0], sizes = [2, 32], strides = [1, 1]} : vector<2x128xf32> to vector<2x32xf32>
    %819 = arith.negf %818 : vector<2x32xf32>
    %820 = math.exp %819 : vector<2x32xf32>
    %cst_228 = arith.constant 1.000000e+00 : f32
    %821 = vector.broadcast %cst_228 : f32 to vector<2x32xf32>
    %822 = arith.addf %821, %820 : vector<2x32xf32>
    %823 = arith.divf %821, %822 : vector<2x32xf32>
    %824 = vector.extract_strided_slice %817 {offsets = [0, 32], sizes = [2, 32], strides = [1, 1]} : vector<2x128xf32> to vector<2x32xf32>
    %825 = arith.negf %824 : vector<2x32xf32>
    %826 = math.exp %825 : vector<2x32xf32>
    %cst_229 = arith.constant 1.000000e+00 : f32
    %827 = vector.broadcast %cst_229 : f32 to vector<2x32xf32>
    %828 = arith.addf %827, %826 : vector<2x32xf32>
    %829 = arith.divf %827, %828 : vector<2x32xf32>
    %830 = vector.extract_strided_slice %817 {offsets = [0, 64], sizes = [2, 32], strides = [1, 1]} : vector<2x128xf32> to vector<2x32xf32>
    %831 = math.tanh %830 : vector<2x32xf32>
    %832 = vector.extract_strided_slice %817 {offsets = [0, 96], sizes = [2, 32], strides = [1, 1]} : vector<2x128xf32> to vector<2x32xf32>
    %833 = arith.negf %832 : vector<2x32xf32>
    %834 = math.exp %833 : vector<2x32xf32>
    %cst_230 = arith.constant 1.000000e+00 : f32
    %835 = vector.broadcast %cst_230 : f32 to vector<2x32xf32>
    %836 = arith.addf %835, %834 : vector<2x32xf32>
    %837 = arith.divf %835, %836 : vector<2x32xf32>
    %838 = arith.mulf %829, %780 : vector<2x32xf32>
    %839 = arith.mulf %823, %831 : vector<2x32xf32>
    %840 = arith.addf %838, %839 : vector<2x32xf32>
    %841 = math.tanh %840 : vector<2x32xf32>
    %842 = arith.mulf %837, %841 : vector<2x32xf32>
    %843 = vector.extract_strided_slice %548 {offsets = [0, 128], sizes = [2, 128], strides = [1, 1]} : vector<2x256xf32> to vector<2x128xf32>
    %c1_231 = arith.constant 1 : index
    %c0_232 = arith.constant 0 : index
    %c0_233 = arith.constant 0 : index
    %844 = vector.load %arg5[%c1_231, %c0_232, %c0_233] : memref<2x32x128xf32, #tpu.memory_space<vmem>>, vector<1x32x128xf32>
    %845 = vector.shape_cast %844 : vector<1x32x128xf32> to vector<32x128xf32>
    %cst_234 = arith.constant dense<0.000000e+00> : vector<2x128xf32>
    %846 = tpu.matmul %812, %845, %cst_234 {dimension_numbers = #tpu.dot_dimension_numbers<[1], [0], [0], [1], [0, 0, 1, 1], [], []>} : vector<2x32xf32>, vector<32x128xf32>, vector<2x128xf32> -> vector<2x128xf32>
    %847 = arith.addf %843, %846 : vector<2x128xf32>
    %848 = vector.extract_strided_slice %847 {offsets = [0, 0], sizes = [2, 32], strides = [1, 1]} : vector<2x128xf32> to vector<2x32xf32>
    %849 = arith.negf %848 : vector<2x32xf32>
    %850 = math.exp %849 : vector<2x32xf32>
    %cst_235 = arith.constant 1.000000e+00 : f32
    %851 = vector.broadcast %cst_235 : f32 to vector<2x32xf32>
    %852 = arith.addf %851, %850 : vector<2x32xf32>
    %853 = arith.divf %851, %852 : vector<2x32xf32>
    %854 = vector.extract_strided_slice %847 {offsets = [0, 32], sizes = [2, 32], strides = [1, 1]} : vector<2x128xf32> to vector<2x32xf32>
    %855 = arith.negf %854 : vector<2x32xf32>
    %856 = math.exp %855 : vector<2x32xf32>
    %cst_236 = arith.constant 1.000000e+00 : f32
    %857 = vector.broadcast %cst_236 : f32 to vector<2x32xf32>
    %858 = arith.addf %857, %856 : vector<2x32xf32>
    %859 = arith.divf %857, %858 : vector<2x32xf32>
    %860 = vector.extract_strided_slice %847 {offsets = [0, 64], sizes = [2, 32], strides = [1, 1]} : vector<2x128xf32> to vector<2x32xf32>
    %861 = math.tanh %860 : vector<2x32xf32>
    %862 = vector.extract_strided_slice %847 {offsets = [0, 96], sizes = [2, 32], strides = [1, 1]} : vector<2x128xf32> to vector<2x32xf32>
    %863 = arith.negf %862 : vector<2x32xf32>
    %864 = math.exp %863 : vector<2x32xf32>
    %cst_237 = arith.constant 1.000000e+00 : f32
    %865 = vector.broadcast %cst_237 : f32 to vector<2x32xf32>
    %866 = arith.addf %865, %864 : vector<2x32xf32>
    %867 = arith.divf %865, %866 : vector<2x32xf32>
    %868 = arith.mulf %859, %810 : vector<2x32xf32>
    %869 = arith.mulf %853, %861 : vector<2x32xf32>
    %870 = arith.addf %868, %869 : vector<2x32xf32>
    %871 = math.tanh %870 : vector<2x32xf32>
    %872 = arith.mulf %867, %871 : vector<2x32xf32>
    %873 = vector.extract_strided_slice %558 {offsets = [0, 0], sizes = [2, 128], strides = [1, 1]} : vector<2x256xf32> to vector<2x128xf32>
    %c0_238 = arith.constant 0 : index
    %c0_239 = arith.constant 0 : index
    %c0_240 = arith.constant 0 : index
    %874 = vector.load %arg5[%c0_238, %c0_239, %c0_240] : memref<2x32x128xf32, #tpu.memory_space<vmem>>, vector<1x32x128xf32>
    %875 = vector.shape_cast %874 : vector<1x32x128xf32> to vector<32x128xf32>
    %cst_241 = arith.constant dense<0.000000e+00> : vector<2x128xf32>
    %876 = tpu.matmul %842, %875, %cst_241 {dimension_numbers = #tpu.dot_dimension_numbers<[1], [0], [0], [1], [0, 0, 1, 1], [], []>} : vector<2x32xf32>, vector<32x128xf32>, vector<2x128xf32> -> vector<2x128xf32>
    %877 = arith.addf %873, %876 : vector<2x128xf32>
    %878 = vector.extract_strided_slice %877 {offsets = [0, 0], sizes = [2, 32], strides = [1, 1]} : vector<2x128xf32> to vector<2x32xf32>
    %879 = arith.negf %878 : vector<2x32xf32>
    %880 = math.exp %879 : vector<2x32xf32>
    %cst_242 = arith.constant 1.000000e+00 : f32
    %881 = vector.broadcast %cst_242 : f32 to vector<2x32xf32>
    %882 = arith.addf %881, %880 : vector<2x32xf32>
    %883 = arith.divf %881, %882 : vector<2x32xf32>
    %884 = vector.extract_strided_slice %877 {offsets = [0, 32], sizes = [2, 32], strides = [1, 1]} : vector<2x128xf32> to vector<2x32xf32>
    %885 = arith.negf %884 : vector<2x32xf32>
    %886 = math.exp %885 : vector<2x32xf32>
    %cst_243 = arith.constant 1.000000e+00 : f32
    %887 = vector.broadcast %cst_243 : f32 to vector<2x32xf32>
    %888 = arith.addf %887, %886 : vector<2x32xf32>
    %889 = arith.divf %887, %888 : vector<2x32xf32>
    %890 = vector.extract_strided_slice %877 {offsets = [0, 64], sizes = [2, 32], strides = [1, 1]} : vector<2x128xf32> to vector<2x32xf32>
    %891 = math.tanh %890 : vector<2x32xf32>
    %892 = vector.extract_strided_slice %877 {offsets = [0, 96], sizes = [2, 32], strides = [1, 1]} : vector<2x128xf32> to vector<2x32xf32>
    %893 = arith.negf %892 : vector<2x32xf32>
    %894 = math.exp %893 : vector<2x32xf32>
    %cst_244 = arith.constant 1.000000e+00 : f32
    %895 = vector.broadcast %cst_244 : f32 to vector<2x32xf32>
    %896 = arith.addf %895, %894 : vector<2x32xf32>
    %897 = arith.divf %895, %896 : vector<2x32xf32>
    %898 = arith.mulf %889, %840 : vector<2x32xf32>
    %899 = arith.mulf %883, %891 : vector<2x32xf32>
    %900 = arith.addf %898, %899 : vector<2x32xf32>
    %901 = math.tanh %900 : vector<2x32xf32>
    %902 = arith.mulf %897, %901 : vector<2x32xf32>
    %903 = vector.extract_strided_slice %543 {offsets = [0, 128], sizes = [2, 128], strides = [1, 1]} : vector<2x256xf32> to vector<2x128xf32>
    %c1_245 = arith.constant 1 : index
    %c0_246 = arith.constant 0 : index
    %c0_247 = arith.constant 0 : index
    %904 = vector.load %arg5[%c1_245, %c0_246, %c0_247] : memref<2x32x128xf32, #tpu.memory_space<vmem>>, vector<1x32x128xf32>
    %905 = vector.shape_cast %904 : vector<1x32x128xf32> to vector<32x128xf32>
    %cst_248 = arith.constant dense<0.000000e+00> : vector<2x128xf32>
    %906 = tpu.matmul %872, %905, %cst_248 {dimension_numbers = #tpu.dot_dimension_numbers<[1], [0], [0], [1], [0, 0, 1, 1], [], []>} : vector<2x32xf32>, vector<32x128xf32>, vector<2x128xf32> -> vector<2x128xf32>
    %907 = arith.addf %903, %906 : vector<2x128xf32>
    %908 = vector.extract_strided_slice %907 {offsets = [0, 0], sizes = [2, 32], strides = [1, 1]} : vector<2x128xf32> to vector<2x32xf32>
    %909 = arith.negf %908 : vector<2x32xf32>
    %910 = math.exp %909 : vector<2x32xf32>
    %cst_249 = arith.constant 1.000000e+00 : f32
    %911 = vector.broadcast %cst_249 : f32 to vector<2x32xf32>
    %912 = arith.addf %911, %910 : vector<2x32xf32>
    %913 = arith.divf %911, %912 : vector<2x32xf32>
    %914 = vector.extract_strided_slice %907 {offsets = [0, 32], sizes = [2, 32], strides = [1, 1]} : vector<2x128xf32> to vector<2x32xf32>
    %915 = arith.negf %914 : vector<2x32xf32>
    %916 = math.exp %915 : vector<2x32xf32>
    %cst_250 = arith.constant 1.000000e+00 : f32
    %917 = vector.broadcast %cst_250 : f32 to vector<2x32xf32>
    %918 = arith.addf %917, %916 : vector<2x32xf32>
    %919 = arith.divf %917, %918 : vector<2x32xf32>
    %920 = vector.extract_strided_slice %907 {offsets = [0, 64], sizes = [2, 32], strides = [1, 1]} : vector<2x128xf32> to vector<2x32xf32>
    %921 = math.tanh %920 : vector<2x32xf32>
    %922 = vector.extract_strided_slice %907 {offsets = [0, 96], sizes = [2, 32], strides = [1, 1]} : vector<2x128xf32> to vector<2x32xf32>
    %923 = arith.negf %922 : vector<2x32xf32>
    %924 = math.exp %923 : vector<2x32xf32>
    %cst_251 = arith.constant 1.000000e+00 : f32
    %925 = vector.broadcast %cst_251 : f32 to vector<2x32xf32>
    %926 = arith.addf %925, %924 : vector<2x32xf32>
    %927 = arith.divf %925, %926 : vector<2x32xf32>
    %928 = arith.mulf %919, %870 : vector<2x32xf32>
    %929 = arith.mulf %913, %921 : vector<2x32xf32>
    %930 = arith.addf %928, %929 : vector<2x32xf32>
    %931 = math.tanh %930 : vector<2x32xf32>
    %932 = arith.mulf %927, %931 : vector<2x32xf32>
    %933 = vector.extract_strided_slice %563 {offsets = [0, 0], sizes = [2, 128], strides = [1, 1]} : vector<2x256xf32> to vector<2x128xf32>
    %c0_252 = arith.constant 0 : index
    %c0_253 = arith.constant 0 : index
    %c0_254 = arith.constant 0 : index
    %934 = vector.load %arg5[%c0_252, %c0_253, %c0_254] : memref<2x32x128xf32, #tpu.memory_space<vmem>>, vector<1x32x128xf32>
    %935 = vector.shape_cast %934 : vector<1x32x128xf32> to vector<32x128xf32>
    %cst_255 = arith.constant dense<0.000000e+00> : vector<2x128xf32>
    %936 = tpu.matmul %902, %935, %cst_255 {dimension_numbers = #tpu.dot_dimension_numbers<[1], [0], [0], [1], [0, 0, 1, 1], [], []>} : vector<2x32xf32>, vector<32x128xf32>, vector<2x128xf32> -> vector<2x128xf32>
    %937 = arith.addf %933, %936 : vector<2x128xf32>
    %938 = vector.extract_strided_slice %937 {offsets = [0, 0], sizes = [2, 32], strides = [1, 1]} : vector<2x128xf32> to vector<2x32xf32>
    %939 = arith.negf %938 : vector<2x32xf32>
    %940 = math.exp %939 : vector<2x32xf32>
    %cst_256 = arith.constant 1.000000e+00 : f32
    %941 = vector.broadcast %cst_256 : f32 to vector<2x32xf32>
    %942 = arith.addf %941, %940 : vector<2x32xf32>
    %943 = arith.divf %941, %942 : vector<2x32xf32>
    %944 = vector.extract_strided_slice %937 {offsets = [0, 32], sizes = [2, 32], strides = [1, 1]} : vector<2x128xf32> to vector<2x32xf32>
    %945 = arith.negf %944 : vector<2x32xf32>
    %946 = math.exp %945 : vector<2x32xf32>
    %cst_257 = arith.constant 1.000000e+00 : f32
    %947 = vector.broadcast %cst_257 : f32 to vector<2x32xf32>
    %948 = arith.addf %947, %946 : vector<2x32xf32>
    %949 = arith.divf %947, %948 : vector<2x32xf32>
    %950 = vector.extract_strided_slice %937 {offsets = [0, 64], sizes = [2, 32], strides = [1, 1]} : vector<2x128xf32> to vector<2x32xf32>
    %951 = math.tanh %950 : vector<2x32xf32>
    %952 = vector.extract_strided_slice %937 {offsets = [0, 96], sizes = [2, 32], strides = [1, 1]} : vector<2x128xf32> to vector<2x32xf32>
    %953 = arith.negf %952 : vector<2x32xf32>
    %954 = math.exp %953 : vector<2x32xf32>
    %cst_258 = arith.constant 1.000000e+00 : f32
    %955 = vector.broadcast %cst_258 : f32 to vector<2x32xf32>
    %956 = arith.addf %955, %954 : vector<2x32xf32>
    %957 = arith.divf %955, %956 : vector<2x32xf32>
    %958 = arith.mulf %949, %900 : vector<2x32xf32>
    %959 = arith.mulf %943, %951 : vector<2x32xf32>
    %960 = arith.addf %958, %959 : vector<2x32xf32>
    %961 = math.tanh %960 : vector<2x32xf32>
    %962 = arith.mulf %957, %961 : vector<2x32xf32>
    %963 = vector.extract_strided_slice %538 {offsets = [0, 128], sizes = [2, 128], strides = [1, 1]} : vector<2x256xf32> to vector<2x128xf32>
    %c1_259 = arith.constant 1 : index
    %c0_260 = arith.constant 0 : index
    %c0_261 = arith.constant 0 : index
    %964 = vector.load %arg5[%c1_259, %c0_260, %c0_261] : memref<2x32x128xf32, #tpu.memory_space<vmem>>, vector<1x32x128xf32>
    %965 = vector.shape_cast %964 : vector<1x32x128xf32> to vector<32x128xf32>
    %cst_262 = arith.constant dense<0.000000e+00> : vector<2x128xf32>
    %966 = tpu.matmul %932, %965, %cst_262 {dimension_numbers = #tpu.dot_dimension_numbers<[1], [0], [0], [1], [0, 0, 1, 1], [], []>} : vector<2x32xf32>, vector<32x128xf32>, vector<2x128xf32> -> vector<2x128xf32>
    %967 = arith.addf %963, %966 : vector<2x128xf32>
    %968 = vector.extract_strided_slice %967 {offsets = [0, 0], sizes = [2, 32], strides = [1, 1]} : vector<2x128xf32> to vector<2x32xf32>
    %969 = arith.negf %968 : vector<2x32xf32>
    %970 = math.exp %969 : vector<2x32xf32>
    %cst_263 = arith.constant 1.000000e+00 : f32
    %971 = vector.broadcast %cst_263 : f32 to vector<2x32xf32>
    %972 = arith.addf %971, %970 : vector<2x32xf32>
    %973 = arith.divf %971, %972 : vector<2x32xf32>
    %974 = vector.extract_strided_slice %967 {offsets = [0, 32], sizes = [2, 32], strides = [1, 1]} : vector<2x128xf32> to vector<2x32xf32>
    %975 = arith.negf %974 : vector<2x32xf32>
    %976 = math.exp %975 : vector<2x32xf32>
    %cst_264 = arith.constant 1.000000e+00 : f32
    %977 = vector.broadcast %cst_264 : f32 to vector<2x32xf32>
    %978 = arith.addf %977, %976 : vector<2x32xf32>
    %979 = arith.divf %977, %978 : vector<2x32xf32>
    %980 = vector.extract_strided_slice %967 {offsets = [0, 64], sizes = [2, 32], strides = [1, 1]} : vector<2x128xf32> to vector<2x32xf32>
    %981 = math.tanh %980 : vector<2x32xf32>
    %982 = vector.extract_strided_slice %967 {offsets = [0, 96], sizes = [2, 32], strides = [1, 1]} : vector<2x128xf32> to vector<2x32xf32>
    %983 = arith.negf %982 : vector<2x32xf32>
    %984 = math.exp %983 : vector<2x32xf32>
    %cst_265 = arith.constant 1.000000e+00 : f32
    %985 = vector.broadcast %cst_265 : f32 to vector<2x32xf32>
    %986 = arith.addf %985, %984 : vector<2x32xf32>
    %987 = arith.divf %985, %986 : vector<2x32xf32>
    %988 = arith.mulf %979, %930 : vector<2x32xf32>
    %989 = arith.mulf %973, %981 : vector<2x32xf32>
    %990 = arith.addf %988, %989 : vector<2x32xf32>
    %991 = math.tanh %990 : vector<2x32xf32>
    %992 = arith.mulf %987, %991 : vector<2x32xf32>
    %993 = vector.extract_strided_slice %568 {offsets = [0, 0], sizes = [2, 128], strides = [1, 1]} : vector<2x256xf32> to vector<2x128xf32>
    %c0_266 = arith.constant 0 : index
    %c0_267 = arith.constant 0 : index
    %c0_268 = arith.constant 0 : index
    %994 = vector.load %arg5[%c0_266, %c0_267, %c0_268] : memref<2x32x128xf32, #tpu.memory_space<vmem>>, vector<1x32x128xf32>
    %995 = vector.shape_cast %994 : vector<1x32x128xf32> to vector<32x128xf32>
    %cst_269 = arith.constant dense<0.000000e+00> : vector<2x128xf32>
    %996 = tpu.matmul %962, %995, %cst_269 {dimension_numbers = #tpu.dot_dimension_numbers<[1], [0], [0], [1], [0, 0, 1, 1], [], []>} : vector<2x32xf32>, vector<32x128xf32>, vector<2x128xf32> -> vector<2x128xf32>
    %997 = arith.addf %993, %996 : vector<2x128xf32>
    %998 = vector.extract_strided_slice %997 {offsets = [0, 0], sizes = [2, 32], strides = [1, 1]} : vector<2x128xf32> to vector<2x32xf32>
    %999 = arith.negf %998 : vector<2x32xf32>
    %1000 = math.exp %999 : vector<2x32xf32>
    %cst_270 = arith.constant 1.000000e+00 : f32
    %1001 = vector.broadcast %cst_270 : f32 to vector<2x32xf32>
    %1002 = arith.addf %1001, %1000 : vector<2x32xf32>
    %1003 = arith.divf %1001, %1002 : vector<2x32xf32>
    %1004 = vector.extract_strided_slice %997 {offsets = [0, 32], sizes = [2, 32], strides = [1, 1]} : vector<2x128xf32> to vector<2x32xf32>
    %1005 = arith.negf %1004 : vector<2x32xf32>
    %1006 = math.exp %1005 : vector<2x32xf32>
    %cst_271 = arith.constant 1.000000e+00 : f32
    %1007 = vector.broadcast %cst_271 : f32 to vector<2x32xf32>
    %1008 = arith.addf %1007, %1006 : vector<2x32xf32>
    %1009 = arith.divf %1007, %1008 : vector<2x32xf32>
    %1010 = vector.extract_strided_slice %997 {offsets = [0, 64], sizes = [2, 32], strides = [1, 1]} : vector<2x128xf32> to vector<2x32xf32>
    %1011 = math.tanh %1010 : vector<2x32xf32>
    %1012 = vector.extract_strided_slice %997 {offsets = [0, 96], sizes = [2, 32], strides = [1, 1]} : vector<2x128xf32> to vector<2x32xf32>
    %1013 = arith.negf %1012 : vector<2x32xf32>
    %1014 = math.exp %1013 : vector<2x32xf32>
    %cst_272 = arith.constant 1.000000e+00 : f32
    %1015 = vector.broadcast %cst_272 : f32 to vector<2x32xf32>
    %1016 = arith.addf %1015, %1014 : vector<2x32xf32>
    %1017 = arith.divf %1015, %1016 : vector<2x32xf32>
    %1018 = arith.mulf %1009, %960 : vector<2x32xf32>
    %1019 = arith.mulf %1003, %1011 : vector<2x32xf32>
    %1020 = arith.addf %1018, %1019 : vector<2x32xf32>
    %1021 = math.tanh %1020 : vector<2x32xf32>
    %1022 = arith.mulf %1017, %1021 : vector<2x32xf32>
    %1023 = vector.extract_strided_slice %533 {offsets = [0, 128], sizes = [2, 128], strides = [1, 1]} : vector<2x256xf32> to vector<2x128xf32>
    %c1_273 = arith.constant 1 : index
    %c0_274 = arith.constant 0 : index
    %c0_275 = arith.constant 0 : index
    %1024 = vector.load %arg5[%c1_273, %c0_274, %c0_275] : memref<2x32x128xf32, #tpu.memory_space<vmem>>, vector<1x32x128xf32>
    %1025 = vector.shape_cast %1024 : vector<1x32x128xf32> to vector<32x128xf32>
    %cst_276 = arith.constant dense<0.000000e+00> : vector<2x128xf32>
    %1026 = tpu.matmul %992, %1025, %cst_276 {dimension_numbers = #tpu.dot_dimension_numbers<[1], [0], [0], [1], [0, 0, 1, 1], [], []>} : vector<2x32xf32>, vector<32x128xf32>, vector<2x128xf32> -> vector<2x128xf32>
    %1027 = arith.addf %1023, %1026 : vector<2x128xf32>
    %1028 = vector.extract_strided_slice %1027 {offsets = [0, 0], sizes = [2, 32], strides = [1, 1]} : vector<2x128xf32> to vector<2x32xf32>
    %1029 = arith.negf %1028 : vector<2x32xf32>
    %1030 = math.exp %1029 : vector<2x32xf32>
    %cst_277 = arith.constant 1.000000e+00 : f32
    %1031 = vector.broadcast %cst_277 : f32 to vector<2x32xf32>
    %1032 = arith.addf %1031, %1030 : vector<2x32xf32>
    %1033 = arith.divf %1031, %1032 : vector<2x32xf32>
    %1034 = vector.extract_strided_slice %1027 {offsets = [0, 32], sizes = [2, 32], strides = [1, 1]} : vector<2x128xf32> to vector<2x32xf32>
    %1035 = arith.negf %1034 : vector<2x32xf32>
    %1036 = math.exp %1035 : vector<2x32xf32>
    %cst_278 = arith.constant 1.000000e+00 : f32
    %1037 = vector.broadcast %cst_278 : f32 to vector<2x32xf32>
    %1038 = arith.addf %1037, %1036 : vector<2x32xf32>
    %1039 = arith.divf %1037, %1038 : vector<2x32xf32>
    %1040 = vector.extract_strided_slice %1027 {offsets = [0, 64], sizes = [2, 32], strides = [1, 1]} : vector<2x128xf32> to vector<2x32xf32>
    %1041 = math.tanh %1040 : vector<2x32xf32>
    %1042 = vector.extract_strided_slice %1027 {offsets = [0, 96], sizes = [2, 32], strides = [1, 1]} : vector<2x128xf32> to vector<2x32xf32>
    %1043 = arith.negf %1042 : vector<2x32xf32>
    %1044 = math.exp %1043 : vector<2x32xf32>
    %cst_279 = arith.constant 1.000000e+00 : f32
    %1045 = vector.broadcast %cst_279 : f32 to vector<2x32xf32>
    %1046 = arith.addf %1045, %1044 : vector<2x32xf32>
    %1047 = arith.divf %1045, %1046 : vector<2x32xf32>
    %1048 = arith.mulf %1039, %990 : vector<2x32xf32>
    %1049 = arith.mulf %1033, %1041 : vector<2x32xf32>
    %1050 = arith.addf %1048, %1049 : vector<2x32xf32>
    %1051 = math.tanh %1050 : vector<2x32xf32>
    %1052 = arith.mulf %1047, %1051 : vector<2x32xf32>
    %c0_280 = arith.constant 0 : index
    %c0_281 = arith.constant 0 : index
    %1053 = vector.load %arg7[%c0_280, %c0_281] : memref<1x64xf32, #tpu.memory_space<vmem>>, vector<1x64xf32>
    %c0_282 = arith.constant 0 : index
    %c0_283 = arith.constant 0 : index
    %1054 = vector.load %arg8[%c0_282, %c0_283] : memref<1x64xf32, #tpu.memory_space<vmem>>, vector<1x64xf32>
    %c0_284 = arith.constant 0 : index
    %c0_285 = arith.constant 0 : index
    %1055 = vector.load %arg9[%c0_284, %c0_285] : memref<1x64xf32, #tpu.memory_space<vmem>>, vector<1x64xf32>
    %c0_286 = arith.constant 0 : index
    %c0_287 = arith.constant 0 : index
    %1056 = vector.load %arg10[%c0_286, %c0_287] : memref<1x1xf32, #tpu.memory_space<vmem>>, vector<1x1xf32>
    %cst_288 = arith.constant 0.000000e+00 : f32
    %1057 = vector.broadcast %cst_288 : f32 to vector<2x1xf32>
    %cst_289 = arith.constant dense<0.000000e+00> : vector<2xf32>
    %1058 = vector.multi_reduction <add>, %602, %cst_289 [1] : vector<2x32xf32> to vector<2xf32>
    %1059 = vector.shape_cast %1058 : vector<2xf32> to vector<2x1xf32>
    %1060 = arith.addf %1057, %1059 : vector<2x1xf32>
    %cst_290 = arith.constant dense<0.000000e+00> : vector<2xf32>
    %1061 = vector.multi_reduction <add>, %1052, %cst_290 [1] : vector<2x32xf32> to vector<2xf32>
    %1062 = vector.shape_cast %1061 : vector<2xf32> to vector<2x1xf32>
    %1063 = arith.addf %1060, %1062 : vector<2x1xf32>
    %cst_291 = arith.constant 1.562500e-02 : f32
    %1064 = vector.broadcast %cst_291 : f32 to vector<2x1xf32>
    %1065 = arith.mulf %1063, %1064 : vector<2x1xf32>
    %1066 = vector.broadcast %1065 : vector<2x1xf32> to vector<2x32xf32>
    %1067 = arith.subf %602, %1066 : vector<2x32xf32>
    %1068 = vector.broadcast %1065 : vector<2x1xf32> to vector<2x32xf32>
    %1069 = arith.subf %1052, %1068 : vector<2x32xf32>
    %cst_292 = arith.constant 0.000000e+00 : f32
    %1070 = vector.broadcast %cst_292 : f32 to vector<2x1xf32>
    %1071 = arith.mulf %1067, %1067 : vector<2x32xf32>
    %cst_293 = arith.constant dense<0.000000e+00> : vector<2xf32>
    %1072 = vector.multi_reduction <add>, %1071, %cst_293 [1] : vector<2x32xf32> to vector<2xf32>
    %1073 = vector.shape_cast %1072 : vector<2xf32> to vector<2x1xf32>
    %1074 = arith.addf %1070, %1073 : vector<2x1xf32>
    %1075 = arith.mulf %1069, %1069 : vector<2x32xf32>
    %cst_294 = arith.constant dense<0.000000e+00> : vector<2xf32>
    %1076 = vector.multi_reduction <add>, %1075, %cst_294 [1] : vector<2x32xf32> to vector<2xf32>
    %1077 = vector.shape_cast %1076 : vector<2xf32> to vector<2x1xf32>
    %1078 = arith.addf %1074, %1077 : vector<2x1xf32>
    %cst_295 = arith.constant 1.562500e-02 : f32
    %1079 = vector.broadcast %cst_295 : f32 to vector<2x1xf32>
    %1080 = arith.mulf %1078, %1079 : vector<2x1xf32>
    %cst_296 = arith.constant 9.99999974E-6 : f32
    %1081 = vector.broadcast %cst_296 : f32 to vector<2x1xf32>
    %1082 = arith.addf %1080, %1081 : vector<2x1xf32>
    %1083 = math.rsqrt %1082 : vector<2x1xf32>
    %1084 = vector.broadcast %1083 : vector<2x1xf32> to vector<2x32xf32>
    %1085 = arith.mulf %1067, %1084 : vector<2x32xf32>
    %1086 = vector.extract_strided_slice %1053 {offsets = [0, 0], sizes = [1, 32], strides = [1, 1]} : vector<1x64xf32> to vector<1x32xf32>
    %1087 = vector.broadcast %1086 : vector<1x32xf32> to vector<2x32xf32>
    %1088 = arith.mulf %1085, %1087 : vector<2x32xf32>
    %1089 = vector.extract_strided_slice %1054 {offsets = [0, 0], sizes = [1, 32], strides = [1, 1]} : vector<1x64xf32> to vector<1x32xf32>
    %1090 = vector.broadcast %1089 : vector<1x32xf32> to vector<2x32xf32>
    %1091 = arith.addf %1088, %1090 : vector<2x32xf32>
    %1092 = vector.extract_strided_slice %1055 {offsets = [0, 0], sizes = [1, 32], strides = [1, 1]} : vector<1x64xf32> to vector<1x32xf32>
    %1093 = vector.broadcast %1092 : vector<1x32xf32> to vector<2x32xf32>
    %1094 = arith.mulf %1091, %1093 : vector<2x32xf32>
    %cst_297 = arith.constant dense<0.000000e+00> : vector<2xf32>
    %1095 = vector.multi_reduction <add>, %1094, %cst_297 [1] : vector<2x32xf32> to vector<2xf32>
    %1096 = vector.shape_cast %1095 : vector<2xf32> to vector<2x1xf32>
    %1097 = vector.broadcast %1056 : vector<1x1xf32> to vector<2x1xf32>
    %1098 = arith.addf %1097, %1096 : vector<2x1xf32>
    %1099 = vector.broadcast %1083 : vector<2x1xf32> to vector<2x32xf32>
    %1100 = arith.mulf %1069, %1099 : vector<2x32xf32>
    %1101 = vector.extract_strided_slice %1053 {offsets = [0, 32], sizes = [1, 32], strides = [1, 1]} : vector<1x64xf32> to vector<1x32xf32>
    %1102 = vector.broadcast %1101 : vector<1x32xf32> to vector<2x32xf32>
    %1103 = arith.mulf %1100, %1102 : vector<2x32xf32>
    %1104 = vector.extract_strided_slice %1054 {offsets = [0, 32], sizes = [1, 32], strides = [1, 1]} : vector<1x64xf32> to vector<1x32xf32>
    %1105 = vector.broadcast %1104 : vector<1x32xf32> to vector<2x32xf32>
    %1106 = arith.addf %1103, %1105 : vector<2x32xf32>
    %1107 = vector.extract_strided_slice %1055 {offsets = [0, 32], sizes = [1, 32], strides = [1, 1]} : vector<1x64xf32> to vector<1x32xf32>
    %1108 = vector.broadcast %1107 : vector<1x32xf32> to vector<2x32xf32>
    %1109 = arith.mulf %1106, %1108 : vector<2x32xf32>
    %cst_298 = arith.constant dense<0.000000e+00> : vector<2xf32>
    %1110 = vector.multi_reduction <add>, %1109, %cst_298 [1] : vector<2x32xf32> to vector<2xf32>
    %1111 = vector.shape_cast %1110 : vector<2xf32> to vector<2x1xf32>
    %1112 = arith.addf %1098, %1111 : vector<2x1xf32>
    %cst_299 = arith.constant 0.000000e+00 : f32
    %1113 = vector.broadcast %cst_299 : f32 to vector<2x1xf32>
    %cst_300 = arith.constant dense<0.000000e+00> : vector<2xf32>
    %1114 = vector.multi_reduction <add>, %662, %cst_300 [1] : vector<2x32xf32> to vector<2xf32>
    %1115 = vector.shape_cast %1114 : vector<2xf32> to vector<2x1xf32>
    %1116 = arith.addf %1113, %1115 : vector<2x1xf32>
    %cst_301 = arith.constant dense<0.000000e+00> : vector<2xf32>
    %1117 = vector.multi_reduction <add>, %992, %cst_301 [1] : vector<2x32xf32> to vector<2xf32>
    %1118 = vector.shape_cast %1117 : vector<2xf32> to vector<2x1xf32>
    %1119 = arith.addf %1116, %1118 : vector<2x1xf32>
    %cst_302 = arith.constant 1.562500e-02 : f32
    %1120 = vector.broadcast %cst_302 : f32 to vector<2x1xf32>
    %1121 = arith.mulf %1119, %1120 : vector<2x1xf32>
    %1122 = vector.broadcast %1121 : vector<2x1xf32> to vector<2x32xf32>
    %1123 = arith.subf %662, %1122 : vector<2x32xf32>
    %1124 = vector.broadcast %1121 : vector<2x1xf32> to vector<2x32xf32>
    %1125 = arith.subf %992, %1124 : vector<2x32xf32>
    %cst_303 = arith.constant 0.000000e+00 : f32
    %1126 = vector.broadcast %cst_303 : f32 to vector<2x1xf32>
    %1127 = arith.mulf %1123, %1123 : vector<2x32xf32>
    %cst_304 = arith.constant dense<0.000000e+00> : vector<2xf32>
    %1128 = vector.multi_reduction <add>, %1127, %cst_304 [1] : vector<2x32xf32> to vector<2xf32>
    %1129 = vector.shape_cast %1128 : vector<2xf32> to vector<2x1xf32>
    %1130 = arith.addf %1126, %1129 : vector<2x1xf32>
    %1131 = arith.mulf %1125, %1125 : vector<2x32xf32>
    %cst_305 = arith.constant dense<0.000000e+00> : vector<2xf32>
    %1132 = vector.multi_reduction <add>, %1131, %cst_305 [1] : vector<2x32xf32> to vector<2xf32>
    %1133 = vector.shape_cast %1132 : vector<2xf32> to vector<2x1xf32>
    %1134 = arith.addf %1130, %1133 : vector<2x1xf32>
    %cst_306 = arith.constant 1.562500e-02 : f32
    %1135 = vector.broadcast %cst_306 : f32 to vector<2x1xf32>
    %1136 = arith.mulf %1134, %1135 : vector<2x1xf32>
    %cst_307 = arith.constant 9.99999974E-6 : f32
    %1137 = vector.broadcast %cst_307 : f32 to vector<2x1xf32>
    %1138 = arith.addf %1136, %1137 : vector<2x1xf32>
    %1139 = math.rsqrt %1138 : vector<2x1xf32>
    %1140 = vector.broadcast %1139 : vector<2x1xf32> to vector<2x32xf32>
    %1141 = arith.mulf %1123, %1140 : vector<2x32xf32>
    %1142 = vector.extract_strided_slice %1053 {offsets = [0, 0], sizes = [1, 32], strides = [1, 1]} : vector<1x64xf32> to vector<1x32xf32>
    %1143 = vector.broadcast %1142 : vector<1x32xf32> to vector<2x32xf32>
    %1144 = arith.mulf %1141, %1143 : vector<2x32xf32>
    %1145 = vector.extract_strided_slice %1054 {offsets = [0, 0], sizes = [1, 32], strides = [1, 1]} : vector<1x64xf32> to vector<1x32xf32>
    %1146 = vector.broadcast %1145 : vector<1x32xf32> to vector<2x32xf32>
    %1147 = arith.addf %1144, %1146 : vector<2x32xf32>
    %1148 = vector.extract_strided_slice %1055 {offsets = [0, 0], sizes = [1, 32], strides = [1, 1]} : vector<1x64xf32> to vector<1x32xf32>
    %1149 = vector.broadcast %1148 : vector<1x32xf32> to vector<2x32xf32>
    %1150 = arith.mulf %1147, %1149 : vector<2x32xf32>
    %cst_308 = arith.constant dense<0.000000e+00> : vector<2xf32>
    %1151 = vector.multi_reduction <add>, %1150, %cst_308 [1] : vector<2x32xf32> to vector<2xf32>
    %1152 = vector.shape_cast %1151 : vector<2xf32> to vector<2x1xf32>
    %1153 = vector.broadcast %1056 : vector<1x1xf32> to vector<2x1xf32>
    %1154 = arith.addf %1153, %1152 : vector<2x1xf32>
    %1155 = vector.broadcast %1139 : vector<2x1xf32> to vector<2x32xf32>
    %1156 = arith.mulf %1125, %1155 : vector<2x32xf32>
    %1157 = vector.extract_strided_slice %1053 {offsets = [0, 32], sizes = [1, 32], strides = [1, 1]} : vector<1x64xf32> to vector<1x32xf32>
    %1158 = vector.broadcast %1157 : vector<1x32xf32> to vector<2x32xf32>
    %1159 = arith.mulf %1156, %1158 : vector<2x32xf32>
    %1160 = vector.extract_strided_slice %1054 {offsets = [0, 32], sizes = [1, 32], strides = [1, 1]} : vector<1x64xf32> to vector<1x32xf32>
    %1161 = vector.broadcast %1160 : vector<1x32xf32> to vector<2x32xf32>
    %1162 = arith.addf %1159, %1161 : vector<2x32xf32>
    %1163 = vector.extract_strided_slice %1055 {offsets = [0, 32], sizes = [1, 32], strides = [1, 1]} : vector<1x64xf32> to vector<1x32xf32>
    %1164 = vector.broadcast %1163 : vector<1x32xf32> to vector<2x32xf32>
    %1165 = arith.mulf %1162, %1164 : vector<2x32xf32>
    %cst_309 = arith.constant dense<0.000000e+00> : vector<2xf32>
    %1166 = vector.multi_reduction <add>, %1165, %cst_309 [1] : vector<2x32xf32> to vector<2xf32>
    %1167 = vector.shape_cast %1166 : vector<2xf32> to vector<2x1xf32>
    %1168 = arith.addf %1154, %1167 : vector<2x1xf32>
    %cst_310 = arith.constant 0.000000e+00 : f32
    %1169 = vector.broadcast %cst_310 : f32 to vector<2x1xf32>
    %cst_311 = arith.constant dense<0.000000e+00> : vector<2xf32>
    %1170 = vector.multi_reduction <add>, %722, %cst_311 [1] : vector<2x32xf32> to vector<2xf32>
    %1171 = vector.shape_cast %1170 : vector<2xf32> to vector<2x1xf32>
    %1172 = arith.addf %1169, %1171 : vector<2x1xf32>
    %cst_312 = arith.constant dense<0.000000e+00> : vector<2xf32>
    %1173 = vector.multi_reduction <add>, %932, %cst_312 [1] : vector<2x32xf32> to vector<2xf32>
    %1174 = vector.shape_cast %1173 : vector<2xf32> to vector<2x1xf32>
    %1175 = arith.addf %1172, %1174 : vector<2x1xf32>
    %cst_313 = arith.constant 1.562500e-02 : f32
    %1176 = vector.broadcast %cst_313 : f32 to vector<2x1xf32>
    %1177 = arith.mulf %1175, %1176 : vector<2x1xf32>
    %1178 = vector.broadcast %1177 : vector<2x1xf32> to vector<2x32xf32>
    %1179 = arith.subf %722, %1178 : vector<2x32xf32>
    %1180 = vector.broadcast %1177 : vector<2x1xf32> to vector<2x32xf32>
    %1181 = arith.subf %932, %1180 : vector<2x32xf32>
    %cst_314 = arith.constant 0.000000e+00 : f32
    %1182 = vector.broadcast %cst_314 : f32 to vector<2x1xf32>
    %1183 = arith.mulf %1179, %1179 : vector<2x32xf32>
    %cst_315 = arith.constant dense<0.000000e+00> : vector<2xf32>
    %1184 = vector.multi_reduction <add>, %1183, %cst_315 [1] : vector<2x32xf32> to vector<2xf32>
    %1185 = vector.shape_cast %1184 : vector<2xf32> to vector<2x1xf32>
    %1186 = arith.addf %1182, %1185 : vector<2x1xf32>
    %1187 = arith.mulf %1181, %1181 : vector<2x32xf32>
    %cst_316 = arith.constant dense<0.000000e+00> : vector<2xf32>
    %1188 = vector.multi_reduction <add>, %1187, %cst_316 [1] : vector<2x32xf32> to vector<2xf32>
    %1189 = vector.shape_cast %1188 : vector<2xf32> to vector<2x1xf32>
    %1190 = arith.addf %1186, %1189 : vector<2x1xf32>
    %cst_317 = arith.constant 1.562500e-02 : f32
    %1191 = vector.broadcast %cst_317 : f32 to vector<2x1xf32>
    %1192 = arith.mulf %1190, %1191 : vector<2x1xf32>
    %cst_318 = arith.constant 9.99999974E-6 : f32
    %1193 = vector.broadcast %cst_318 : f32 to vector<2x1xf32>
    %1194 = arith.addf %1192, %1193 : vector<2x1xf32>
    %1195 = math.rsqrt %1194 : vector<2x1xf32>
    %1196 = vector.broadcast %1195 : vector<2x1xf32> to vector<2x32xf32>
    %1197 = arith.mulf %1179, %1196 : vector<2x32xf32>
    %1198 = vector.extract_strided_slice %1053 {offsets = [0, 0], sizes = [1, 32], strides = [1, 1]} : vector<1x64xf32> to vector<1x32xf32>
    %1199 = vector.broadcast %1198 : vector<1x32xf32> to vector<2x32xf32>
    %1200 = arith.mulf %1197, %1199 : vector<2x32xf32>
    %1201 = vector.extract_strided_slice %1054 {offsets = [0, 0], sizes = [1, 32], strides = [1, 1]} : vector<1x64xf32> to vector<1x32xf32>
    %1202 = vector.broadcast %1201 : vector<1x32xf32> to vector<2x32xf32>
    %1203 = arith.addf %1200, %1202 : vector<2x32xf32>
    %1204 = vector.extract_strided_slice %1055 {offsets = [0, 0], sizes = [1, 32], strides = [1, 1]} : vector<1x64xf32> to vector<1x32xf32>
    %1205 = vector.broadcast %1204 : vector<1x32xf32> to vector<2x32xf32>
    %1206 = arith.mulf %1203, %1205 : vector<2x32xf32>
    %cst_319 = arith.constant dense<0.000000e+00> : vector<2xf32>
    %1207 = vector.multi_reduction <add>, %1206, %cst_319 [1] : vector<2x32xf32> to vector<2xf32>
    %1208 = vector.shape_cast %1207 : vector<2xf32> to vector<2x1xf32>
    %1209 = vector.broadcast %1056 : vector<1x1xf32> to vector<2x1xf32>
    %1210 = arith.addf %1209, %1208 : vector<2x1xf32>
    %1211 = vector.broadcast %1195 : vector<2x1xf32> to vector<2x32xf32>
    %1212 = arith.mulf %1181, %1211 : vector<2x32xf32>
    %1213 = vector.extract_strided_slice %1053 {offsets = [0, 32], sizes = [1, 32], strides = [1, 1]} : vector<1x64xf32> to vector<1x32xf32>
    %1214 = vector.broadcast %1213 : vector<1x32xf32> to vector<2x32xf32>
    %1215 = arith.mulf %1212, %1214 : vector<2x32xf32>
    %1216 = vector.extract_strided_slice %1054 {offsets = [0, 32], sizes = [1, 32], strides = [1, 1]} : vector<1x64xf32> to vector<1x32xf32>
    %1217 = vector.broadcast %1216 : vector<1x32xf32> to vector<2x32xf32>
    %1218 = arith.addf %1215, %1217 : vector<2x32xf32>
    %1219 = vector.extract_strided_slice %1055 {offsets = [0, 32], sizes = [1, 32], strides = [1, 1]} : vector<1x64xf32> to vector<1x32xf32>
    %1220 = vector.broadcast %1219 : vector<1x32xf32> to vector<2x32xf32>
    %1221 = arith.mulf %1218, %1220 : vector<2x32xf32>
    %cst_320 = arith.constant dense<0.000000e+00> : vector<2xf32>
    %1222 = vector.multi_reduction <add>, %1221, %cst_320 [1] : vector<2x32xf32> to vector<2xf32>
    %1223 = vector.shape_cast %1222 : vector<2xf32> to vector<2x1xf32>
    %1224 = arith.addf %1210, %1223 : vector<2x1xf32>
    %cst_321 = arith.constant 0.000000e+00 : f32
    %1225 = vector.broadcast %cst_321 : f32 to vector<2x1xf32>
    %cst_322 = arith.constant dense<0.000000e+00> : vector<2xf32>
    %1226 = vector.multi_reduction <add>, %782, %cst_322 [1] : vector<2x32xf32> to vector<2xf32>
    %1227 = vector.shape_cast %1226 : vector<2xf32> to vector<2x1xf32>
    %1228 = arith.addf %1225, %1227 : vector<2x1xf32>
    %cst_323 = arith.constant dense<0.000000e+00> : vector<2xf32>
    %1229 = vector.multi_reduction <add>, %872, %cst_323 [1] : vector<2x32xf32> to vector<2xf32>
    %1230 = vector.shape_cast %1229 : vector<2xf32> to vector<2x1xf32>
    %1231 = arith.addf %1228, %1230 : vector<2x1xf32>
    %cst_324 = arith.constant 1.562500e-02 : f32
    %1232 = vector.broadcast %cst_324 : f32 to vector<2x1xf32>
    %1233 = arith.mulf %1231, %1232 : vector<2x1xf32>
    %1234 = vector.broadcast %1233 : vector<2x1xf32> to vector<2x32xf32>
    %1235 = arith.subf %782, %1234 : vector<2x32xf32>
    %1236 = vector.broadcast %1233 : vector<2x1xf32> to vector<2x32xf32>
    %1237 = arith.subf %872, %1236 : vector<2x32xf32>
    %cst_325 = arith.constant 0.000000e+00 : f32
    %1238 = vector.broadcast %cst_325 : f32 to vector<2x1xf32>
    %1239 = arith.mulf %1235, %1235 : vector<2x32xf32>
    %cst_326 = arith.constant dense<0.000000e+00> : vector<2xf32>
    %1240 = vector.multi_reduction <add>, %1239, %cst_326 [1] : vector<2x32xf32> to vector<2xf32>
    %1241 = vector.shape_cast %1240 : vector<2xf32> to vector<2x1xf32>
    %1242 = arith.addf %1238, %1241 : vector<2x1xf32>
    %1243 = arith.mulf %1237, %1237 : vector<2x32xf32>
    %cst_327 = arith.constant dense<0.000000e+00> : vector<2xf32>
    %1244 = vector.multi_reduction <add>, %1243, %cst_327 [1] : vector<2x32xf32> to vector<2xf32>
    %1245 = vector.shape_cast %1244 : vector<2xf32> to vector<2x1xf32>
    %1246 = arith.addf %1242, %1245 : vector<2x1xf32>
    %cst_328 = arith.constant 1.562500e-02 : f32
    %1247 = vector.broadcast %cst_328 : f32 to vector<2x1xf32>
    %1248 = arith.mulf %1246, %1247 : vector<2x1xf32>
    %cst_329 = arith.constant 9.99999974E-6 : f32
    %1249 = vector.broadcast %cst_329 : f32 to vector<2x1xf32>
    %1250 = arith.addf %1248, %1249 : vector<2x1xf32>
    %1251 = math.rsqrt %1250 : vector<2x1xf32>
    %1252 = vector.broadcast %1251 : vector<2x1xf32> to vector<2x32xf32>
    %1253 = arith.mulf %1235, %1252 : vector<2x32xf32>
    %1254 = vector.extract_strided_slice %1053 {offsets = [0, 0], sizes = [1, 32], strides = [1, 1]} : vector<1x64xf32> to vector<1x32xf32>
    %1255 = vector.broadcast %1254 : vector<1x32xf32> to vector<2x32xf32>
    %1256 = arith.mulf %1253, %1255 : vector<2x32xf32>
    %1257 = vector.extract_strided_slice %1054 {offsets = [0, 0], sizes = [1, 32], strides = [1, 1]} : vector<1x64xf32> to vector<1x32xf32>
    %1258 = vector.broadcast %1257 : vector<1x32xf32> to vector<2x32xf32>
    %1259 = arith.addf %1256, %1258 : vector<2x32xf32>
    %1260 = vector.extract_strided_slice %1055 {offsets = [0, 0], sizes = [1, 32], strides = [1, 1]} : vector<1x64xf32> to vector<1x32xf32>
    %1261 = vector.broadcast %1260 : vector<1x32xf32> to vector<2x32xf32>
    %1262 = arith.mulf %1259, %1261 : vector<2x32xf32>
    %cst_330 = arith.constant dense<0.000000e+00> : vector<2xf32>
    %1263 = vector.multi_reduction <add>, %1262, %cst_330 [1] : vector<2x32xf32> to vector<2xf32>
    %1264 = vector.shape_cast %1263 : vector<2xf32> to vector<2x1xf32>
    %1265 = vector.broadcast %1056 : vector<1x1xf32> to vector<2x1xf32>
    %1266 = arith.addf %1265, %1264 : vector<2x1xf32>
    %1267 = vector.broadcast %1251 : vector<2x1xf32> to vector<2x32xf32>
    %1268 = arith.mulf %1237, %1267 : vector<2x32xf32>
    %1269 = vector.extract_strided_slice %1053 {offsets = [0, 32], sizes = [1, 32], strides = [1, 1]} : vector<1x64xf32> to vector<1x32xf32>
    %1270 = vector.broadcast %1269 : vector<1x32xf32> to vector<2x32xf32>
    %1271 = arith.mulf %1268, %1270 : vector<2x32xf32>
    %1272 = vector.extract_strided_slice %1054 {offsets = [0, 32], sizes = [1, 32], strides = [1, 1]} : vector<1x64xf32> to vector<1x32xf32>
    %1273 = vector.broadcast %1272 : vector<1x32xf32> to vector<2x32xf32>
    %1274 = arith.addf %1271, %1273 : vector<2x32xf32>
    %1275 = vector.extract_strided_slice %1055 {offsets = [0, 32], sizes = [1, 32], strides = [1, 1]} : vector<1x64xf32> to vector<1x32xf32>
    %1276 = vector.broadcast %1275 : vector<1x32xf32> to vector<2x32xf32>
    %1277 = arith.mulf %1274, %1276 : vector<2x32xf32>
    %cst_331 = arith.constant dense<0.000000e+00> : vector<2xf32>
    %1278 = vector.multi_reduction <add>, %1277, %cst_331 [1] : vector<2x32xf32> to vector<2xf32>
    %1279 = vector.shape_cast %1278 : vector<2xf32> to vector<2x1xf32>
    %1280 = arith.addf %1266, %1279 : vector<2x1xf32>
    %cst_332 = arith.constant 0.000000e+00 : f32
    %1281 = vector.broadcast %cst_332 : f32 to vector<2x1xf32>
    %cst_333 = arith.constant dense<0.000000e+00> : vector<2xf32>
    %1282 = vector.multi_reduction <add>, %842, %cst_333 [1] : vector<2x32xf32> to vector<2xf32>
    %1283 = vector.shape_cast %1282 : vector<2xf32> to vector<2x1xf32>
    %1284 = arith.addf %1281, %1283 : vector<2x1xf32>
    %cst_334 = arith.constant dense<0.000000e+00> : vector<2xf32>
    %1285 = vector.multi_reduction <add>, %812, %cst_334 [1] : vector<2x32xf32> to vector<2xf32>
    %1286 = vector.shape_cast %1285 : vector<2xf32> to vector<2x1xf32>
    %1287 = arith.addf %1284, %1286 : vector<2x1xf32>
    %cst_335 = arith.constant 1.562500e-02 : f32
    %1288 = vector.broadcast %cst_335 : f32 to vector<2x1xf32>
    %1289 = arith.mulf %1287, %1288 : vector<2x1xf32>
    %1290 = vector.broadcast %1289 : vector<2x1xf32> to vector<2x32xf32>
    %1291 = arith.subf %842, %1290 : vector<2x32xf32>
    %1292 = vector.broadcast %1289 : vector<2x1xf32> to vector<2x32xf32>
    %1293 = arith.subf %812, %1292 : vector<2x32xf32>
    %cst_336 = arith.constant 0.000000e+00 : f32
    %1294 = vector.broadcast %cst_336 : f32 to vector<2x1xf32>
    %1295 = arith.mulf %1291, %1291 : vector<2x32xf32>
    %cst_337 = arith.constant dense<0.000000e+00> : vector<2xf32>
    %1296 = vector.multi_reduction <add>, %1295, %cst_337 [1] : vector<2x32xf32> to vector<2xf32>
    %1297 = vector.shape_cast %1296 : vector<2xf32> to vector<2x1xf32>
    %1298 = arith.addf %1294, %1297 : vector<2x1xf32>
    %1299 = arith.mulf %1293, %1293 : vector<2x32xf32>
    %cst_338 = arith.constant dense<0.000000e+00> : vector<2xf32>
    %1300 = vector.multi_reduction <add>, %1299, %cst_338 [1] : vector<2x32xf32> to vector<2xf32>
    %1301 = vector.shape_cast %1300 : vector<2xf32> to vector<2x1xf32>
    %1302 = arith.addf %1298, %1301 : vector<2x1xf32>
    %cst_339 = arith.constant 1.562500e-02 : f32
    %1303 = vector.broadcast %cst_339 : f32 to vector<2x1xf32>
    %1304 = arith.mulf %1302, %1303 : vector<2x1xf32>
    %cst_340 = arith.constant 9.99999974E-6 : f32
    %1305 = vector.broadcast %cst_340 : f32 to vector<2x1xf32>
    %1306 = arith.addf %1304, %1305 : vector<2x1xf32>
    %1307 = math.rsqrt %1306 : vector<2x1xf32>
    %1308 = vector.broadcast %1307 : vector<2x1xf32> to vector<2x32xf32>
    %1309 = arith.mulf %1291, %1308 : vector<2x32xf32>
    %1310 = vector.extract_strided_slice %1053 {offsets = [0, 0], sizes = [1, 32], strides = [1, 1]} : vector<1x64xf32> to vector<1x32xf32>
    %1311 = vector.broadcast %1310 : vector<1x32xf32> to vector<2x32xf32>
    %1312 = arith.mulf %1309, %1311 : vector<2x32xf32>
    %1313 = vector.extract_strided_slice %1054 {offsets = [0, 0], sizes = [1, 32], strides = [1, 1]} : vector<1x64xf32> to vector<1x32xf32>
    %1314 = vector.broadcast %1313 : vector<1x32xf32> to vector<2x32xf32>
    %1315 = arith.addf %1312, %1314 : vector<2x32xf32>
    %1316 = vector.extract_strided_slice %1055 {offsets = [0, 0], sizes = [1, 32], strides = [1, 1]} : vector<1x64xf32> to vector<1x32xf32>
    %1317 = vector.broadcast %1316 : vector<1x32xf32> to vector<2x32xf32>
    %1318 = arith.mulf %1315, %1317 : vector<2x32xf32>
    %cst_341 = arith.constant dense<0.000000e+00> : vector<2xf32>
    %1319 = vector.multi_reduction <add>, %1318, %cst_341 [1] : vector<2x32xf32> to vector<2xf32>
    %1320 = vector.shape_cast %1319 : vector<2xf32> to vector<2x1xf32>
    %1321 = vector.broadcast %1056 : vector<1x1xf32> to vector<2x1xf32>
    %1322 = arith.addf %1321, %1320 : vector<2x1xf32>
    %1323 = vector.broadcast %1307 : vector<2x1xf32> to vector<2x32xf32>
    %1324 = arith.mulf %1293, %1323 : vector<2x32xf32>
    %1325 = vector.extract_strided_slice %1053 {offsets = [0, 32], sizes = [1, 32], strides = [1, 1]} : vector<1x64xf32> to vector<1x32xf32>
    %1326 = vector.broadcast %1325 : vector<1x32xf32> to vector<2x32xf32>
    %1327 = arith.mulf %1324, %1326 : vector<2x32xf32>
    %1328 = vector.extract_strided_slice %1054 {offsets = [0, 32], sizes = [1, 32], strides = [1, 1]} : vector<1x64xf32> to vector<1x32xf32>
    %1329 = vector.broadcast %1328 : vector<1x32xf32> to vector<2x32xf32>
    %1330 = arith.addf %1327, %1329 : vector<2x32xf32>
    %1331 = vector.extract_strided_slice %1055 {offsets = [0, 32], sizes = [1, 32], strides = [1, 1]} : vector<1x64xf32> to vector<1x32xf32>
    %1332 = vector.broadcast %1331 : vector<1x32xf32> to vector<2x32xf32>
    %1333 = arith.mulf %1330, %1332 : vector<2x32xf32>
    %cst_342 = arith.constant dense<0.000000e+00> : vector<2xf32>
    %1334 = vector.multi_reduction <add>, %1333, %cst_342 [1] : vector<2x32xf32> to vector<2xf32>
    %1335 = vector.shape_cast %1334 : vector<2xf32> to vector<2x1xf32>
    %1336 = arith.addf %1322, %1335 : vector<2x1xf32>
    %cst_343 = arith.constant 0.000000e+00 : f32
    %1337 = vector.broadcast %cst_343 : f32 to vector<2x1xf32>
    %cst_344 = arith.constant dense<0.000000e+00> : vector<2xf32>
    %1338 = vector.multi_reduction <add>, %902, %cst_344 [1] : vector<2x32xf32> to vector<2xf32>
    %1339 = vector.shape_cast %1338 : vector<2xf32> to vector<2x1xf32>
    %1340 = arith.addf %1337, %1339 : vector<2x1xf32>
    %cst_345 = arith.constant dense<0.000000e+00> : vector<2xf32>
    %1341 = vector.multi_reduction <add>, %752, %cst_345 [1] : vector<2x32xf32> to vector<2xf32>
    %1342 = vector.shape_cast %1341 : vector<2xf32> to vector<2x1xf32>
    %1343 = arith.addf %1340, %1342 : vector<2x1xf32>
    %cst_346 = arith.constant 1.562500e-02 : f32
    %1344 = vector.broadcast %cst_346 : f32 to vector<2x1xf32>
    %1345 = arith.mulf %1343, %1344 : vector<2x1xf32>
    %1346 = vector.broadcast %1345 : vector<2x1xf32> to vector<2x32xf32>
    %1347 = arith.subf %902, %1346 : vector<2x32xf32>
    %1348 = vector.broadcast %1345 : vector<2x1xf32> to vector<2x32xf32>
    %1349 = arith.subf %752, %1348 : vector<2x32xf32>
    %cst_347 = arith.constant 0.000000e+00 : f32
    %1350 = vector.broadcast %cst_347 : f32 to vector<2x1xf32>
    %1351 = arith.mulf %1347, %1347 : vector<2x32xf32>
    %cst_348 = arith.constant dense<0.000000e+00> : vector<2xf32>
    %1352 = vector.multi_reduction <add>, %1351, %cst_348 [1] : vector<2x32xf32> to vector<2xf32>
    %1353 = vector.shape_cast %1352 : vector<2xf32> to vector<2x1xf32>
    %1354 = arith.addf %1350, %1353 : vector<2x1xf32>
    %1355 = arith.mulf %1349, %1349 : vector<2x32xf32>
    %cst_349 = arith.constant dense<0.000000e+00> : vector<2xf32>
    %1356 = vector.multi_reduction <add>, %1355, %cst_349 [1] : vector<2x32xf32> to vector<2xf32>
    %1357 = vector.shape_cast %1356 : vector<2xf32> to vector<2x1xf32>
    %1358 = arith.addf %1354, %1357 : vector<2x1xf32>
    %cst_350 = arith.constant 1.562500e-02 : f32
    %1359 = vector.broadcast %cst_350 : f32 to vector<2x1xf32>
    %1360 = arith.mulf %1358, %1359 : vector<2x1xf32>
    %cst_351 = arith.constant 9.99999974E-6 : f32
    %1361 = vector.broadcast %cst_351 : f32 to vector<2x1xf32>
    %1362 = arith.addf %1360, %1361 : vector<2x1xf32>
    %1363 = math.rsqrt %1362 : vector<2x1xf32>
    %1364 = vector.broadcast %1363 : vector<2x1xf32> to vector<2x32xf32>
    %1365 = arith.mulf %1347, %1364 : vector<2x32xf32>
    %1366 = vector.extract_strided_slice %1053 {offsets = [0, 0], sizes = [1, 32], strides = [1, 1]} : vector<1x64xf32> to vector<1x32xf32>
    %1367 = vector.broadcast %1366 : vector<1x32xf32> to vector<2x32xf32>
    %1368 = arith.mulf %1365, %1367 : vector<2x32xf32>
    %1369 = vector.extract_strided_slice %1054 {offsets = [0, 0], sizes = [1, 32], strides = [1, 1]} : vector<1x64xf32> to vector<1x32xf32>
    %1370 = vector.broadcast %1369 : vector<1x32xf32> to vector<2x32xf32>
    %1371 = arith.addf %1368, %1370 : vector<2x32xf32>
    %1372 = vector.extract_strided_slice %1055 {offsets = [0, 0], sizes = [1, 32], strides = [1, 1]} : vector<1x64xf32> to vector<1x32xf32>
    %1373 = vector.broadcast %1372 : vector<1x32xf32> to vector<2x32xf32>
    %1374 = arith.mulf %1371, %1373 : vector<2x32xf32>
    %cst_352 = arith.constant dense<0.000000e+00> : vector<2xf32>
    %1375 = vector.multi_reduction <add>, %1374, %cst_352 [1] : vector<2x32xf32> to vector<2xf32>
    %1376 = vector.shape_cast %1375 : vector<2xf32> to vector<2x1xf32>
    %1377 = vector.broadcast %1056 : vector<1x1xf32> to vector<2x1xf32>
    %1378 = arith.addf %1377, %1376 : vector<2x1xf32>
    %1379 = vector.broadcast %1363 : vector<2x1xf32> to vector<2x32xf32>
    %1380 = arith.mulf %1349, %1379 : vector<2x32xf32>
    %1381 = vector.extract_strided_slice %1053 {offsets = [0, 32], sizes = [1, 32], strides = [1, 1]} : vector<1x64xf32> to vector<1x32xf32>
    %1382 = vector.broadcast %1381 : vector<1x32xf32> to vector<2x32xf32>
    %1383 = arith.mulf %1380, %1382 : vector<2x32xf32>
    %1384 = vector.extract_strided_slice %1054 {offsets = [0, 32], sizes = [1, 32], strides = [1, 1]} : vector<1x64xf32> to vector<1x32xf32>
    %1385 = vector.broadcast %1384 : vector<1x32xf32> to vector<2x32xf32>
    %1386 = arith.addf %1383, %1385 : vector<2x32xf32>
    %1387 = vector.extract_strided_slice %1055 {offsets = [0, 32], sizes = [1, 32], strides = [1, 1]} : vector<1x64xf32> to vector<1x32xf32>
    %1388 = vector.broadcast %1387 : vector<1x32xf32> to vector<2x32xf32>
    %1389 = arith.mulf %1386, %1388 : vector<2x32xf32>
    %cst_353 = arith.constant dense<0.000000e+00> : vector<2xf32>
    %1390 = vector.multi_reduction <add>, %1389, %cst_353 [1] : vector<2x32xf32> to vector<2xf32>
    %1391 = vector.shape_cast %1390 : vector<2xf32> to vector<2x1xf32>
    %1392 = arith.addf %1378, %1391 : vector<2x1xf32>
    %cst_354 = arith.constant 0.000000e+00 : f32
    %1393 = vector.broadcast %cst_354 : f32 to vector<2x1xf32>
    %cst_355 = arith.constant dense<0.000000e+00> : vector<2xf32>
    %1394 = vector.multi_reduction <add>, %962, %cst_355 [1] : vector<2x32xf32> to vector<2xf32>
    %1395 = vector.shape_cast %1394 : vector<2xf32> to vector<2x1xf32>
    %1396 = arith.addf %1393, %1395 : vector<2x1xf32>
    %cst_356 = arith.constant dense<0.000000e+00> : vector<2xf32>
    %1397 = vector.multi_reduction <add>, %692, %cst_356 [1] : vector<2x32xf32> to vector<2xf32>
    %1398 = vector.shape_cast %1397 : vector<2xf32> to vector<2x1xf32>
    %1399 = arith.addf %1396, %1398 : vector<2x1xf32>
    %cst_357 = arith.constant 1.562500e-02 : f32
    %1400 = vector.broadcast %cst_357 : f32 to vector<2x1xf32>
    %1401 = arith.mulf %1399, %1400 : vector<2x1xf32>
    %1402 = vector.broadcast %1401 : vector<2x1xf32> to vector<2x32xf32>
    %1403 = arith.subf %962, %1402 : vector<2x32xf32>
    %1404 = vector.broadcast %1401 : vector<2x1xf32> to vector<2x32xf32>
    %1405 = arith.subf %692, %1404 : vector<2x32xf32>
    %cst_358 = arith.constant 0.000000e+00 : f32
    %1406 = vector.broadcast %cst_358 : f32 to vector<2x1xf32>
    %1407 = arith.mulf %1403, %1403 : vector<2x32xf32>
    %cst_359 = arith.constant dense<0.000000e+00> : vector<2xf32>
    %1408 = vector.multi_reduction <add>, %1407, %cst_359 [1] : vector<2x32xf32> to vector<2xf32>
    %1409 = vector.shape_cast %1408 : vector<2xf32> to vector<2x1xf32>
    %1410 = arith.addf %1406, %1409 : vector<2x1xf32>
    %1411 = arith.mulf %1405, %1405 : vector<2x32xf32>
    %cst_360 = arith.constant dense<0.000000e+00> : vector<2xf32>
    %1412 = vector.multi_reduction <add>, %1411, %cst_360 [1] : vector<2x32xf32> to vector<2xf32>
    %1413 = vector.shape_cast %1412 : vector<2xf32> to vector<2x1xf32>
    %1414 = arith.addf %1410, %1413 : vector<2x1xf32>
    %cst_361 = arith.constant 1.562500e-02 : f32
    %1415 = vector.broadcast %cst_361 : f32 to vector<2x1xf32>
    %1416 = arith.mulf %1414, %1415 : vector<2x1xf32>
    %cst_362 = arith.constant 9.99999974E-6 : f32
    %1417 = vector.broadcast %cst_362 : f32 to vector<2x1xf32>
    %1418 = arith.addf %1416, %1417 : vector<2x1xf32>
    %1419 = math.rsqrt %1418 : vector<2x1xf32>
    %1420 = vector.broadcast %1419 : vector<2x1xf32> to vector<2x32xf32>
    %1421 = arith.mulf %1403, %1420 : vector<2x32xf32>
    %1422 = vector.extract_strided_slice %1053 {offsets = [0, 0], sizes = [1, 32], strides = [1, 1]} : vector<1x64xf32> to vector<1x32xf32>
    %1423 = vector.broadcast %1422 : vector<1x32xf32> to vector<2x32xf32>
    %1424 = arith.mulf %1421, %1423 : vector<2x32xf32>
    %1425 = vector.extract_strided_slice %1054 {offsets = [0, 0], sizes = [1, 32], strides = [1, 1]} : vector<1x64xf32> to vector<1x32xf32>
    %1426 = vector.broadcast %1425 : vector<1x32xf32> to vector<2x32xf32>
    %1427 = arith.addf %1424, %1426 : vector<2x32xf32>
    %1428 = vector.extract_strided_slice %1055 {offsets = [0, 0], sizes = [1, 32], strides = [1, 1]} : vector<1x64xf32> to vector<1x32xf32>
    %1429 = vector.broadcast %1428 : vector<1x32xf32> to vector<2x32xf32>
    %1430 = arith.mulf %1427, %1429 : vector<2x32xf32>
    %cst_363 = arith.constant dense<0.000000e+00> : vector<2xf32>
    %1431 = vector.multi_reduction <add>, %1430, %cst_363 [1] : vector<2x32xf32> to vector<2xf32>
    %1432 = vector.shape_cast %1431 : vector<2xf32> to vector<2x1xf32>
    %1433 = vector.broadcast %1056 : vector<1x1xf32> to vector<2x1xf32>
    %1434 = arith.addf %1433, %1432 : vector<2x1xf32>
    %1435 = vector.broadcast %1419 : vector<2x1xf32> to vector<2x32xf32>
    %1436 = arith.mulf %1405, %1435 : vector<2x32xf32>
    %1437 = vector.extract_strided_slice %1053 {offsets = [0, 32], sizes = [1, 32], strides = [1, 1]} : vector<1x64xf32> to vector<1x32xf32>
    %1438 = vector.broadcast %1437 : vector<1x32xf32> to vector<2x32xf32>
    %1439 = arith.mulf %1436, %1438 : vector<2x32xf32>
    %1440 = vector.extract_strided_slice %1054 {offsets = [0, 32], sizes = [1, 32], strides = [1, 1]} : vector<1x64xf32> to vector<1x32xf32>
    %1441 = vector.broadcast %1440 : vector<1x32xf32> to vector<2x32xf32>
    %1442 = arith.addf %1439, %1441 : vector<2x32xf32>
    %1443 = vector.extract_strided_slice %1055 {offsets = [0, 32], sizes = [1, 32], strides = [1, 1]} : vector<1x64xf32> to vector<1x32xf32>
    %1444 = vector.broadcast %1443 : vector<1x32xf32> to vector<2x32xf32>
    %1445 = arith.mulf %1442, %1444 : vector<2x32xf32>
    %cst_364 = arith.constant dense<0.000000e+00> : vector<2xf32>
    %1446 = vector.multi_reduction <add>, %1445, %cst_364 [1] : vector<2x32xf32> to vector<2xf32>
    %1447 = vector.shape_cast %1446 : vector<2xf32> to vector<2x1xf32>
    %1448 = arith.addf %1434, %1447 : vector<2x1xf32>
    %cst_365 = arith.constant 0.000000e+00 : f32
    %1449 = vector.broadcast %cst_365 : f32 to vector<2x1xf32>
    %cst_366 = arith.constant dense<0.000000e+00> : vector<2xf32>
    %1450 = vector.multi_reduction <add>, %1022, %cst_366 [1] : vector<2x32xf32> to vector<2xf32>
    %1451 = vector.shape_cast %1450 : vector<2xf32> to vector<2x1xf32>
    %1452 = arith.addf %1449, %1451 : vector<2x1xf32>
    %cst_367 = arith.constant dense<0.000000e+00> : vector<2xf32>
    %1453 = vector.multi_reduction <add>, %632, %cst_367 [1] : vector<2x32xf32> to vector<2xf32>
    %1454 = vector.shape_cast %1453 : vector<2xf32> to vector<2x1xf32>
    %1455 = arith.addf %1452, %1454 : vector<2x1xf32>
    %cst_368 = arith.constant 1.562500e-02 : f32
    %1456 = vector.broadcast %cst_368 : f32 to vector<2x1xf32>
    %1457 = arith.mulf %1455, %1456 : vector<2x1xf32>
    %1458 = vector.broadcast %1457 : vector<2x1xf32> to vector<2x32xf32>
    %1459 = arith.subf %1022, %1458 : vector<2x32xf32>
    %1460 = vector.broadcast %1457 : vector<2x1xf32> to vector<2x32xf32>
    %1461 = arith.subf %632, %1460 : vector<2x32xf32>
    %cst_369 = arith.constant 0.000000e+00 : f32
    %1462 = vector.broadcast %cst_369 : f32 to vector<2x1xf32>
    %1463 = arith.mulf %1459, %1459 : vector<2x32xf32>
    %cst_370 = arith.constant dense<0.000000e+00> : vector<2xf32>
    %1464 = vector.multi_reduction <add>, %1463, %cst_370 [1] : vector<2x32xf32> to vector<2xf32>
    %1465 = vector.shape_cast %1464 : vector<2xf32> to vector<2x1xf32>
    %1466 = arith.addf %1462, %1465 : vector<2x1xf32>
    %1467 = arith.mulf %1461, %1461 : vector<2x32xf32>
    %cst_371 = arith.constant dense<0.000000e+00> : vector<2xf32>
    %1468 = vector.multi_reduction <add>, %1467, %cst_371 [1] : vector<2x32xf32> to vector<2xf32>
    %1469 = vector.shape_cast %1468 : vector<2xf32> to vector<2x1xf32>
    %1470 = arith.addf %1466, %1469 : vector<2x1xf32>
    %cst_372 = arith.constant 1.562500e-02 : f32
    %1471 = vector.broadcast %cst_372 : f32 to vector<2x1xf32>
    %1472 = arith.mulf %1470, %1471 : vector<2x1xf32>
    %cst_373 = arith.constant 9.99999974E-6 : f32
    %1473 = vector.broadcast %cst_373 : f32 to vector<2x1xf32>
    %1474 = arith.addf %1472, %1473 : vector<2x1xf32>
    %1475 = math.rsqrt %1474 : vector<2x1xf32>
    %1476 = vector.broadcast %1475 : vector<2x1xf32> to vector<2x32xf32>
    %1477 = arith.mulf %1459, %1476 : vector<2x32xf32>
    %1478 = vector.extract_strided_slice %1053 {offsets = [0, 0], sizes = [1, 32], strides = [1, 1]} : vector<1x64xf32> to vector<1x32xf32>
    %1479 = vector.broadcast %1478 : vector<1x32xf32> to vector<2x32xf32>
    %1480 = arith.mulf %1477, %1479 : vector<2x32xf32>
    %1481 = vector.extract_strided_slice %1054 {offsets = [0, 0], sizes = [1, 32], strides = [1, 1]} : vector<1x64xf32> to vector<1x32xf32>
    %1482 = vector.broadcast %1481 : vector<1x32xf32> to vector<2x32xf32>
    %1483 = arith.addf %1480, %1482 : vector<2x32xf32>
    %1484 = vector.extract_strided_slice %1055 {offsets = [0, 0], sizes = [1, 32], strides = [1, 1]} : vector<1x64xf32> to vector<1x32xf32>
    %1485 = vector.broadcast %1484 : vector<1x32xf32> to vector<2x32xf32>
    %1486 = arith.mulf %1483, %1485 : vector<2x32xf32>
    %cst_374 = arith.constant dense<0.000000e+00> : vector<2xf32>
    %1487 = vector.multi_reduction <add>, %1486, %cst_374 [1] : vector<2x32xf32> to vector<2xf32>
    %1488 = vector.shape_cast %1487 : vector<2xf32> to vector<2x1xf32>
    %1489 = vector.broadcast %1056 : vector<1x1xf32> to vector<2x1xf32>
    %1490 = arith.addf %1489, %1488 : vector<2x1xf32>
    %1491 = vector.broadcast %1475 : vector<2x1xf32> to vector<2x32xf32>
    %1492 = arith.mulf %1461, %1491 : vector<2x32xf32>
    %1493 = vector.extract_strided_slice %1053 {offsets = [0, 32], sizes = [1, 32], strides = [1, 1]} : vector<1x64xf32> to vector<1x32xf32>
    %1494 = vector.broadcast %1493 : vector<1x32xf32> to vector<2x32xf32>
    %1495 = arith.mulf %1492, %1494 : vector<2x32xf32>
    %1496 = vector.extract_strided_slice %1054 {offsets = [0, 32], sizes = [1, 32], strides = [1, 1]} : vector<1x64xf32> to vector<1x32xf32>
    %1497 = vector.broadcast %1496 : vector<1x32xf32> to vector<2x32xf32>
    %1498 = arith.addf %1495, %1497 : vector<2x32xf32>
    %1499 = vector.extract_strided_slice %1055 {offsets = [0, 32], sizes = [1, 32], strides = [1, 1]} : vector<1x64xf32> to vector<1x32xf32>
    %1500 = vector.broadcast %1499 : vector<1x32xf32> to vector<2x32xf32>
    %1501 = arith.mulf %1498, %1500 : vector<2x32xf32>
    %cst_375 = arith.constant dense<0.000000e+00> : vector<2xf32>
    %1502 = vector.multi_reduction <add>, %1501, %cst_375 [1] : vector<2x32xf32> to vector<2xf32>
    %1503 = vector.shape_cast %1502 : vector<2xf32> to vector<2x1xf32>
    %1504 = arith.addf %1490, %1503 : vector<2x1xf32>
    %1505 = arith.maximumf %1112, %1168 : vector<2x1xf32>
    %1506 = arith.maximumf %1505, %1224 : vector<2x1xf32>
    %1507 = arith.maximumf %1506, %1280 : vector<2x1xf32>
    %1508 = arith.maximumf %1507, %1336 : vector<2x1xf32>
    %1509 = arith.maximumf %1508, %1392 : vector<2x1xf32>
    %1510 = arith.maximumf %1509, %1448 : vector<2x1xf32>
    %1511 = arith.maximumf %1510, %1504 : vector<2x1xf32>
    %1512 = arith.subf %1112, %1511 : vector<2x1xf32>
    %1513 = math.exp %1512 : vector<2x1xf32>
    %1514 = arith.subf %1168, %1511 : vector<2x1xf32>
    %1515 = math.exp %1514 : vector<2x1xf32>
    %1516 = arith.subf %1224, %1511 : vector<2x1xf32>
    %1517 = math.exp %1516 : vector<2x1xf32>
    %1518 = arith.subf %1280, %1511 : vector<2x1xf32>
    %1519 = math.exp %1518 : vector<2x1xf32>
    %1520 = arith.subf %1336, %1511 : vector<2x1xf32>
    %1521 = math.exp %1520 : vector<2x1xf32>
    %1522 = arith.subf %1392, %1511 : vector<2x1xf32>
    %1523 = math.exp %1522 : vector<2x1xf32>
    %1524 = arith.subf %1448, %1511 : vector<2x1xf32>
    %1525 = math.exp %1524 : vector<2x1xf32>
    %1526 = arith.subf %1504, %1511 : vector<2x1xf32>
    %1527 = math.exp %1526 : vector<2x1xf32>
    %1528 = arith.addf %1513, %1515 : vector<2x1xf32>
    %1529 = arith.addf %1528, %1517 : vector<2x1xf32>
    %1530 = arith.addf %1529, %1519 : vector<2x1xf32>
    %1531 = arith.addf %1530, %1521 : vector<2x1xf32>
    %1532 = arith.addf %1531, %1523 : vector<2x1xf32>
    %1533 = arith.addf %1532, %1525 : vector<2x1xf32>
    %1534 = arith.addf %1533, %1527 : vector<2x1xf32>
    %1535 = tpu.reciprocal %1534 {approx = true} : vector<2x1xf32> -> vector<2x1xf32>
    %1536 = arith.mulf %1513, %1535 : vector<2x1xf32>
    %1537 = arith.mulf %1515, %1535 : vector<2x1xf32>
    %1538 = arith.mulf %1517, %1535 : vector<2x1xf32>
    %1539 = arith.mulf %1519, %1535 : vector<2x1xf32>
    %1540 = arith.mulf %1521, %1535 : vector<2x1xf32>
    %1541 = arith.mulf %1523, %1535 : vector<2x1xf32>
    %1542 = arith.mulf %1525, %1535 : vector<2x1xf32>
    %1543 = arith.mulf %1527, %1535 : vector<2x1xf32>
    %c0_376 = arith.constant 0 : index
    %c0_377 = arith.constant 0 : index
    %1544 = vector.load %arg12[%c0_376, %c0_377] : memref<1x128xf32, #tpu.memory_space<vmem>>, vector<1x128xf32>
    %1545 = vector.broadcast %1536 : vector<2x1xf32> to vector<2x32xf32>
    %1546 = arith.mulf %1545, %1091 : vector<2x32xf32>
    %1547 = vector.broadcast %1537 : vector<2x1xf32> to vector<2x32xf32>
    %1548 = arith.mulf %1547, %1147 : vector<2x32xf32>
    %1549 = arith.addf %1546, %1548 : vector<2x32xf32>
    %1550 = vector.broadcast %1538 : vector<2x1xf32> to vector<2x32xf32>
    %1551 = arith.mulf %1550, %1203 : vector<2x32xf32>
    %1552 = arith.addf %1549, %1551 : vector<2x32xf32>
    %1553 = vector.broadcast %1539 : vector<2x1xf32> to vector<2x32xf32>
    %1554 = arith.mulf %1553, %1259 : vector<2x32xf32>
    %1555 = arith.addf %1552, %1554 : vector<2x32xf32>
    %1556 = vector.broadcast %1540 : vector<2x1xf32> to vector<2x32xf32>
    %1557 = arith.mulf %1556, %1315 : vector<2x32xf32>
    %1558 = arith.addf %1555, %1557 : vector<2x32xf32>
    %1559 = vector.broadcast %1541 : vector<2x1xf32> to vector<2x32xf32>
    %1560 = arith.mulf %1559, %1371 : vector<2x32xf32>
    %1561 = arith.addf %1558, %1560 : vector<2x32xf32>
    %1562 = vector.broadcast %1542 : vector<2x1xf32> to vector<2x32xf32>
    %1563 = arith.mulf %1562, %1427 : vector<2x32xf32>
    %1564 = arith.addf %1561, %1563 : vector<2x32xf32>
    %1565 = vector.broadcast %1543 : vector<2x1xf32> to vector<2x32xf32>
    %1566 = arith.mulf %1565, %1483 : vector<2x32xf32>
    %1567 = arith.addf %1564, %1566 : vector<2x32xf32>
    %c0_378 = arith.constant 0 : index
    %c0_379 = arith.constant 0 : index
    %1568 = vector.load %arg11[%c0_378, %c0_379] : memref<64x128xf32, #tpu.memory_space<vmem>>, vector<32x128xf32>
    %cst_380 = arith.constant dense<0.000000e+00> : vector<2x128xf32>
    %1569 = tpu.matmul %1567, %1568, %cst_380 {dimension_numbers = #tpu.dot_dimension_numbers<[1], [0], [0], [1], [0, 0, 1, 1], [], []>} : vector<2x32xf32>, vector<32x128xf32>, vector<2x128xf32> -> vector<2x128xf32>
    %1570 = vector.broadcast %1544 : vector<1x128xf32> to vector<2x128xf32>
    %1571 = arith.addf %1570, %1569 : vector<2x128xf32>
    %1572 = vector.broadcast %1536 : vector<2x1xf32> to vector<2x32xf32>
    %1573 = arith.mulf %1572, %1106 : vector<2x32xf32>
    %1574 = vector.broadcast %1537 : vector<2x1xf32> to vector<2x32xf32>
    %1575 = arith.mulf %1574, %1162 : vector<2x32xf32>
    %1576 = arith.addf %1573, %1575 : vector<2x32xf32>
    %1577 = vector.broadcast %1538 : vector<2x1xf32> to vector<2x32xf32>
    %1578 = arith.mulf %1577, %1218 : vector<2x32xf32>
    %1579 = arith.addf %1576, %1578 : vector<2x32xf32>
    %1580 = vector.broadcast %1539 : vector<2x1xf32> to vector<2x32xf32>
    %1581 = arith.mulf %1580, %1274 : vector<2x32xf32>
    %1582 = arith.addf %1579, %1581 : vector<2x32xf32>
    %1583 = vector.broadcast %1540 : vector<2x1xf32> to vector<2x32xf32>
    %1584 = arith.mulf %1583, %1330 : vector<2x32xf32>
    %1585 = arith.addf %1582, %1584 : vector<2x32xf32>
    %1586 = vector.broadcast %1541 : vector<2x1xf32> to vector<2x32xf32>
    %1587 = arith.mulf %1586, %1386 : vector<2x32xf32>
    %1588 = arith.addf %1585, %1587 : vector<2x32xf32>
    %1589 = vector.broadcast %1542 : vector<2x1xf32> to vector<2x32xf32>
    %1590 = arith.mulf %1589, %1442 : vector<2x32xf32>
    %1591 = arith.addf %1588, %1590 : vector<2x32xf32>
    %1592 = vector.broadcast %1543 : vector<2x1xf32> to vector<2x32xf32>
    %1593 = arith.mulf %1592, %1498 : vector<2x32xf32>
    %1594 = arith.addf %1591, %1593 : vector<2x32xf32>
    %c32_381 = arith.constant 32 : index
    %c0_382 = arith.constant 0 : index
    %1595 = vector.load %arg11[%c32_381, %c0_382] : memref<64x128xf32, #tpu.memory_space<vmem>>, vector<32x128xf32>
    %cst_383 = arith.constant dense<0.000000e+00> : vector<2x128xf32>
    %1596 = tpu.matmul %1594, %1595, %cst_383 {dimension_numbers = #tpu.dot_dimension_numbers<[1], [0], [0], [1], [0, 0, 1, 1], [], []>} : vector<2x32xf32>, vector<32x128xf32>, vector<2x128xf32> -> vector<2x128xf32>
    %1597 = arith.addf %1571, %1596 : vector<2x128xf32>
    %c0_384 = arith.constant 0 : index
    %c0_385 = arith.constant 0 : index
    %1598 = vector.load %arg13[%c0_384, %c0_385] : memref<2x128xf32, #tpu.memory_space<vmem>>, vector<2x128xf32>
    tpu.vector_store %arg13[%c0_384, %c0_385], %1597 {strides = array<i32>} : memref<2x128xf32, #tpu.memory_space<vmem>>, vector<2x128xf32>,
    return
  }
}

</mosaic_0001>

<bundles_post_ra>
// kernel: lstm_model_forward.1
= control target key start
LH: loop header
LB: loop body
LE: loop exit
PB: predicated region body
PF: predicated region fallthrough
CT: control target
= control target key end

     0   :  { %s8787_s0 = inlined_call_operand.vmem [shape: f32[8,2,16], index: 0, kind: input, shape index: {}]   ;;  %s8788_s1 = inlined_call_operand.hbm [shape: f32[16,256], index: 1, kind: input, shape index: {}]   ;;  %s8789_s2 = inlined_call_operand.vmem [shape: f32[2,32,128], index: 2, kind: input, shape index: {}]   ;;  %s8790_s3 = inlined_call_operand.vmem [shape: f32[1,256], index: 3, kind: input, shape index: {}]   ;;  %s8791_s4 = inlined_call_operand.vmem [shape: f32[64,256], index: 4, kind: input, shape index: {}]   ;;  %s8792_s5 = inlined_call_operand.vmem [shape: f32[2,32,128], index: 5, kind: input, shape index: {}]   ;;  %s8793_s6 = inlined_call_operand.hbm [shape: f32[1,256], index: 6, kind: input, shape index: {}]   ;;  %s8794_s7 = inlined_call_operand.vmem [shape: f32[1,64], index: 7, kind: input, shape index: {}]   ;;  %s8795_s8 = inlined_call_operand.vmem [shape: f32[1,64], index: 8, kind: input, shape index: {}]   ;;  %s8796_s9 = inlined_call_operand.vmem [shape: f32[1,64], index: 9, kind: input, shape index: {}]   ;;  %s8797_s10 = inlined_call_operand.<no memory space> [shape: f32[1,1], index: 10, kind: input, shape index: {}]   ;;  %s8798_s11 = inlined_call_operand.vmem [shape: f32[64,128], index: 11, kind: input, shape index: {}]   ;;  %s8799_s12 = inlined_call_operand.vmem [shape: f32[1,128], index: 12, kind: input, shape index: {}]   ;;  %s8800_s13 = inlined_call_operand.hbm [shape: f32[2,128], index: 13, kind: output, shape index: {}]  }
   0x1   :  { %v18_v0 = vstv %s8797_s10 }
   0x2   :  { %19 = vst [vmem:[#allocation2] sm:$0x1] %v18_v0 }
   0x3   :  { %20 = vsyncpa [#allocation4], 0 }
   0x4   :  { %21 = vsyncpa [#allocation7], 0 }
   0x5   :  { %22 = vsyncpa [#allocation5], 0  ;;  %s7345_s27 = smov [#allocation3]   ;;  %s7273_s14 = scalar_lea.hbm %s8788_s1, 512 }
   0x6   :  { %s30_s28 = sshll.u32 %s7345_s27, 4  ;;  %p7274_p0 = scmp.ne.s32.totalorder %s8788_s1, %s7273_s14  ;;  %s31_s28 = int_to_ptr.vmem [resolvable:$true] %s30_s28 }
   0x7   :  { %p7277_p1 = scmp.lt.u32.totalorder %s7273_s14, %s8788_s1 }
   0x9   :  { %p7279_p2 = pnand %p7277_p1, %p7274_p0 }
   0xb   :  { %7282 = shalt.err (!%p7279_p2)
}
   0xc   :  { %s7283_s10 = scalar_lea.vmem %s31_s28, 512  ;;  %p7288_p4 = scmp.lt.s32.totalorder %s31_s28, %s31_s28 }
   0xd   :  { %p7284_p3 = scmp.ne.s32.totalorder %s31_s28, %s7283_s10  ;;  %p7289_p5 = scmp.lt.s32.totalorder %s7283_s10, %s7283_s10 }
   0xf   :  { %p7290_p6 = por %p7289_p5, %p7288_p4 }
  0x11   :  { %p7291_p7 = pnand %p7290_p6, %p7284_p3 }
  0x13   :  { %7294 = shalt.err (!%p7291_p7)
}
  0x14   :  { %s7346_s19 = smov 256   ;;  %s7347_s20 = smov 16  }
  0x15   :  { %36 = dma.hbm_to_vmem [thread:$0]  %s8788_s1, 512, %s31_s28, [#allocation4], %s7346_s19, %s7346_s19, %s7347_s20  }
  0x16   :  { %s7348_s23 = smov [#allocation6]   ;;  %s7295_s27 = scalar_lea.hbm %s8793_s6, 32 }
  0x17   :  { %s51_s24 = sshll.u32 %s7348_s23, 4  ;;  %p7296_p8 = scmp.ne.s32.totalorder %s8793_s6, %s7295_s27  ;;  %s52_s24 = int_to_ptr.vmem [resolvable:$true] %s51_s24 }
  0x18   :  { %p7299_p9 = scmp.lt.u32.totalorder %s7295_s27, %s8793_s6 }
  0x1a   :  { %p7301_p10 = pnand %p7299_p9, %p7296_p8 }
  0x1c   :  { %7304 = shalt.err (!%p7301_p10)
}
  0x1d   :  { %s7305_s16 = scalar_lea.vmem %s52_s24, 32  ;;  %p7310_p12 = scmp.lt.s32.totalorder %s52_s24, %s52_s24 }
  0x1e   :  { %p7306_p11 = scmp.ne.s32.totalorder %s52_s24, %s7305_s16  ;;  %p7311_p13 = scmp.lt.s32.totalorder %s7305_s16, %s7305_s16 }
  0x20   :  { %p7312_p0 = por %p7311_p13, %p7310_p12 }
  0x22   :  { %p7313_p1 = pnand %p7312_p0, %p7306_p11 }
  0x24   :  { %7316 = shalt.err (!%p7313_p1)
}
  0x25   :  { %54 = dma.hbm_to_vmem [thread:$0]  %s8793_s6, 32, %s52_s24, [#allocation7]  }
  0x26   :  { %7339 = dma.done.wait [#allocation4], 512  }
  0x27   :  { %7340 = vsyncadd [#allocation4], 4294966784 }
  0x28   :  { %7341 = dma.done.wait [#allocation7], 32  }
  0x29   :  { %7342 = vsyncadd [#allocation7], 4294967264  ;;  %v7349_v1 = vmov 0.0   ;;  %v74_v2 = vld [vmem:[#allocation3 + $0x8] sm:$0xff]  ;;  %v76_v3 = vld [vmem:[#allocation3 + $0x18] sm:$0xff]  ;;  %vm90_vm0 = vcmask 130048   ;;  %v80_v30 = vlaneseq }
  0x2a   :  { %234 = vmatprep.mubr.f32.mxu1 %v7349_v1  ;;  %158 = vmatprep.mubr.f32.mxu0 %v7349_v1  ;;  %v73_v4 = vld [vmem:[#allocation3] sm:$0xff]  ;;  %v7456_v5 = vpack.c.bf16 %v76_v3, %v74_v2  ;;  %v75_v6 = vld [vmem:[#allocation3 + $0x10] sm:$0xff]  ;;  %v5929_v11 = vld [vmem:[%s8787_s0 + $0xa] sm:$0x3]  ;;  %v7350_v16 = vmov 0.0|0.0   ;;  %vm7351_vm1 = vmmov 0  }
  0x2b   :  { %v7458_v7 = vpack.c.bf16 %v75_v6, %v73_v4  ;;  %v5921_v8 = vld [vmem:[%s8787_s0 + $0x2] sm:$0x3]  ;;  %v78_v9 = vld [vmem:[%s8787_s0] sm:$0x3]  ;;  %v5925_v10 = vld [vmem:[%s8787_s0 + $0x6] sm:$0x3] }
  0x2c   :  { %6575 = vmatprep.subr.bf16.mxu1 %v7456_v5  ;;  %6571 = vmatprep.subr.bf16.mxu0 %v7456_v5  ;;  %v697_v12 = vld [vmem:[%s8789_s2] sm:$0xff]  ;;  %v698_v13 = vld [vmem:[%s8789_s2 + $0x8] sm:$0xff]  ;;  %v699_v17 = vld [vmem:[%s8789_s2 + $0x10] sm:$0xff]  ;;  %v7560_v33 = vshrl.u32 %v80_v30, 7  ;;  %s7353_s22 = smov 32   ;;  %vm701_vm2 = vcmask 261120  }
  0x2d   :  { %6577 = vmatpush1.bf16.msra.mxu1 %v7458_v7  ;;  %6573 = vmatpush1.bf16.msra.mxu0 %v7458_v7  ;;  %v5933_v14 = vld [vmem:[%s8787_s0 + $0xe] sm:$0x3]  ;;  %v7502_v15 = vpack.c.bf16 %v698_v13, %v697_v12  ;;  %v700_v18 = vld [vmem:[%s8789_s2 + $0x18] sm:$0xff]  ;;  %v5936_v20 = vld [vmem:[%s8789_s2 + $0x20] sm:$0xff]  ;;  %s7354_s28 = smov 96   ;;  %vm5110_vm3 = vcmask 254976  }
  0x2e   :  { %6583 = vmatprep.subr.bf16.mxu1 %v7456_v5  ;;  %6579 = vmatprep.subr.bf16.mxu0 %v7456_v5  ;;  %v7513_v19 = vpack.c.bf16 %v700_v18, %v699_v17  ;;  %v5937_v21 = vld [vmem:[%s8789_s2 + $0x28] sm:$0xff]  ;;  %v5938_v23 = vld [vmem:[%s8789_s2 + $0x30] sm:$0xff]  ;;  %v5939_v24 = vld [vmem:[%s8789_s2 + $0x38] sm:$0xff]  ;;  %v82_v36 = vsub.s32 0, %v7560_v33  ;;  %v86_v43 = vsub.s32 1, %v7560_v33  ;;  %s7356_s14 = smov [#allocation8]  }
  0x2f   :  { %v7525_v22 = vpack.c.bf16 %v5937_v21, %v5936_v20  ;;  %v7536_v25 = vpack.c.bf16 %v5939_v24, %v5938_v23  ;;  %v77_v37 = vld [vmem:[%s8790_s3] sm:$0x3]  ;;  %s7352_s3 = smov 64   ;;  %v5931_v13 = vld [vmem:[%s8787_s0 + $0xc] sm:$0x3] }
  0x30   :  { %5922 = vmatmul.mubr.msk.f32.vlgmr.msra.gmra.mrb[0].mxu1 %vm90_vm0, %v5921_v8  ;;  %5920 = vmatmul.mubr.msk.f32.vlgmr.msra.gmra.mrb[0].mxu0 %vm90_vm0, %v78_v9  ;;  %v7574_v40 = vrot.slane %v77_v37, %v82_v36  ;;  %v7580_v46 = vrot.slane %v77_v37, %v86_v43 }
  0x31   :  { %6585 = vmatpush1.bf16.msra.mxu1 %v7458_v7  ;;  %386 = vmatprep.mubr.f32.mxu1 %v7349_v1 }
  0x32   :  { %6591 = vmatprep.subr.bf16.mxu1 %v7456_v5  ;;  %6581 = vmatpush1.bf16.msra.mxu0 %v7458_v7 }
  0x33   :  { %310 = vmatprep.mubr.f32.mxu0 %v7349_v1  ;;  %6587 = vmatprep.subr.bf16.mxu0 %v7456_v5 }
  0x34   :  { %5926 = vmatmul.mubr.msk.f32.vlgmr.msra.gmra.mrb[2].mxu1 %vm90_vm0, %v5925_v10  ;;  %v5923_v10 = vld [vmem:[%s8787_s0 + $0x4] sm:$0x3] }
  0x35   :  { %6593 = vmatpush1.bf16.msra.mxu1 %v7458_v7  ;;  %538 = vmatprep.mubr.f32.mxu1 %v7349_v1 }
  0x36   :  { %6599 = vmatprep.subr.bf16.mxu1 %v7456_v5  ;;  %5924 = vmatmul.mubr.msk.f32.vlgmr.msra.gmra.mrb[2].mxu0 %vm90_vm0, %v5923_v10 }
  0x37   :  { %6589 = vmatpush1.bf16.msra.mxu0 %v7458_v7  ;;  %462 = vmatprep.mubr.f32.mxu0 %v7349_v1 }
  0x38   :  { %5930 = vmatmul.mubr.msk.f32.vlgmr.msra.gmra.mrb[4].mxu1 %vm90_vm0, %v5929_v11  ;;  %v5927_v11 = vld [vmem:[%s8787_s0 + $0x8] sm:$0x3]  ;;  %6595 = vmatprep.subr.bf16.mxu0 %v7456_v5 }
  0x39   :  { %6601 = vmatpush1.bf16.msra.mxu1 %v7458_v7  ;;  %690 = vmatprep.mubr.f32.mxu1 %v7349_v1 }
  0x3a   :  { %6602 = vmatprep.subr.bf16.mxu1 %v7350_v16  ;;  %5928 = vmatmul.mubr.msk.f32.vlgmr.msra.gmra.mrb[4].mxu0 %vm90_vm0, %v5927_v11 }
  0x3b   :  { %6597 = vmatpush1.bf16.msra.mxu0 %v7458_v7  ;;  %614 = vmatprep.mubr.f32.mxu0 %v7349_v1 }
  0x3c   :  { %5934 = vmatmul.mubr.msk.f32.vlgmr.msra.gmra.mrb[6].mxu1 %vm90_vm0, %v5933_v14  ;;  %6614 = vmatprep.subr.bf16.mxu0 %v7350_v16 }
  0x3d   :  { %6604 = vmatpush3.bf16.msra.mxu1 %v7502_v15  ;;  %6204 = vmatprep.mubr.msk.f32.mxu1 %vm7351_vm1, %v7349_v1 }
  0x3e   :  { %6605 = vmatprep.subr.bf16.mxu1 %v7350_v16  ;;  %5932 = vmatmul.mubr.msk.f32.vlgmr.msra.gmra.mrb[6].mxu0 %vm90_vm0, %v5931_v13 }
  0x3f   :  { %6616 = vmatpush3.bf16.msra.mxu0 %v7502_v15  ;;  %6226 = vmatprep.mubr.msk.f32.mxu0 %vm7351_vm1, %v7349_v1 }
  0x40   :  { %6617 = vmatprep.subr.bf16.mxu0 %v7350_v16 }
  0x41   :  { %6607 = vmatpush3.bf16.msra.mxu1 %v7513_v19 }
  0x42   :  { %6608 = vmatprep.subr.bf16.mxu1 %v7350_v16 }
  0x43   :  { %6619 = vmatpush3.bf16.msra.mxu0 %v7513_v19 }
  0x44   :  { %6205 = vmatmul.mubr.f32.vlgmr.msra.gmra.mrb[8].mxu1 %v7349_v1  ;;  %6626 = vmatprep.subr.bf16.mxu0 %v7350_v16 }
  0x45   :  { %6610 = vmatpush3.bf16.msra.mxu1 %v7525_v22  ;;  %6215 = vmatprep.mubr.msk.f32.mxu1 %vm7351_vm1, %v7349_v1 }
  0x46   :  { %6611 = vmatprep.subr.bf16.mxu1 %v7350_v16 }
  0x49   :  { %6613 = vmatpush3.bf16.msra.mxu1 %v7536_v25 }
  0x4a   :  { %6620 = vmatprep.subr.bf16.mxu1 %v7350_v16 }
  0x4c   :  { %6216 = vmatmul.mubr.f32.vlgmr.msra.gmra.mrb[10].mxu1 %v7349_v1 }
  0x4d   :  { %6622 = vmatpush3.bf16.msra.mxu1 %v7525_v22  ;;  %6237 = vmatprep.mubr.msk.f32.mxu1 %vm7351_vm1, %v7349_v1 }
  0x4e   :  { %6623 = vmatprep.subr.bf16.mxu1 %v7350_v16 }
  0x51   :  { %6625 = vmatpush3.bf16.msra.mxu1 %v7536_v25 }
  0x52   :  { %6632 = vmatprep.subr.bf16.mxu1 %v7350_v16 }
 0x103   :  { %v7550_v26 = vpop.f32.mrb[0].mxu1  ;;  %v160_v27 = vpop.f32.mrb[0].mxu0 }
 0x104   :  { %v7552_v28 = vpop.f32.mrb[1].mxu1  ;;  %v7554_v29 = vpop.f32.mrb[1].mxu0  ;;  %v161_v41 = vadd.f32 %v160_v27, %v7574_v40 }
 0x107   :  { %v7556_v31 = vpop.f32.mrb[2].mxu1 }
 0x108   :  { %v7558_v32 = vpop.f32.mrb[3].mxu1 }
 0x109   :  { %v7621_v20 = vpop.f32.mrb[2].mxu0 }
 0x10a   :  { %v7623_v21 = vpop.f32.mrb[3].mxu0 }
 0x10b   :  { %v7562_v34 = vpop.f32.mrb[4].mxu1 }
 0x10c   :  { %v7564_v35 = vpop.f32.mrb[5].mxu1 }
 0x10d   :  { %v7625_v23 = vpop.f32.mrb[4].mxu0 }
 0x10e   :  { %v7627_v24 = vpop.f32.mrb[5].mxu0 }
 0x10f   :  { %v7570_v38 = vpop.f32.mrb[6].mxu1 }
 0x110   :  { %v694_v39 = vpop.f32.mrb[7].mxu1 }
 0x111   :  { %v695_v47 = vadd.f32 %v694_v39, %v7580_v46  ;;  %v7629_v27 = vpop.f32.mrb[6].mxu0 }
 0x112   :  { %v618_v30 = vpop.f32.mrb[7].mxu0 }
 0x117   :  { %v771_v42 = vpop.f32.mrb[8].mxu1 }
 0x118   :  { %v775_v44 = vadd.f32 %v771_v42, %v161_v41  ;;  %v6206_v45 = vpop.f32.mrb[9].mxu1  ;;  %v619_v41 = vadd.f32 %v618_v30, %v7580_v46 }
 0x11a   :  { %v5935_v54 = vmul.f32 -1.442695, %v775_v44 }
 0x11f   :  { %v871_v48 = vpop.f32.mrb[10].mxu1 }
 0x120   :  { %v875_v49 = vadd.f32 %v871_v48, %v695_v47  ;;  %v6217_v50 = vpop.f32.mrb[11].mxu1  ;;  %v237_v47 = vadd.f32 %v7550_v26, %v7574_v40 }
 0x122   :  { %6983 = vtanh.f32 %v875_v49  ;;  %v5940_v53 = vmul.f32 -1.442695, %v875_v49 }
 0x123   :  { %6985 = vtanh.f32 %v775_v44 }
 0x124   :  { %6987 = vpow2.f32 %v5940_v53 }
 0x125   :  { %6989 = vpow2.f32 %v5935_v54 }
 0x12c   :  { %v6984_v51 = vpop.eup %6983 }
 0x12d   :  { %885 = vrot.lane.b32.xlu0 %v6984_v51, %s7352_s3  ;;  %v6986_v52 = vpop.eup %6985 }
 0x12e   :  { %v6988_v55 = vpop.eup %6987 }
 0x12f   :  { %v879_v56 = vadd.f32 1.0, %v6988_v55  ;;  %v6990_v57 = vpop.eup %6989 }
 0x130   :  { %v779_v58 = vadd.f32 1.0, %v6990_v57 }
 0x131   :  { %785 = vrot.lane.b32.xlu0 %v6986_v52, %s7352_s3  ;;  %6991 = vrcp.f32 %v879_v56 }
 0x132   :  { %6993 = vrcp.f32 %v779_v58 }
 0x13b   :  { %v6992_v59 = vpop.eup %6991 }
 0x13c   :  { %v6994_v62 = vpop.eup %6993  ;;  %v883_v2 = vmul.f32 0.0, %v6992_v59 }
 0x13d   :  { %v783_v6 = vmul.f32 0.0, %v6994_v62 }
 0x19f   :  { %v886_v60 = vpop.permute.xlu0 %885 }
 0x1a0   :  { %v888_v61 = vmul.f32 %v6992_v59, %v886_v60 }
 0x1a2   :  { %890 = vrot.lane.b32.xlu1 %v888_v61, %s7353_s22 }
 0x1a3   :  { %v786_v63 = vpop.permute.xlu0 %785 }
 0x1a4   :  { %v788_v0 = vmul.f32 %v6994_v62, %v786_v63 }
 0x1a6   :  { %790 = vrot.lane.b32.xlu1 %v788_v0, %s7353_s22 }
 0x214   :  { %v891_v3 = vpop.permute.xlu1 %890 }
 0x215   :  { %v7587_v4 = vadd.f32 %v891_v3, %v883_v2 }
 0x217   :  { %6995 = vtanh.f32 %v7587_v4 }
 0x218   :  { %v791_v8 = vpop.permute.xlu1 %790 }
 0x219   :  { %v7590_v9 = vadd.f32 %v791_v8, %v783_v6 }
 0x21b   :  { %6997 = vtanh.f32 %v7590_v9 }
 0x221   :  { %v6996_v12 = vpop.eup %6995 }
 0x222   :  { %896 = vrot.lane.b32.xlu0 %v6996_v12, %s7352_s3 }
 0x225   :  { %v6998_v14 = vpop.eup %6997 }
 0x226   :  { %796 = vrot.lane.b32.xlu1 %v6998_v14, %s7352_s3 }
 0x294   :  { %v897_v5 = vpop.permute.xlu0 %896 }
 0x295   :  { %v899_v7 = vmul.f32 %v6992_v59, %v897_v5 }
 0x297   :  { %1001 = vrot.lane.b32.xlu0 %v899_v7, %s7353_s22 }
 0x298   :  { %v797_v17 = vpop.permute.xlu1 %796 }
 0x299   :  { %v799_v18 = vmul.f32 %v6994_v62, %v797_v17  ;;  %v543_v17 = vadd.f32 %v7564_v35, %v7580_v46 }
 0x29b   :  { %901 = vrot.lane.b32.xlu1 %v799_v18, %s7353_s22 }
 0x309   :  { %v7631_v37 = vpop.permute.xlu0 %1001 }
 0x30a   :  { %6238 = vmatmul.mubr.msk.f32.vlgmr.msra.gmra.mrb[12].mxu1 %vm701_vm2, %v7631_v37 }
 0x30b   :  { %6634 = vmatpush3.bf16.msra.mxu1 %v7525_v22  ;;  %6259 = vmatprep.mubr.msk.f32.mxu1 %vm7351_vm1, %v7349_v1 }
 0x30c   :  { %6635 = vmatprep.subr.bf16.mxu1 %v7350_v16 }
 0x30d   :  { %v7639_v39 = vpop.permute.xlu1 %901 }
 0x30e   :  { %6227 = vmatmul.mubr.msk.f32.vlgmr.msra.gmra.mrb[8].mxu0 %vm701_vm2, %v7639_v39 }
 0x30f   :  { %6628 = vmatpush3.bf16.msra.mxu0 %v7502_v15  ;;  %6637 = vmatpush3.bf16.msra.mxu1 %v7536_v25 }
 0x310   :  { %6629 = vmatprep.subr.bf16.mxu0 %v7350_v16  ;;  %6248 = vmatprep.mubr.msk.f32.mxu0 %vm7351_vm1, %v7349_v1 }
 0x311   :  { %6644 = vmatprep.subr.bf16.mxu1 %v7350_v16 }
 0x313   :  { %6631 = vmatpush3.bf16.msra.mxu0 %v7513_v19 }
 0x314   :  { %6638 = vmatprep.subr.bf16.mxu0 %v7350_v16 }
 0x3dd   :  { %v1071_v42 = vpop.f32.mrb[12].mxu1 }
 0x3de   :  { %v1075_v44 = vadd.f32 %v1071_v42, %v619_v41  ;;  %v6239_v45 = vpop.f32.mrb[13].mxu1  ;;  %v313_v42 = vadd.f32 %v7621_v20, %v7574_v40 }
 0x3e0   :  { %6999 = vtanh.f32 %v1075_v44  ;;  %v5944_v53 = vmul.f32 -1.442695, %v1075_v44 }
 0x3e1   :  { %v971_v48 = vpop.f32.mrb[8].mxu0 }
 0x3e2   :  { %v975_v49 = vadd.f32 %v971_v48, %v237_v47  ;;  %v6228_v50 = vpop.f32.mrb[9].mxu0 }
 0x3e4   :  { %7001 = vtanh.f32 %v975_v49  ;;  %v5942_v54 = vmul.f32 -1.442695, %v975_v49 }
 0x3e5   :  { %7003 = vpow2.f32 %v5944_v53 }
 0x3e6   :  { %7005 = vpow2.f32 %v5942_v54 }
 0x3ea   :  { %v7000_v51 = vpop.eup %6999 }
 0x3eb   :  { %1085 = vrot.lane.b32.xlu0 %v7000_v51, %s7352_s3 }
 0x3ee   :  { %v7002_v52 = vpop.eup %7001 }
 0x3ef   :  { %985 = vrot.lane.b32.xlu1 %v7002_v52, %s7352_s3  ;;  %v7004_v55 = vpop.eup %7003 }
 0x3f0   :  { %v1079_v56 = vadd.f32 1.0, %v7004_v55  ;;  %v7006_v57 = vpop.eup %7005 }
 0x3f1   :  { %v979_v26 = vadd.f32 1.0, %v7006_v57 }
 0x3f2   :  { %7007 = vrcp.f32 %v1079_v56 }
 0x3f3   :  { %7009 = vrcp.f32 %v979_v26 }
 0x3fc   :  { %v7008_v58 = vpop.eup %7007 }
 0x3fd   :  { %v7010_v61 = vpop.eup %7009  ;;  %v1083_v0 = vmul.f32 %v7008_v58, %v7587_v4 }
 0x3fe   :  { %v983_v6 = vmul.f32 %v7010_v61, %v7590_v9 }
 0x45d   :  { %v1086_v59 = vpop.permute.xlu0 %1085 }
 0x45e   :  { %v1088_v60 = vmul.f32 %v7008_v58, %v1086_v59 }
 0x460   :  { %1090 = vrot.lane.b32.xlu0 %v1088_v60, %s7353_s22 }
 0x461   :  { %v986_v62 = vpop.permute.xlu1 %985 }
 0x462   :  { %v988_v63 = vmul.f32 %v7010_v61, %v986_v62 }
 0x464   :  { %990 = vrot.lane.b32.xlu1 %v988_v63, %s7353_s22 }
 0x4d2   :  { %v1091_v2 = vpop.permute.xlu0 %1090 }
 0x4d3   :  { %v1093_v3 = vadd.f32 %v1091_v2, %v1083_v0 }
 0x4d5   :  { %7011 = vtanh.f32 %v1093_v3 }
 0x4d6   :  { %v991_v8 = vpop.permute.xlu1 %990 }
 0x4d7   :  { %v993_v10 = vadd.f32 %v991_v8, %v983_v6 }
 0x4d9   :  { %7013 = vtanh.f32 %v993_v10 }
 0x4df   :  { %v7012_v11 = vpop.eup %7011 }
 0x4e0   :  { %1096 = vrot.lane.b32.xlu0 %v7012_v11, %s7352_s3 }
 0x4e3   :  { %v7014_v12 = vpop.eup %7013 }
 0x4e4   :  { %996 = vrot.lane.b32.xlu1 %v7014_v12, %s7352_s3 }
 0x552   :  { %v1097_v13 = vpop.permute.xlu0 %1096 }
 0x553   :  { %v1099_v14 = vmul.f32 %v7008_v58, %v1097_v13 }
 0x555   :  { %1201 = vrot.lane.b32.xlu0 %v1099_v14, %s7353_s22  ;;  %v467_v14 = vadd.f32 %v7627_v24, %v7580_v46 }
 0x556   :  { %v997_v5 = vpop.permute.xlu1 %996 }
 0x557   :  { %v999_v4 = vmul.f32 %v7010_v61, %v997_v5 }
 0x559   :  { %1101 = vrot.lane.b32.xlu1 %v999_v4, %s7353_s22 }
 0x5c7   :  { %v7664_v7 = vpop.permute.xlu0 %1201 }
 0x5c8   :  { %6260 = vmatmul.mubr.msk.f32.vlgmr.msra.gmra.mrb[14].mxu1 %vm701_vm2, %v7664_v7 }
 0x5c9   :  { %6646 = vmatpush3.bf16.msra.mxu1 %v7525_v22  ;;  %6281 = vmatprep.mubr.msk.f32.mxu1 %vm7351_vm1, %v7349_v1 }
 0x5ca   :  { %6647 = vmatprep.subr.bf16.mxu1 %v7350_v16 }
 0x5cb   :  { %v7672_v9 = vpop.permute.xlu1 %1101 }
 0x5cc   :  { %6249 = vmatmul.mubr.msk.f32.vlgmr.msra.gmra.mrb[10].mxu0 %vm701_vm2, %v7672_v9 }
 0x5cd   :  { %6640 = vmatpush3.bf16.msra.mxu0 %v7502_v15  ;;  %6649 = vmatpush3.bf16.msra.mxu1 %v7536_v25 }
 0x5ce   :  { %6641 = vmatprep.subr.bf16.mxu0 %v7350_v16  ;;  %6270 = vmatprep.mubr.msk.f32.mxu0 %vm7351_vm1, %v7349_v1 }
 0x5cf   :  { %6656 = vmatprep.subr.bf16.mxu1 %v7350_v16 }
 0x5d1   :  { %6643 = vmatpush3.bf16.msra.mxu0 %v7513_v19 }
 0x5d2   :  { %6650 = vmatprep.subr.bf16.mxu0 %v7350_v16 }
 0x69b   :  { %v1271_v18 = vpop.f32.mrb[14].mxu1 }
 0x69c   :  { %v1275_v30 = vadd.f32 %v1271_v18, %v543_v17  ;;  %v6261_v41 = vpop.f32.mrb[15].mxu1  ;;  %v389_v18 = vadd.f32 %v7556_v31, %v7574_v40 }
 0x69e   :  { %7015 = vtanh.f32 %v1275_v30  ;;  %v5948_v50 = vmul.f32 -1.442695, %v1275_v30 }
 0x69f   :  { %v1171_v44 = vpop.f32.mrb[10].mxu0 }
 0x6a0   :  { %v1175_v45 = vadd.f32 %v1171_v44, %v313_v42  ;;  %v6250_v47 = vpop.f32.mrb[11].mxu0 }
 0x6a2   :  { %7017 = vtanh.f32 %v1175_v45  ;;  %v5946_v35 = vmul.f32 -1.442695, %v1175_v45 }
 0x6a3   :  { %7019 = vpow2.f32 %v5948_v50 }
 0x6a4   :  { %7021 = vpow2.f32 %v5946_v35 }
 0x6a8   :  { %v7016_v48 = vpop.eup %7015 }
 0x6a9   :  { %1285 = vrot.lane.b32.xlu0 %v7016_v48, %s7352_s3 }
 0x6ac   :  { %v7018_v49 = vpop.eup %7017 }
 0x6ad   :  { %1185 = vrot.lane.b32.xlu1 %v7018_v49, %s7352_s3  ;;  %v7020_v51 = vpop.eup %7019 }
 0x6ae   :  { %v1279_v52 = vadd.f32 1.0, %v7020_v51  ;;  %v7022_v53 = vpop.eup %7021 }
 0x6af   :  { %v1179_v20 = vadd.f32 1.0, %v7022_v53 }
 0x6b0   :  { %7023 = vrcp.f32 %v1279_v52 }
 0x6b1   :  { %7025 = vrcp.f32 %v1179_v20 }
 0x6ba   :  { %v7024_v54 = vpop.eup %7023 }
 0x6bb   :  { %v7026_v57 = vpop.eup %7025  ;;  %v1283_v59 = vmul.f32 %v7024_v54, %v1093_v3 }
 0x6bc   :  { %v1183_v62 = vmul.f32 %v7026_v57, %v993_v10 }
 0x71b   :  { %v1286_v55 = vpop.permute.xlu0 %1285 }
 0x71c   :  { %v1288_v56 = vmul.f32 %v7024_v54, %v1286_v55 }
 0x71e   :  { %1290 = vrot.lane.b32.xlu0 %v1288_v56, %s7353_s22 }
 0x71f   :  { %v1186_v26 = vpop.permute.xlu1 %1185 }
 0x720   :  { %v1188_v58 = vmul.f32 %v7026_v57, %v1186_v26 }
 0x722   :  { %1190 = vrot.lane.b32.xlu1 %v1188_v58, %s7353_s22 }
 0x790   :  { %v1291_v60 = vpop.permute.xlu0 %1290 }
 0x791   :  { %v1293_v61 = vadd.f32 %v1291_v60, %v1283_v59 }
 0x793   :  { %7027 = vtanh.f32 %v1293_v61 }
 0x794   :  { %v1191_v63 = vpop.permute.xlu1 %1190 }
 0x795   :  { %v1193_v0 = vadd.f32 %v1191_v63, %v1183_v62 }
 0x797   :  { %7029 = vtanh.f32 %v1193_v0 }
 0x79d   :  { %v7028_v2 = vpop.eup %7027 }
 0x79e   :  { %1296 = vrot.lane.b32.xlu0 %v7028_v2, %s7352_s3 }
 0x7a1   :  { %v7030_v6 = vpop.eup %7029 }
 0x7a2   :  { %1196 = vrot.lane.b32.xlu1 %v7030_v6, %s7352_s3 }
 0x810   :  { %v1297_v8 = vpop.permute.xlu0 %1296 }
 0x811   :  { %v1299_v11 = vmul.f32 %v7024_v54, %v1297_v8 }
 0x813   :  { %1401 = vrot.lane.b32.xlu0 %v1299_v11, %s7353_s22  ;;  %v391_v11 = vadd.f32 %v7558_v32, %v7580_v46 }
 0x814   :  { %v1197_v12 = vpop.permute.xlu1 %1196 }
 0x815   :  { %v1199_v13 = vmul.f32 %v7026_v57, %v1197_v12 }
 0x817   :  { %1301 = vrot.lane.b32.xlu1 %v1199_v13, %s7353_s22 }
 0x885   :  { %v7696_v3 = vpop.permute.xlu0 %1401 }
 0x886   :  { %6282 = vmatmul.mubr.msk.f32.vlgmr.msra.gmra.mrb[16].mxu1 %vm701_vm2, %v7696_v3 }
 0x887   :  { %6658 = vmatpush3.bf16.msra.mxu1 %v7525_v22  ;;  %6303 = vmatprep.mubr.msk.f32.mxu1 %vm7351_vm1, %v7349_v1 }
 0x888   :  { %6659 = vmatprep.subr.bf16.mxu1 %v7350_v16 }
 0x889   :  { %v7704_v10 = vpop.permute.xlu1 %1301 }
 0x88a   :  { %6271 = vmatmul.mubr.msk.f32.vlgmr.msra.gmra.mrb[12].mxu0 %vm701_vm2, %v7704_v10 }
 0x88b   :  { %6652 = vmatpush3.bf16.msra.mxu0 %v7502_v15  ;;  %6661 = vmatpush3.bf16.msra.mxu1 %v7536_v25 }
 0x88c   :  { %6653 = vmatprep.subr.bf16.mxu0 %v7350_v16  ;;  %6292 = vmatprep.mubr.msk.f32.mxu0 %vm7351_vm1, %v7349_v1 }
 0x88d   :  { %6668 = vmatprep.subr.bf16.mxu1 %v7350_v16 }
 0x88f   :  { %6655 = vmatpush3.bf16.msra.mxu0 %v7513_v19 }
 0x890   :  { %6662 = vmatprep.subr.bf16.mxu0 %v7350_v16 }
 0x959   :  { %v1471_v5 = vpop.f32.mrb[16].mxu1 }
 0x95a   :  { %v1475_v4 = vadd.f32 %v1471_v5, %v467_v14  ;;  %v6283_v17 = vpop.f32.mrb[17].mxu1  ;;  %v465_v5 = vadd.f32 %v7625_v23, %v7574_v40 }
 0x95c   :  { %7031 = vtanh.f32 %v1475_v4  ;;  %v5952_v47 = vmul.f32 -1.442695, %v1475_v4 }
 0x95d   :  { %v1371_v30 = vpop.f32.mrb[12].mxu0 }
 0x95e   :  { %v1375_v41 = vadd.f32 %v1371_v30, %v389_v18  ;;  %v6272_v42 = vpop.f32.mrb[13].mxu0 }
 0x960   :  { %7033 = vtanh.f32 %v1375_v41  ;;  %v5950_v24 = vmul.f32 -1.442695, %v1375_v41 }
 0x961   :  { %7035 = vpow2.f32 %v5952_v47 }
 0x962   :  { %7037 = vpow2.f32 %v5950_v24 }
 0x966   :  { %v7032_v44 = vpop.eup %7031 }
 0x967   :  { %1485 = vrot.lane.b32.xlu0 %v7032_v44, %s7352_s3 }
 0x96a   :  { %v7034_v45 = vpop.eup %7033 }
 0x96b   :  { %1385 = vrot.lane.b32.xlu1 %v7034_v45, %s7352_s3  ;;  %v7036_v48 = vpop.eup %7035 }
 0x96c   :  { %v1479_v49 = vadd.f32 1.0, %v7036_v48  ;;  %v7038_v50 = vpop.eup %7037 }
 0x96d   :  { %v1379_v31 = vadd.f32 1.0, %v7038_v50 }
 0x96e   :  { %7039 = vrcp.f32 %v1479_v49 }
 0x96f   :  { %7041 = vrcp.f32 %v1379_v31 }
 0x978   :  { %v7040_v35 = vpop.eup %7039 }
 0x979   :  { %v7042_v53 = vpop.eup %7041  ;;  %v1483_v55 = vmul.f32 %v7040_v35, %v1293_v61 }
 0x97a   :  { %v1383_v26 = vmul.f32 %v7042_v53, %v1193_v0 }
 0x9d9   :  { %v1486_v51 = vpop.permute.xlu0 %1485 }
 0x9da   :  { %v1488_v52 = vmul.f32 %v7040_v35, %v1486_v51 }
 0x9dc   :  { %1490 = vrot.lane.b32.xlu0 %v1488_v52, %s7353_s22 }
 0x9dd   :  { %v1386_v20 = vpop.permute.xlu1 %1385 }
 0x9de   :  { %v1388_v54 = vmul.f32 %v7042_v53, %v1386_v20 }
 0x9e0   :  { %1390 = vrot.lane.b32.xlu1 %v1388_v54, %s7353_s22 }
 0xa4e   :  { %v1491_v56 = vpop.permute.xlu0 %1490 }
 0xa4f   :  { %v1493_v57 = vadd.f32 %v1491_v56, %v1483_v55 }
 0xa51   :  { %7043 = vtanh.f32 %v1493_v57 }
 0xa52   :  { %v1391_v58 = vpop.permute.xlu1 %1390 }
 0xa53   :  { %v1393_v59 = vadd.f32 %v1391_v58, %v1383_v26 }
 0xa55   :  { %7045 = vtanh.f32 %v1393_v59 }
 0xa5b   :  { %v7044_v60 = vpop.eup %7043 }
 0xa5c   :  { %1496 = vrot.lane.b32.xlu0 %v7044_v60, %s7352_s3 }
 0xa5f   :  { %v7046_v62 = vpop.eup %7045 }
 0xa60   :  { %1396 = vrot.lane.b32.xlu1 %v7046_v62, %s7352_s3 }
 0xace   :  { %v1497_v63 = vpop.permute.xlu0 %1496 }
 0xacf   :  { %v1499_v2 = vmul.f32 %v7040_v35, %v1497_v63 }
 0xad1   :  { %1601 = vrot.lane.b32.xlu0 %v1499_v2, %s7353_s22  ;;  %v315_v2 = vadd.f32 %v7623_v21, %v7580_v46 }
 0xad2   :  { %v1397_v6 = vpop.permute.xlu1 %1396 }
 0xad3   :  { %v1399_v8 = vmul.f32 %v7042_v53, %v1397_v6 }
 0xad5   :  { %1501 = vrot.lane.b32.xlu1 %v1399_v8, %s7353_s22 }
 0xb43   :  { %v7728_v61 = vpop.permute.xlu0 %1601 }
 0xb44   :  { %6304 = vmatmul.mubr.msk.f32.vlgmr.msra.gmra.mrb[18].mxu1 %vm701_vm2, %v7728_v61 }
 0xb45   :  { %6670 = vmatpush3.bf16.msra.mxu1 %v7525_v22  ;;  %6325 = vmatprep.mubr.msk.f32.mxu1 %vm7351_vm1, %v7349_v1 }
 0xb46   :  { %6671 = vmatprep.subr.bf16.mxu1 %v7350_v16 }
 0xb47   :  { %v7736_v0 = vpop.permute.xlu1 %1501 }
 0xb48   :  { %6293 = vmatmul.mubr.msk.f32.vlgmr.msra.gmra.mrb[14].mxu0 %vm701_vm2, %v7736_v0 }
 0xb49   :  { %6664 = vmatpush3.bf16.msra.mxu0 %v7502_v15  ;;  %6673 = vmatpush3.bf16.msra.mxu1 %v7536_v25 }
 0xb4a   :  { %6665 = vmatprep.subr.bf16.mxu0 %v7350_v16  ;;  %6314 = vmatprep.mubr.msk.f32.mxu0 %vm7351_vm1, %v7349_v1 }
 0xb4b   :  { %6680 = vmatprep.subr.bf16.mxu1 %v7350_v16 }
 0xb4d   :  { %6667 = vmatpush3.bf16.msra.mxu0 %v7513_v19 }
 0xb4e   :  { %6674 = vmatprep.subr.bf16.mxu0 %v7350_v16 }
 0xc17   :  { %v1671_v12 = vpop.f32.mrb[18].mxu1 }
 0xc18   :  { %v1675_v13 = vadd.f32 %v1671_v12, %v391_v11  ;;  %v6305_v14 = vpop.f32.mrb[19].mxu1  ;;  %v541_v12 = vadd.f32 %v7562_v34, %v7574_v40 }
 0xc1a   :  { %7047 = vtanh.f32 %v1675_v13  ;;  %v5956_v42 = vmul.f32 -1.442695, %v1675_v13 }
 0xc1b   :  { %v1571_v4 = vpop.f32.mrb[14].mxu0 }
 0xc1c   :  { %v1575_v17 = vadd.f32 %v1571_v4, %v465_v5  ;;  %v6294_v18 = vpop.f32.mrb[15].mxu0 }
 0xc1e   :  { %7049 = vtanh.f32 %v1575_v17  ;;  %v5954_v32 = vmul.f32 -1.442695, %v1575_v17 }
 0xc1f   :  { %7051 = vpow2.f32 %v5956_v42 }
 0xc20   :  { %7053 = vpow2.f32 %v5954_v32 }
 0xc24   :  { %v7048_v30 = vpop.eup %7047 }
 0xc25   :  { %1685 = vrot.lane.b32.xlu0 %v7048_v30, %s7352_s3 }
 0xc28   :  { %v7050_v41 = vpop.eup %7049 }
 0xc29   :  { %1585 = vrot.lane.b32.xlu1 %v7050_v41, %s7352_s3  ;;  %v7052_v44 = vpop.eup %7051 }
 0xc2a   :  { %v1679_v45 = vadd.f32 1.0, %v7052_v44  ;;  %v7054_v47 = vpop.eup %7053 }
 0xc2b   :  { %v1579_v23 = vadd.f32 1.0, %v7054_v47 }
 0xc2c   :  { %7055 = vrcp.f32 %v1679_v45 }
 0xc2d   :  { %7057 = vrcp.f32 %v1579_v23 }
 0xc36   :  { %v7056_v24 = vpop.eup %7055 }
 0xc37   :  { %v7058_v50 = vpop.eup %7057  ;;  %v1683_v51 = vmul.f32 %v7056_v24, %v1493_v57 }
 0xc38   :  { %v1583_v20 = vmul.f32 %v7058_v50, %v1393_v59 }
 0xc97   :  { %v1686_v48 = vpop.permute.xlu0 %1685 }
 0xc98   :  { %v1688_v49 = vmul.f32 %v7056_v24, %v1686_v48 }
 0xc9a   :  { %1690 = vrot.lane.b32.xlu0 %v1688_v49, %s7353_s22 }
 0xc9b   :  { %v1586_v31 = vpop.permute.xlu1 %1585 }
 0xc9c   :  { %v1588_v35 = vmul.f32 %v7058_v50, %v1586_v31 }
 0xc9e   :  { %1590 = vrot.lane.b32.xlu1 %v1588_v35, %s7353_s22 }
 0xd0c   :  { %v1691_v52 = vpop.permute.xlu0 %1690 }
 0xd0d   :  { %v1693_v53 = vadd.f32 %v1691_v52, %v1683_v51 }
 0xd0f   :  { %7059 = vtanh.f32 %v1693_v53 }
 0xd10   :  { %v1591_v54 = vpop.permute.xlu1 %1590 }
 0xd11   :  { %v1593_v55 = vadd.f32 %v1591_v54, %v1583_v20 }
 0xd13   :  { %7061 = vtanh.f32 %v1593_v55 }
 0xd19   :  { %v7060_v56 = vpop.eup %7059 }
 0xd1a   :  { %1696 = vrot.lane.b32.xlu0 %v7060_v56, %s7352_s3 }
 0xd1d   :  { %v7062_v26 = vpop.eup %7061 }
 0xd1e   :  { %1596 = vrot.lane.b32.xlu1 %v7062_v26, %s7352_s3 }
 0xd8c   :  { %v1697_v58 = vpop.permute.xlu0 %1696 }
 0xd8d   :  { %v1699_v60 = vmul.f32 %v7056_v24, %v1697_v58 }
 0xd8f   :  { %1801 = vrot.lane.b32.xlu0 %v1699_v60, %s7353_s22 }
 0xd90   :  { %v1597_v62 = vpop.permute.xlu1 %1596 }
 0xd91   :  { %v1599_v63 = vmul.f32 %v7058_v50, %v1597_v62 }
 0xd93   :  { %1701 = vrot.lane.b32.xlu1 %v1599_v63, %s7353_s22 }
 0xe01   :  { %v7760_v57 = vpop.permute.xlu0 %1801 }
 0xe02   :  { %6326 = vmatmul.mubr.msk.f32.vlgmr.msra.gmra.mrb[20].mxu1 %vm701_vm2, %v7760_v57 }
 0xe03   :  { %6682 = vmatpush3.bf16.msra.mxu1 %v7525_v22  ;;  %6347 = vmatprep.mubr.msk.f32.mxu1 %vm7351_vm1, %v7349_v1 }
 0xe04   :  { %6683 = vmatprep.subr.bf16.mxu1 %v7350_v16 }
 0xe05   :  { %v7768_v59 = vpop.permute.xlu1 %1701 }
 0xe06   :  { %6315 = vmatmul.mubr.msk.f32.vlgmr.msra.gmra.mrb[16].mxu0 %vm701_vm2, %v7768_v59 }
 0xe07   :  { %6676 = vmatpush3.bf16.msra.mxu0 %v7502_v15  ;;  %6685 = vmatpush3.bf16.msra.mxu1 %v7536_v25 }
 0xe08   :  { %6677 = vmatprep.subr.bf16.mxu0 %v7350_v16  ;;  %6336 = vmatprep.mubr.msk.f32.mxu0 %vm7351_vm1, %v7349_v1 }
 0xe09   :  { %6692 = vmatprep.subr.bf16.mxu1 %v7350_v16 }
 0xe0b   :  { %6679 = vmatpush3.bf16.msra.mxu0 %v7513_v19 }
 0xe0c   :  { %6686 = vmatprep.subr.bf16.mxu0 %v7350_v16 }
 0xed5   :  { %v1871_v6 = vpop.f32.mrb[20].mxu1 }
 0xed6   :  { %v1875_v8 = vadd.f32 %v1871_v6, %v315_v2  ;;  %v6327_v11 = vpop.f32.mrb[21].mxu1  ;;  %v617_v2 = vadd.f32 %v7629_v27, %v7574_v40 }
 0xed8   :  { %7063 = vtanh.f32 %v1875_v8  ;;  %v5960_v18 = vmul.f32 -1.442695, %v1875_v8 }
 0xed9   :  { %v1771_v13 = vpop.f32.mrb[16].mxu0 }
 0xeda   :  { %v1775_v14 = vadd.f32 %v1771_v13, %v541_v12  ;;  %v6316_v5 = vpop.f32.mrb[17].mxu0 }
 0xedc   :  { %7065 = vtanh.f32 %v1775_v14  ;;  %v5958_v21 = vmul.f32 -1.442695, %v1775_v14 }
 0xedd   :  { %7067 = vpow2.f32 %v5960_v18 }
 0xede   :  { %7069 = vpow2.f32 %v5958_v21 }
 0xee2   :  { %v7064_v4 = vpop.eup %7063 }
 0xee3   :  { %1885 = vrot.lane.b32.xlu0 %v7064_v4, %s7352_s3 }
 0xee6   :  { %v7066_v17 = vpop.eup %7065 }
 0xee7   :  { %1785 = vrot.lane.b32.xlu1 %v7066_v17, %s7352_s3  ;;  %v7068_v30 = vpop.eup %7067 }
 0xee8   :  { %v1879_v41 = vadd.f32 1.0, %v7068_v30  ;;  %v7070_v42 = vpop.eup %7069 }
 0xee9   :  { %v1779_v34 = vadd.f32 1.0, %v7070_v42 }
 0xeea   :  { %7071 = vrcp.f32 %v1879_v41 }
 0xeeb   :  { %7073 = vrcp.f32 %v1779_v34 }
 0xef4   :  { %v7072_v32 = vpop.eup %7071 }
 0xef5   :  { %v7074_v47 = vpop.eup %7073  ;;  %v1883_v48 = vmul.f32 %v7072_v32, %v1693_v53 }
 0xef6   :  { %v1783_v31 = vmul.f32 %v7074_v47, %v1593_v55 }
 0xf55   :  { %v1886_v44 = vpop.permute.xlu0 %1885 }
 0xf56   :  { %v1888_v45 = vmul.f32 %v7072_v32, %v1886_v44 }
 0xf58   :  { %1890 = vrot.lane.b32.xlu0 %v1888_v45, %s7353_s22 }
 0xf59   :  { %v1786_v23 = vpop.permute.xlu1 %1785 }
 0xf5a   :  { %v1788_v24 = vmul.f32 %v7074_v47, %v1786_v23  ;;  %v2304_v23 = vld [vmem:[%s8791_s4 + $0x18] sm:$0xff] }
 0xf5c   :  { %1790 = vrot.lane.b32.xlu1 %v1788_v24, %s7353_s22 }
 0xfca   :  { %v1891_v49 = vpop.permute.xlu0 %1890 }
 0xfcb   :  { %v1893_v50 = vadd.f32 %v1891_v49, %v1883_v48 }
 0xfcd   :  { %7075 = vtanh.f32 %v1893_v50 }
 0xfce   :  { %v1791_v35 = vpop.permute.xlu1 %1790 }
 0xfcf   :  { %v1793_v51 = vadd.f32 %v1791_v35, %v1783_v31 }
 0xfd1   :  { %7077 = vtanh.f32 %v1793_v51 }
 0xfd7   :  { %v7076_v52 = vpop.eup %7075 }
 0xfd8   :  { %1896 = vrot.lane.b32.xlu0 %v7076_v52, %s7352_s3  ;;  %v2301_v52 = vld [vmem:[%s8791_s4] sm:$0xff] }
 0xfdb   :  { %v7078_v20 = vpop.eup %7077 }
 0xfdc   :  { %1796 = vrot.lane.b32.xlu1 %v7078_v20, %s7352_s3  ;;  %v2303_v20 = vld [vmem:[%s8791_s4 + $0x10] sm:$0xff] }
0x104a   :  { %v1897_v54 = vpop.permute.xlu0 %1896 }
0x104b   :  { %v1899_v56 = vmul.f32 %v7072_v32, %v1897_v54  ;;  %v2306_v54 = vld [vmem:[%s8791_s4 + $0x28] sm:$0xff] }
0x104d   :  { %2001 = vrot.lane.b32.xlu0 %v1899_v56, %s7353_s22  ;;  %v2308_v56 = vld [vmem:[%s8791_s4 + $0x38] sm:$0xff] }
0x104e   :  { %v1797_v26 = vpop.permute.xlu1 %1796 }
0x104f   :  { %v1799_v58 = vmul.f32 %v7074_v47, %v1797_v26  ;;  %v2302_v47 = vld [vmem:[%s8791_s4 + $0x8] sm:$0xff]  ;;  %v7850_v26 = vpack.c.bf16 %v2303_v20, %v2301_v52 }
0x1050   :  { %v7830_v24 = vpack.c.bf16 %v2304_v23, %v2302_v47 }
0x1051   :  { %1901 = vrot.lane.b32.xlu1 %v1799_v58, %s7353_s22  ;;  %v7852_v58 = vpack.c.bf16 %v2308_v56, %v2306_v54 }
0x10bf   :  { %v7792_v53 = vpop.permute.xlu0 %2001 }
0x10c0   :  { %6348 = vmatmul.mubr.msk.f32.vlgmr.msra.gmra.mrb[22].mxu1 %vm701_vm2, %v7792_v53 }
0x10c1   :  { %6694 = vmatpush3.bf16.msra.mxu1 %v7525_v22  ;;  %6369 = vmatprep.mubr.msk.f32.mxu1 %vm7351_vm1, %v7349_v1  ;;  %v239_v22 = vadd.f32 %v7552_v28, %v7580_v46 }
0x10c2   :  { %6695 = vmatprep.subr.bf16.mxu1 %v7350_v16 }
0x10c3   :  { %v7800_v55 = vpop.permute.xlu1 %1901 }
0x10c4   :  { %6337 = vmatmul.mubr.msk.f32.vlgmr.msra.gmra.mrb[18].mxu0 %vm701_vm2, %v7800_v55 }
0x10c5   :  { %6688 = vmatpush3.bf16.msra.mxu0 %v7502_v15  ;;  %6697 = vmatpush3.bf16.msra.mxu1 %v7536_v25 }
0x10c6   :  { %6689 = vmatprep.subr.bf16.mxu0 %v7350_v16  ;;  %6358 = vmatprep.mubr.msk.f32.mxu0 %vm7351_vm1, %v7349_v1 }
0x10c7   :  { %6715 = vmatprep.subr.bf16.mxu1 %v7830_v24 }
0x10c9   :  { %6691 = vmatpush3.bf16.msra.mxu0 %v7513_v19 }
0x10ca   :  { %6699 = vmatprep.subr.bf16.mxu0 %v7830_v24 }
0x1193   :  { %v2071_v60 = vpop.f32.mrb[22].mxu1 }
0x1194   :  { %v2075_v62 = vadd.f32 %v2071_v60, %v239_v22  ;;  %v6349_v63 = vpop.f32.mrb[23].mxu1  ;;  %v2305_v22 = vld [vmem:[%s8791_s4 + $0x20] sm:$0xff]  ;;  %v2307_v60 = vld [vmem:[%s8791_s4 + $0x30] sm:$0xff] }
0x1195   :  { %v2310_v63 = vld [vmem:[%s8791_s4 + $0x48] sm:$0xff] }
0x1196   :  { %7079 = vtanh.f32 %v2075_v62  ;;  %v5964_v19 = vmul.f32 -1.442695, %v2075_v62 }
0x1197   :  { %v1971_v15 = vpop.f32.mrb[18].mxu0 }
0x1198   :  { %v1975_v6 = vadd.f32 %v1971_v15, %v617_v2  ;;  %v6338_v25 = vpop.f32.mrb[19].mxu0  ;;  %v2312_v2 = vld [vmem:[%s8791_s4 + $0x58] sm:$0xff]  ;;  %v7868_v15 = vpack.c.bf16 %v2307_v60, %v2305_v22 }
0x1199   :  { %v2309_v25 = vld [vmem:[%s8791_s4 + $0x40] sm:$0xff] }
0x119a   :  { %7081 = vtanh.f32 %v1975_v6  ;;  %v5962_v28 = vmul.f32 -1.442695, %v1975_v6  ;;  %v7872_v6 = vpack.c.bf16 %v2312_v2, %v2310_v63 }
0x119b   :  { %7083 = vpow2.f32 %v5964_v19  ;;  %v2314_v19 = vld [vmem:[%s8791_s4 + $0x68] sm:$0xff] }
0x119c   :  { %7085 = vpow2.f32 %v5962_v28  ;;  %v2316_v28 = vld [vmem:[%s8791_s4 + $0x78] sm:$0xff] }
0x11a0   :  { %v7080_v8 = vpop.eup %7079 }
0x11a1   :  { %2085 = vrot.lane.b32.xlu0 %v7080_v8, %s7352_s3  ;;  %v2311_v8 = vld [vmem:[%s8791_s4 + $0x50] sm:$0xff] }
0x11a4   :  { %v7082_v11 = vpop.eup %7081 }
0x11a5   :  { %1985 = vrot.lane.b32.xlu1 %v7082_v11, %s7352_s3  ;;  %v7084_v12 = vpop.eup %7083 }
0x11a6   :  { %v2079_v13 = vadd.f32 1.0, %v7084_v12  ;;  %v7086_v14 = vpop.eup %7085  ;;  %v7892_v12 = vpack.c.bf16 %v2311_v8, %v2309_v25 }
0x11a7   :  { %v1979_v27 = vadd.f32 1.0, %v7086_v14  ;;  %v2313_v14 = vld [vmem:[%s8791_s4 + $0x60] sm:$0xff] }
0x11a8   :  { %7087 = vrcp.f32 %v2079_v13  ;;  %v7896_v13 = vpack.c.bf16 %v2316_v28, %v2314_v19 }
0x11a9   :  { %7089 = vrcp.f32 %v1979_v27  ;;  %v2315_v27 = vld [vmem:[%s8791_s4 + $0x70] sm:$0xff] }
0x11b2   :  { %v7088_v5 = vpop.eup %7087 }
0x11b3   :  { %v7090_v18 = vpop.eup %7089  ;;  %v2083_v41 = vmul.f32 %v7088_v5, %v1893_v50 }
0x11b4   :  { %v1983_v32 = vmul.f32 %v7090_v18, %v1793_v51 }
0x1213   :  { %v2086_v4 = vpop.permute.xlu0 %2085 }
0x1214   :  { %v2088_v17 = vmul.f32 %v7088_v5, %v2086_v4 }
0x1216   :  { %2090 = vrot.lane.b32.xlu0 %v2088_v17, %s7353_s22 }
0x1217   :  { %v1986_v21 = vpop.permute.xlu1 %1985 }
0x1218   :  { %v1988_v30 = vmul.f32 %v7090_v18, %v1986_v21 }
0x121a   :  { %1990 = vrot.lane.b32.xlu1 %v1988_v30, %s7353_s22 }
0x1288   :  { %v2091_v42 = vpop.permute.xlu0 %2090 }
0x1289   :  { %v7818_v34 = vadd.f32 %v2091_v42, %v2083_v41 }
0x128b   :  { %7091 = vtanh.f32 %v7818_v34 }
0x128c   :  { %v1991_v44 = vpop.permute.xlu1 %1990 }
0x128d   :  { %v7821_v45 = vadd.f32 %v1991_v44, %v1983_v32 }
0x128f   :  { %7093 = vtanh.f32 %v7821_v45 }
0x1295   :  { %v7092_v48 = vpop.eup %7091 }
0x1296   :  { %2096 = vrot.lane.b32.xlu0 %v7092_v48, %s7352_s3 }
0x1299   :  { %v7094_v49 = vpop.eup %7093 }
0x129a   :  { %1996 = vrot.lane.b32.xlu1 %v7094_v49, %s7352_s3 }
0x1308   :  { %v2097_v50 = vpop.permute.xlu0 %2096 }
0x1309   :  { %v2099_v31 = vmul.f32 %v7088_v5, %v2097_v50  ;;  %v7909_v5 = vpack.c.bf16 %v2315_v27, %v2313_v14  ;;  %v5986_v14 = vld [vmem:[%s8792_s5 + $0x20] sm:$0xff]  ;;  %v5987_v27 = vld [vmem:[%s8792_s5 + $0x28] sm:$0xff] }
0x130b   :  { %2201 = vrot.lane.b32.xlu0 %v2099_v31, %s7353_s22 }
0x130c   :  { %v1997_v35 = vpop.permute.xlu1 %1996 }
0x130d   :  { %v1999_v51 = vmul.f32 %v7090_v18, %v1997_v35 }
0x130f   :  { %2101 = vrot.lane.b32.xlu1 %v1999_v51, %s7353_s22 }
0x137d   :  { %v2202_v62 = vpop.permute.xlu0 %2201 }
0x137e   :  { %6370 = vmatmul.mubr.msk.f32.vlgmr.msra.gmra.mrb[24].mxu1 %vm701_vm2, %v2202_v62 }
0x137f   :  { %6717 = vmatpush1.bf16.msra.mxu1 %v7850_v26  ;;  %2543 = vmatprep.mubr.f32.mxu1 %v7349_v1 }
0x1380   :  { %6719 = vmatprep.subr.bf16.mxu1 %v7852_v58 }
0x1381   :  { %v7880_v11 = vpop.permute.xlu1 %2101 }
0x1382   :  { %6359 = vmatmul.mubr.msk.f32.vlgmr.msra.gmra.mrb[20].mxu0 %vm701_vm2, %v7880_v11 }
0x1383   :  { %6701 = vmatpush1.bf16.msra.mxu0 %v7850_v26  ;;  %6721 = vmatpush1.bf16.msra.mxu1 %v7868_v15 }
0x1384   :  { %6703 = vmatprep.subr.bf16.mxu0 %v7852_v58  ;;  %6723 = vmatprep.subr.bf16.mxu1 %v7872_v6 }
0x1385   :  { %2381 = vmatprep.mubr.f32.mxu0 %v7349_v1 }
0x1386   :  { %5971 = vmatmul.mubr.msk.f32.vlgmr.msra.gmra.mrb[26].mxu1 %vm701_vm2, %v7672_v9 }
0x1387   :  { %6705 = vmatpush1.bf16.msra.mxu0 %v7868_v15  ;;  %6725 = vmatpush1.bf16.msra.mxu1 %v7892_v12 }
0x1388   :  { %6727 = vmatprep.subr.bf16.mxu1 %v7896_v13  ;;  %2616 = vmatprep.mubr.f32.mxu1 %v7349_v1 }
0x1389   :  { %6707 = vmatprep.subr.bf16.mxu0 %v7872_v6 }
0x138a   :  { %5969 = vmatmul.mubr.msk.f32.vlgmr.msra.gmra.mrb[22].mxu0 %vm701_vm2, %v7639_v39  ;;  %v163_v39 = vadd.f32 %v7554_v29, %v7580_v46 }
0x138b   :  { %6729 = vmatpush1.bf16.msra.mxu1 %v7909_v5  ;;  %6709 = vmatpush1.bf16.msra.mxu0 %v7892_v12 }
0x138c   :  { %6747 = vmatprep.subr.bf16.mxu1 %v7830_v24  ;;  %6711 = vmatprep.subr.bf16.mxu0 %v7896_v13 }
0x138d   :  { %2470 = vmatprep.mubr.f32.mxu0 %v7349_v1 }
0x138e   :  { %5972 = vmatmul.mubr.msk.f32.vlgmr.msra.gmra.mrb[26].mxu1 %vm701_vm2, %v2202_v62 }
0x138f   :  { %6749 = vmatpush1.bf16.msra.mxu1 %v7850_v26  ;;  %2835 = vmatprep.mubr.f32.mxu1 %v7349_v1 }
0x1390   :  { %6751 = vmatprep.subr.bf16.mxu1 %v7852_v58  ;;  %6713 = vmatpush1.bf16.msra.mxu0 %v7909_v5 }
0x1391   :  { %6731 = vmatprep.subr.bf16.mxu0 %v7830_v24 }
0x1393   :  { %6753 = vmatpush1.bf16.msra.mxu1 %v7868_v15 }
0x1394   :  { %6755 = vmatprep.subr.bf16.mxu1 %v7872_v6 }
0x1396   :  { %5975 = vmatmul.mubr.msk.f32.vlgmr.msra.gmra.mrb[28].mxu1 %vm701_vm2, %v7736_v0 }
0x1397   :  { %6757 = vmatpush1.bf16.msra.mxu1 %v7892_v12  ;;  %2908 = vmatprep.mubr.f32.mxu1 %v7349_v1 }
0x1398   :  { %6759 = vmatprep.subr.bf16.mxu1 %v7896_v13 }
0x139b   :  { %6761 = vmatpush1.bf16.msra.mxu1 %v7909_v5 }
0x139c   :  { %6779 = vmatprep.subr.bf16.mxu1 %v7830_v24 }
0x139e   :  { %5976 = vmatmul.mubr.msk.f32.vlgmr.msra.gmra.mrb[28].mxu1 %vm701_vm2, %v7760_v57 }
0x139f   :  { %6781 = vmatpush1.bf16.msra.mxu1 %v7850_v26  ;;  %3127 = vmatprep.mubr.f32.mxu1 %v7349_v1 }
0x13a0   :  { %6783 = vmatprep.subr.bf16.mxu1 %v7852_v58 }
0x13a3   :  { %6785 = vmatpush1.bf16.msra.mxu1 %v7868_v15 }
0x13a4   :  { %6787 = vmatprep.subr.bf16.mxu1 %v7872_v6 }
0x13a6   :  { %5979 = vmatmul.mubr.msk.f32.vlgmr.msra.gmra.mrb[30].mxu1 %vm701_vm2, %v7800_v55  ;;  %v693_v55 = vadd.f32 %v7570_v38, %v7574_v40 }
0x13a7   :  { %6789 = vmatpush1.bf16.msra.mxu1 %v7892_v12  ;;  %3200 = vmatprep.mubr.f32.mxu1 %v7349_v1 }
0x13a8   :  { %6791 = vmatprep.subr.bf16.mxu1 %v7896_v13 }
0x13ab   :  { %6793 = vmatpush1.bf16.msra.mxu1 %v7909_v5 }
0x13ac   :  { %6811 = vmatprep.subr.bf16.mxu1 %v7830_v24 }
0x13ae   :  { %5980 = vmatmul.mubr.msk.f32.vlgmr.msra.gmra.mrb[30].mxu1 %vm701_vm2, %v7696_v3 }
0x13af   :  { %6813 = vmatpush1.bf16.msra.mxu1 %v7850_v26  ;;  %3424 = vmatprep.mubr.f32.mxu1 %v7349_v1 }
0x13b0   :  { %6815 = vmatprep.subr.bf16.mxu1 %v7852_v58 }
0x13b3   :  { %6817 = vmatpush1.bf16.msra.mxu1 %v7868_v15 }
0x13b4   :  { %6819 = vmatprep.subr.bf16.mxu1 %v7872_v6 }
0x1451   :  { %v2271_v9 = vpop.f32.mrb[24].mxu1 }
0x1452   :  { %v2275_v0 = vadd.f32 %v2271_v9, %v163_v39  ;;  %v6371_v57 = vpop.f32.mrb[25].mxu1  ;;  %v8003_v39 = vpack.c.bf16 %v5987_v27, %v5986_v14  ;;  %v5988_v9 = vld [vmem:[%s8792_s5 + $0x30] sm:$0xff] }
0x1454   :  { %7095 = vtanh.f32 %v2275_v0  ;;  %v5968_v42 = vmul.f32 -1.442695, %v2275_v0  ;;  %v5989_v0 = vld [vmem:[%s8792_s5 + $0x38] sm:$0xff] }
0x1455   :  { %v2171_v3 = vpop.f32.mrb[20].mxu0 }
0x1456   :  { %v2175_v4 = vadd.f32 %v2171_v3, %v693_v55  ;;  %v6360_v17 = vpop.f32.mrb[21].mxu0 }
0x1458   :  { %7097 = vtanh.f32 %v2175_v4  ;;  %v5966_v32 = vmul.f32 -1.442695, %v2175_v4 }
0x1459   :  { %7099 = vpow2.f32 %v5968_v42 }
0x145a   :  { %7101 = vpow2.f32 %v5966_v32 }
0x145e   :  { %v7096_v18 = vpop.eup %7095 }
0x145f   :  { %2285 = vrot.lane.b32.xlu0 %v7096_v18, %s7352_s3 }
0x1461   :  { %v7962_v21 = vpop.f32.mrb[26].mxu1 }
0x1462   :  { %v7098_v30 = vpop.eup %7097  ;;  %v7964_v41 = vpop.f32.mrb[27].mxu1 }
0x1463   :  { %2185 = vrot.lane.b32.xlu1 %v7098_v30, %s7352_s3  ;;  %v7100_v44 = vpop.eup %7099 }
0x1464   :  { %v2279_v47 = vadd.f32 1.0, %v7100_v44  ;;  %v7102_v23 = vpop.eup %7101 }
0x1465   :  { %v2179_v48 = vadd.f32 1.0, %v7102_v23 }
0x1466   :  { %7103 = vrcp.f32 %v2279_v47 }
0x1467   :  { %7105 = vrcp.f32 %v2179_v48 }
0x1470   :  { %v7104_v49 = vpop.eup %7103 }
0x1471   :  { %v7967_v29 = vpop.f32.mrb[28].mxu1  ;;  %v7106_v35 = vpop.eup %7105  ;;  %v2283_v20 = vmul.f32 %v7104_v49, %v7818_v34 }
0x1472   :  { %v7969_v46 = vpop.f32.mrb[29].mxu1  ;;  %v2183_v22 = vmul.f32 %v7106_v35, %v7821_v45 }
0x1481   :  { %v7971_v38 = vpop.f32.mrb[30].mxu1 }
0x1482   :  { %v7973_v40 = vpop.f32.mrb[31].mxu1 }
0x14d1   :  { %v2286_v50 = vpop.permute.xlu0 %2285 }
0x14d2   :  { %v2288_v31 = vmul.f32 %v7104_v49, %v2286_v50 }
0x14d4   :  { %2290 = vrot.lane.b32.xlu0 %v2288_v31, %s7353_s22 }
0x14d5   :  { %v2186_v51 = vpop.permute.xlu1 %2185 }
0x14d6   :  { %v2188_v52 = vmul.f32 %v7106_v35, %v2186_v51 }
0x14d8   :  { %2190 = vrot.lane.b32.xlu1 %v2188_v52, %s7353_s22 }
0x1546   :  { %v2291_v54 = vpop.permute.xlu0 %2290 }
0x1547   :  { %v2293_v56 = vadd.f32 %v2291_v54, %v2283_v20 }
0x1549   :  { %7107 = vtanh.f32 %v2293_v56 }
0x154a   :  { %v2191_v60 = vpop.permute.xlu1 %2190 }
0x154b   :  { %v2193_v62 = vadd.f32 %v2191_v60, %v2183_v22 }
0x154d   :  { %7109 = vtanh.f32 %v2193_v62 }
0x1553   :  { %v7108_v63 = vpop.eup %7107 }
0x1554   :  { %2296 = vrot.lane.b32.xlu0 %v7108_v63, %s7352_s3 }
0x1557   :  { %v7110_v2 = vpop.eup %7109 }
0x1558   :  { %2196 = vrot.lane.b32.xlu1 %v7110_v2, %s7352_s3 }
0x15c6   :  { %v2297_v25 = vpop.permute.xlu0 %2296 }
0x15c7   :  { %v2299_v8 = vmul.f32 %v7104_v49, %v2297_v25 }
0x15c9   :  { %2402 = vrot.lane.b32.xlu0 %v2299_v8, %s7353_s22 }
0x15ca   :  { %v2197_v19 = vpop.permute.xlu1 %2196 }
0x15cb   :  { %v2199_v34 = vmul.f32 %v7106_v35, %v2197_v19 }
0x15cd   :  { %3356 = vrot.lane.b32.xlu1 %v2199_v34, %s7353_s22 }
0x163b   :  { %v2403_v28 = vpop.permute.xlu0 %2402 }
0x163c   :  { %5970 = vmatmul.mubr.msk.f32.vlgmr.msra.gmra.mrb[22].mxu0 %vm701_vm2, %v2403_v28 }
0x163d   :  { %6733 = vmatpush1.bf16.msra.mxu0 %v7850_v26  ;;  %2689 = vmatprep.mubr.f32.mxu0 %v7349_v1 }
0x163e   :  { %6735 = vmatprep.subr.bf16.mxu0 %v7852_v58 }
0x163f   :  { %v3357_v45 = vpop.permute.xlu1 %3356 }
0x1640   :  { %5983 = vmatmul.mubr.msk.f32.vlgmr.msra.gmra.mrb[32].mxu1 %vm701_vm2, %v3357_v45 }
0x1641   :  { %6737 = vmatpush1.bf16.msra.mxu0 %v7868_v15  ;;  %6821 = vmatpush1.bf16.msra.mxu1 %v7892_v12 }
0x1642   :  { %6739 = vmatprep.subr.bf16.mxu0 %v7872_v6  ;;  %6823 = vmatprep.subr.bf16.mxu1 %v7896_v13 }
0x1643   :  { %3497 = vmatprep.mubr.f32.mxu1 %v7349_v1 }
0x1644   :  { %5973 = vmatmul.mubr.msk.f32.vlgmr.msra.gmra.mrb[24].mxu0 %vm701_vm2, %v7704_v10  ;;  %v8018_v10 = vpack.c.bf16 %v5989_v0, %v5988_v9 }
0x1645   :  { %6741 = vmatpush1.bf16.msra.mxu0 %v7892_v12  ;;  %6825 = vmatpush1.bf16.msra.mxu1 %v7909_v5 }
0x1646   :  { %6743 = vmatprep.subr.bf16.mxu0 %v7896_v13  ;;  %6832 = vmatprep.subr.bf16.mxu1 %v7350_v16 }
0x1647   :  { %2762 = vmatprep.mubr.f32.mxu0 %v7349_v1 }
0x1648   :  { %5984 = vmatmul.mubr.msk.f32.vlgmr.msra.gmra.mrb[32].mxu1 %vm701_vm2, %v7631_v37  ;;  %v3506_v37 = vld [vmem:[%s8792_s5] sm:$0xff] }
0x1649   :  { %6745 = vmatpush1.bf16.msra.mxu0 %v7909_v5  ;;  %6834 = vmatpush3.bf16.msra.mxu1 %v8003_v39 }
0x164a   :  { %6763 = vmatprep.subr.bf16.mxu0 %v7830_v24  ;;  %6835 = vmatprep.subr.bf16.mxu1 %v7350_v16 }
0x164b   :  { %6391 = vmatprep.mubr.msk.f32.mxu1 %vm7351_vm1, %v7349_v1 }
0x164c   :  { %5974 = vmatmul.mubr.msk.f32.vlgmr.msra.gmra.mrb[24].mxu0 %vm701_vm2, %v7792_v53  ;;  %v3508_v53 = vld [vmem:[%s8792_s5 + $0x10] sm:$0xff] }
0x164d   :  { %6765 = vmatpush1.bf16.msra.mxu0 %v7850_v26  ;;  %6837 = vmatpush3.bf16.msra.mxu1 %v8018_v10 }
0x164e   :  { %6767 = vmatprep.subr.bf16.mxu0 %v7852_v58  ;;  %2981 = vmatprep.mubr.f32.mxu0 %v7349_v1 }
0x164f   :  { %6844 = vmatprep.subr.bf16.mxu1 %v7350_v16 }
0x1650   :  { %6392 = vmatmul.mubr.f32.vlgmr.msra.gmra.mrb[34].mxu1 %v7349_v1 }
0x1651   :  { %6769 = vmatpush1.bf16.msra.mxu0 %v7868_v15  ;;  %6846 = vmatpush3.bf16.msra.mxu1 %v8003_v39 }
0x1652   :  { %6771 = vmatprep.subr.bf16.mxu0 %v7872_v6  ;;  %6847 = vmatprep.subr.bf16.mxu1 %v7350_v16 }
0x1653   :  { %6413 = vmatprep.mubr.msk.f32.mxu1 %vm7351_vm1, %v7349_v1 }
0x1654   :  { %5977 = vmatmul.mubr.msk.f32.vlgmr.msra.gmra.mrb[26].mxu0 %vm701_vm2, %v7768_v59 }
0x1655   :  { %6773 = vmatpush1.bf16.msra.mxu0 %v7892_v12  ;;  %3054 = vmatprep.mubr.f32.mxu0 %v7349_v1 }
0x1656   :  { %6775 = vmatprep.subr.bf16.mxu0 %v7896_v13  ;;  %6849 = vmatpush3.bf16.msra.mxu1 %v8018_v10 }
0x1657   :  { %6856 = vmatprep.subr.bf16.mxu1 %v7350_v16 }
0x1659   :  { %6777 = vmatpush1.bf16.msra.mxu0 %v7909_v5 }
0x165a   :  { %6795 = vmatprep.subr.bf16.mxu0 %v7830_v24  ;;  %v3509_v24 = vld [vmem:[%s8792_s5 + $0x18] sm:$0xff] }
0x165c   :  { %5978 = vmatmul.mubr.msk.f32.vlgmr.msra.gmra.mrb[26].mxu0 %vm701_vm2, %v7728_v61  ;;  %v3507_v61 = vld [vmem:[%s8792_s5 + $0x8] sm:$0xff] }
0x165d   :  { %6797 = vmatpush1.bf16.msra.mxu0 %v7850_v26  ;;  %3273 = vmatprep.mubr.f32.mxu0 %v7349_v1  ;;  %v8066_v59 = vpack.c.bf16 %v3507_v61, %v3506_v37  ;;  %v8078_v26 = vpack.c.bf16 %v3509_v24, %v3508_v53 }
0x165e   :  { %6799 = vmatprep.subr.bf16.mxu0 %v7852_v58 }
0x1661   :  { %6801 = vmatpush1.bf16.msra.mxu0 %v7868_v15 }
0x1662   :  { %6803 = vmatprep.subr.bf16.mxu0 %v7872_v6 }
0x1664   :  { %5981 = vmatmul.mubr.msk.f32.vlgmr.msra.gmra.mrb[28].mxu0 %vm701_vm2, %v7880_v11  ;;  %v2300_v11 = vld [vmem:[#allocation6] sm:$0x3] }
0x1665   :  { %6805 = vmatpush1.bf16.msra.mxu0 %v7892_v12  ;;  %3346 = vmatprep.mubr.f32.mxu0 %v7349_v1 }
0x1666   :  { %6807 = vmatprep.subr.bf16.mxu0 %v7896_v13  ;;  %v8100_v13 = vrot.slane %v2300_v11, %v86_v43  ;;  %v8114_v43 = vrot.slane %v2300_v11, %v82_v36 }
0x1668   :  { %v6936_v11 = vadd.f32 %v7962_v21, %v8114_v43 }
0x1669   :  { %6809 = vmatpush1.bf16.msra.mxu0 %v7909_v5 }
0x166a   :  { %6826 = vmatprep.subr.bf16.mxu0 %v7350_v16 }
0x166c   :  { %5982 = vmatmul.mubr.msk.f32.vlgmr.msra.gmra.mrb[28].mxu0 %vm701_vm2, %v7664_v7 }
0x166d   :  { %6828 = vmatpush3.bf16.msra.mxu0 %v8066_v59  ;;  %6380 = vmatprep.mubr.msk.f32.mxu0 %vm7351_vm1, %v7349_v1 }
0x166e   :  { %6829 = vmatprep.subr.bf16.mxu0 %v7350_v16 }
0x1671   :  { %6831 = vmatpush3.bf16.msra.mxu0 %v8078_v26 }
0x1672   :  { %6838 = vmatprep.subr.bf16.mxu0 %v7350_v16 }
0x1674   :  { %6381 = vmatmul.mubr.f32.vlgmr.msra.gmra.mrb[30].mxu0 %v7349_v1 }
0x1675   :  { %6840 = vmatpush3.bf16.msra.mxu0 %v8066_v59  ;;  %6402 = vmatprep.mubr.msk.f32.mxu0 %vm7351_vm1, %v7349_v1 }
0x1676   :  { %6841 = vmatprep.subr.bf16.mxu0 %v7350_v16 }
0x1679   :  { %6843 = vmatpush3.bf16.msra.mxu0 %v8078_v26 }
0x167a   :  { %6850 = vmatprep.subr.bf16.mxu0 %v7350_v16 }
0x170f   :  { %v2472_v7 = vpop.f32.mrb[22].mxu0 }
0x1710   :  { %v8092_v58 = vpop.f32.mrb[23].mxu0  ;;  %v6934_v44 = vadd.f32 %v2472_v7, %v8114_v43 }
0x171b   :  { %v8094_v15 = vpop.f32.mrb[32].mxu1 }
0x171c   :  { %v3501_v6 = vpop.f32.mrb[33].mxu1 }
0x171d   :  { %v6949_v57 = vadd.f32 %v3501_v6, %v8100_v13 }
0x171f   :  { %v8096_v12 = vpop.f32.mrb[24].mxu0 }
0x1720   :  { %v8102_v5 = vpop.f32.mrb[25].mxu0 }
0x1723   :  { %v3676_v55 = vpop.f32.mrb[34].mxu1 }
0x1724   :  { %v3680_v3 = vadd.f32 %v6949_v57, %v3676_v55  ;;  %v6393_v4 = vpop.f32.mrb[35].mxu1 }
0x1726   :  { %7111 = vtanh.f32 %v3680_v3  ;;  %v5990_v50 = vmul.f32 -1.442695, %v3680_v3 }
0x172f   :  { %v8105_v17 = vpop.f32.mrb[26].mxu0 }
0x1730   :  { %v7112_v18 = vpop.eup %7111  ;;  %v8107_v30 = vpop.f32.mrb[27].mxu0 }
0x1731   :  { %3690 = vrot.lane.b32.xlu0 %v7112_v18, %s7352_s3 }
0x173f   :  { %v8110_v42 = vpop.f32.mrb[28].mxu0 }
0x1740   :  { %v3350_v32 = vpop.f32.mrb[29].mxu0 }
0x1741   :  { %v6947_v61 = vadd.f32 %v3350_v32, %v8100_v13 }
0x1747   :  { %v3576_v47 = vpop.f32.mrb[30].mxu0 }
0x1748   :  { %v3580_v23 = vadd.f32 %v6934_v44, %v3576_v47  ;;  %v6382_v48 = vpop.f32.mrb[31].mxu0 }
0x174a   :  { %7113 = vtanh.f32 %v3580_v23  ;;  %v5985_v33 = vmul.f32 -1.442695, %v3580_v23 }
0x174b   :  { %7115 = vpow2.f32 %v5990_v50 }
0x1754   :  { %v7114_v49 = vpop.eup %7113 }
0x1755   :  { %3590 = vrot.lane.b32.xlu1 %v7114_v49, %s7352_s3  ;;  %v7116_v31 = vpop.eup %7115 }
0x1756   :  { %v3684_v35 = vadd.f32 1.0, %v7116_v31 }
0x1758   :  { %7117 = vrcp.f32 %v3684_v35 }
0x1759   :  { %7119 = vpow2.f32 %v5985_v33 }
0x1762   :  { %v7118_v51 = vpop.eup %7117 }
0x1763   :  { %v7120_v36 = vpop.eup %7119  ;;  %v3688_v62 = vmul.f32 0.0, %v7118_v51 }
0x1764   :  { %v3584_v54 = vadd.f32 1.0, %v7120_v36 }
0x1766   :  { %7121 = vrcp.f32 %v3584_v54 }
0x1770   :  { %v7122_v56 = vpop.eup %7121 }
0x1771   :  { %v3588_v8 = vmul.f32 0.0, %v7122_v56 }
0x17a3   :  { %v3691_v52 = vpop.permute.xlu0 %3690 }
0x17a4   :  { %v3693_v20 = vmul.f32 %v7118_v51, %v3691_v52 }
0x17a6   :  { %3695 = vrot.lane.b32.xlu0 %v3693_v20, %s7353_s22 }
0x17c7   :  { %v3591_v22 = vpop.permute.xlu1 %3590 }
0x17c8   :  { %v3593_v60 = vmul.f32 %v7122_v56, %v3591_v22 }
0x17ca   :  { %3595 = vrot.lane.b32.xlu1 %v3593_v60, %s7353_s22 }
0x1818   :  { %v3696_v63 = vpop.permute.xlu0 %3695 }
0x1819   :  { %v3698_v2 = vadd.f32 %v3696_v63, %v3688_v62 }
0x181b   :  { %7123 = vtanh.f32 %v3698_v2 }
0x1825   :  { %v7124_v25 = vpop.eup %7123 }
0x1826   :  { %3701 = vrot.lane.b32.xlu0 %v7124_v25, %s7352_s3 }
0x183c   :  { %v3596_v19 = vpop.permute.xlu1 %3595 }
0x183d   :  { %v3598_v34 = vadd.f32 %v3596_v19, %v3588_v8 }
0x183f   :  { %7125 = vtanh.f32 %v3598_v34 }
0x1849   :  { %v7126_v28 = vpop.eup %7125 }
0x184a   :  { %3601 = vrot.lane.b32.xlu1 %v7126_v28, %s7352_s3 }
0x1898   :  { %v3702_v45 = vpop.permute.xlu0 %3701 }
0x1899   :  { %v8122_v14 = vmul.f32 %v7118_v51, %v3702_v45 }
0x189b   :  { %3806 = vrot.lane.b32.xlu0 %v8122_v14, %s7353_s22 }
0x18bc   :  { %v3602_v27 = vpop.permute.xlu1 %3601 }
0x18bd   :  { %v8126_v9 = vmul.f32 %v7122_v56, %v3602_v27 }
0x18bf   :  { %3706 = vrot.lane.b32.xlu1 %v8126_v9, %s7353_s22 }
0x190d   :  { %v8130_v0 = vpop.permute.xlu0 %3806 }
0x190e   :  { %6414 = vmatmul.mubr.msk.f32.vlgmr.msra.gmra.mrb[36].mxu1 %vm701_vm2, %v8130_v0 }
0x190f   :  { %6858 = vmatpush3.bf16.msra.mxu1 %v8003_v39  ;;  %6435 = vmatprep.mubr.msk.f32.mxu1 %vm7351_vm1, %v7349_v1 }
0x1910   :  { %6859 = vmatprep.subr.bf16.mxu1 %v7350_v16 }
0x1913   :  { %6861 = vmatpush3.bf16.msra.mxu1 %v8018_v10 }
0x1914   :  { %6868 = vmatprep.subr.bf16.mxu1 %v7350_v16 }
0x1931   :  { %v8140_v37 = vpop.permute.xlu1 %3706 }
0x1932   :  { %6403 = vmatmul.mubr.msk.f32.vlgmr.msra.gmra.mrb[32].mxu0 %vm701_vm2, %v8140_v37 }
0x1933   :  { %6852 = vmatpush3.bf16.msra.mxu0 %v8066_v59  ;;  %6424 = vmatprep.mubr.msk.f32.mxu0 %vm7351_vm1, %v7349_v1 }
0x1934   :  { %6853 = vmatprep.subr.bf16.mxu0 %v7350_v16 }
0x1937   :  { %6855 = vmatpush3.bf16.msra.mxu0 %v8078_v26 }
0x1938   :  { %6862 = vmatprep.subr.bf16.mxu0 %v7350_v16 }
0x19e1   :  { %v3876_v53 = vpop.f32.mrb[36].mxu1 }
0x19e2   :  { %v3880_v24 = vadd.f32 %v6947_v61, %v3876_v53  ;;  %v6415_v7 = vpop.f32.mrb[37].mxu1  ;;  %v6938_v53 = vadd.f32 %v8096_v12, %v8114_v43 }
0x19e4   :  { %7127 = vtanh.f32 %v3880_v24  ;;  %v5994_v18 = vmul.f32 -1.442695, %v3880_v24 }
0x19ee   :  { %v7128_v6 = vpop.eup %7127 }
0x19ef   :  { %3890 = vrot.lane.b32.xlu0 %v7128_v6, %s7352_s3 }
0x1a05   :  { %v3776_v57 = vpop.f32.mrb[32].mxu0 }
0x1a06   :  { %v3780_v55 = vadd.f32 %v6936_v11, %v3776_v57  ;;  %v6404_v3 = vpop.f32.mrb[33].mxu0 }
0x1a08   :  { %7129 = vtanh.f32 %v3780_v55  ;;  %v5992_v49 = vmul.f32 -1.442695, %v3780_v55 }
0x1a09   :  { %7131 = vpow2.f32 %v5994_v18 }
0x1a12   :  { %v7130_v4 = vpop.eup %7129 }
0x1a13   :  { %3790 = vrot.lane.b32.xlu1 %v7130_v4, %s7352_s3  ;;  %v7132_v32 = vpop.eup %7131 }
0x1a14   :  { %v3884_v44 = vadd.f32 1.0, %v7132_v32 }
0x1a16   :  { %7133 = vrcp.f32 %v3884_v44 }
0x1a17   :  { %7135 = vpow2.f32 %v5992_v49 }
0x1a20   :  { %v7134_v47 = vpop.eup %7133 }
0x1a21   :  { %v7136_v21 = vpop.eup %7135  ;;  %v3888_v52 = vmul.f32 %v7134_v47, %v3698_v2 }
0x1a22   :  { %v3784_v50 = vadd.f32 1.0, %v7136_v21 }
0x1a24   :  { %7137 = vrcp.f32 %v3784_v50 }
0x1a2e   :  { %v7138_v31 = vpop.eup %7137 }
0x1a2f   :  { %v3788_v54 = vmul.f32 %v7138_v31, %v3598_v34  ;;  %v6945_v34 = vadd.f32 %v7973_v40, %v8100_v13 }
0x1a61   :  { %v3891_v23 = vpop.permute.xlu0 %3890 }
0x1a62   :  { %v3893_v48 = vmul.f32 %v7134_v47, %v3891_v23 }
0x1a64   :  { %3895 = vrot.lane.b32.xlu0 %v3893_v48, %s7353_s22 }
0x1a85   :  { %v3791_v35 = vpop.permute.xlu1 %3790 }
0x1a86   :  { %v3793_v51 = vmul.f32 %v7138_v31, %v3791_v35 }
0x1a88   :  { %3795 = vrot.lane.b32.xlu1 %v3793_v51, %s7353_s22 }
0x1ad6   :  { %v3896_v20 = vpop.permute.xlu0 %3895 }
0x1ad7   :  { %v3898_v33 = vadd.f32 %v3896_v20, %v3888_v52 }
0x1ad9   :  { %7139 = vtanh.f32 %v3898_v33 }
0x1ae3   :  { %v7140_v36 = vpop.eup %7139 }
0x1ae4   :  { %3901 = vrot.lane.b32.xlu0 %v7140_v36, %s7352_s3 }
0x1afa   :  { %v3796_v56 = vpop.permute.xlu1 %3795 }
0x1afb   :  { %v3798_v22 = vadd.f32 %v3796_v56, %v3788_v54 }
0x1afd   :  { %7141 = vtanh.f32 %v3798_v22 }
0x1b07   :  { %v7142_v60 = vpop.eup %7141 }
0x1b08   :  { %3801 = vrot.lane.b32.xlu1 %v7142_v60, %s7352_s3 }
0x1b56   :  { %v3902_v62 = vpop.permute.xlu0 %3901 }
0x1b57   :  { %v8159_v63 = vmul.f32 %v7134_v47, %v3902_v62  ;;  %v6943_v62 = vadd.f32 %v8107_v30, %v8100_v13 }
0x1b59   :  { %4006 = vrot.lane.b32.xlu0 %v8159_v63, %s7353_s22 }
0x1b7a   :  { %v3802_v2 = vpop.permute.xlu1 %3801 }
0x1b7b   :  { %v8163_v25 = vmul.f32 %v7138_v31, %v3802_v2 }
0x1b7d   :  { %3906 = vrot.lane.b32.xlu1 %v8163_v25, %s7353_s22 }
0x1bcb   :  { %v8167_v8 = vpop.permute.xlu0 %4006 }
0x1bcc   :  { %6436 = vmatmul.mubr.msk.f32.vlgmr.msra.gmra.mrb[38].mxu1 %vm701_vm2, %v8167_v8 }
0x1bcd   :  { %6870 = vmatpush3.bf16.msra.mxu1 %v8003_v39  ;;  %6457 = vmatprep.mubr.msk.f32.mxu1 %vm7351_vm1, %v7349_v1 }
0x1bce   :  { %6871 = vmatprep.subr.bf16.mxu1 %v7350_v16 }
0x1bd1   :  { %6873 = vmatpush3.bf16.msra.mxu1 %v8018_v10 }
0x1bd2   :  { %6880 = vmatprep.subr.bf16.mxu1 %v7350_v16 }
0x1bef   :  { %v8177_v19 = vpop.permute.xlu1 %3906 }
0x1bf0   :  { %6425 = vmatmul.mubr.msk.f32.vlgmr.msra.gmra.mrb[34].mxu0 %vm701_vm2, %v8177_v19 }
0x1bf1   :  { %6864 = vmatpush3.bf16.msra.mxu0 %v8066_v59  ;;  %6446 = vmatprep.mubr.msk.f32.mxu0 %vm7351_vm1, %v7349_v1 }
0x1bf2   :  { %6865 = vmatprep.subr.bf16.mxu0 %v7350_v16 }
0x1bf5   :  { %6867 = vmatpush3.bf16.msra.mxu0 %v8078_v26 }
0x1bf6   :  { %6874 = vmatprep.subr.bf16.mxu0 %v7350_v16 }
0x1c9f   :  { %v4076_v28 = vpop.f32.mrb[38].mxu1 }
0x1ca0   :  { %v4080_v45 = vadd.f32 %v6945_v34, %v4076_v28  ;;  %v6437_v27 = vpop.f32.mrb[39].mxu1 }
0x1ca1   :  { %v6940_v27 = vadd.f32 %v7967_v29, %v8114_v43 }
0x1ca2   :  { %7143 = vtanh.f32 %v4080_v45  ;;  %v5998_v57 = vmul.f32 -1.442695, %v4080_v45 }
0x1cac   :  { %v7144_v61 = vpop.eup %7143 }
0x1cad   :  { %4090 = vrot.lane.b32.xlu0 %v7144_v61, %s7352_s3 }
0x1cc3   :  { %v3976_v24 = vpop.f32.mrb[34].mxu0 }
0x1cc4   :  { %v3980_v7 = vadd.f32 %v6938_v53, %v3976_v24  ;;  %v6426_v6 = vpop.f32.mrb[35].mxu0 }
0x1cc6   :  { %7145 = vtanh.f32 %v3980_v7  ;;  %v5996_v32 = vmul.f32 -1.442695, %v3980_v7 }
0x1cc7   :  { %7147 = vpow2.f32 %v5998_v57 }
0x1cd0   :  { %v7146_v11 = vpop.eup %7145 }
0x1cd1   :  { %3990 = vrot.lane.b32.xlu1 %v7146_v11, %s7352_s3  ;;  %v7148_v40 = vpop.eup %7147 }
0x1cd2   :  { %v4084_v55 = vadd.f32 1.0, %v7148_v40 }
0x1cd4   :  { %7149 = vrcp.f32 %v4084_v55 }
0x1cd5   :  { %7151 = vpow2.f32 %v5996_v32 }
0x1cde   :  { %v7150_v3 = vpop.eup %7149 }
0x1cdf   :  { %v7152_v12 = vpop.eup %7151  ;;  %v4088_v49 = vmul.f32 %v7150_v3, %v3898_v33 }
0x1ce0   :  { %v3984_v44 = vadd.f32 1.0, %v7152_v12 }
0x1ce2   :  { %7153 = vrcp.f32 %v3984_v44 }
0x1cec   :  { %v7154_v47 = vpop.eup %7153 }
0x1ced   :  { %v3988_v35 = vmul.f32 %v7154_v47, %v3798_v22 }
0x1d1f   :  { %v4091_v4 = vpop.permute.xlu0 %4090 }
0x1d20   :  { %v4093_v18 = vmul.f32 %v7150_v3, %v4091_v4 }
0x1d22   :  { %4095 = vrot.lane.b32.xlu0 %v4093_v18, %s7353_s22 }
0x1d43   :  { %v3991_v23 = vpop.permute.xlu1 %3990 }
0x1d44   :  { %v3993_v48 = vmul.f32 %v7154_v47, %v3991_v23 }
0x1d46   :  { %3995 = vrot.lane.b32.xlu1 %v3993_v48, %s7353_s22 }
0x1d94   :  { %v4096_v21 = vpop.permute.xlu0 %4095 }
0x1d95   :  { %v4098_v50 = vadd.f32 %v4096_v21, %v4088_v49 }
0x1d97   :  { %7155 = vtanh.f32 %v4098_v50 }
0x1da1   :  { %v7156_v31 = vpop.eup %7155 }
0x1da2   :  { %4101 = vrot.lane.b32.xlu0 %v7156_v31, %s7352_s3 }
0x1db8   :  { %v3996_v51 = vpop.permute.xlu1 %3995 }
0x1db9   :  { %v3998_v52 = vadd.f32 %v3996_v51, %v3988_v35 }
0x1dbb   :  { %7157 = vtanh.f32 %v3998_v52 }
0x1dc5   :  { %v7158_v20 = vpop.eup %7157 }
0x1dc6   :  { %4001 = vrot.lane.b32.xlu1 %v7158_v20, %s7352_s3 }
0x1e14   :  { %v4102_v36 = vpop.permute.xlu0 %4101 }
0x1e15   :  { %v8197_v54 = vmul.f32 %v7150_v3, %v4102_v36 }
0x1e17   :  { %4206 = vrot.lane.b32.xlu0 %v8197_v54, %s7353_s22 }
0x1e38   :  { %v4002_v33 = vpop.permute.xlu1 %4001 }
0x1e39   :  { %v8201_v56 = vmul.f32 %v7154_v47, %v4002_v33 }
0x1e3b   :  { %4106 = vrot.lane.b32.xlu1 %v8201_v56, %s7353_s22 }
0x1e89   :  { %v8205_v60 = vpop.permute.xlu0 %4206 }
0x1e8a   :  { %6458 = vmatmul.mubr.msk.f32.vlgmr.msra.gmra.mrb[40].mxu1 %vm701_vm2, %v8205_v60 }
0x1e8b   :  { %6882 = vmatpush3.bf16.msra.mxu1 %v8003_v39  ;;  %6479 = vmatprep.mubr.msk.f32.mxu1 %vm7351_vm1, %v7349_v1 }
0x1e8c   :  { %6883 = vmatprep.subr.bf16.mxu1 %v7350_v16 }
0x1e8f   :  { %6885 = vmatpush3.bf16.msra.mxu1 %v8018_v10 }
0x1e90   :  { %6892 = vmatprep.subr.bf16.mxu1 %v7350_v16 }
0x1ead   :  { %v8215_v22 = vpop.permute.xlu1 %4106 }
0x1eae   :  { %6447 = vmatmul.mubr.msk.f32.vlgmr.msra.gmra.mrb[36].mxu0 %vm701_vm2, %v8215_v22 }
0x1eaf   :  { %6876 = vmatpush3.bf16.msra.mxu0 %v8066_v59  ;;  %6468 = vmatprep.mubr.msk.f32.mxu0 %vm7351_vm1, %v7349_v1 }
0x1eb0   :  { %6877 = vmatprep.subr.bf16.mxu0 %v7350_v16 }
0x1eb3   :  { %6879 = vmatpush3.bf16.msra.mxu0 %v8078_v26 }
0x1eb4   :  { %6886 = vmatprep.subr.bf16.mxu0 %v7350_v16 }
0x1f5d   :  { %v4276_v2 = vpop.f32.mrb[40].mxu1 }
0x1f5e   :  { %v4280_v34 = vadd.f32 %v6943_v62, %v4276_v2  ;;  %v6459_v28 = vpop.f32.mrb[41].mxu1  ;;  %v6941_v62 = vadd.f32 %v7969_v46, %v8100_v13 }
0x1f60   :  { %7159 = vtanh.f32 %v4280_v34  ;;  %v6002_v6 = vmul.f32 -1.442695, %v4280_v34 }
0x1f6a   :  { %v7160_v45 = vpop.eup %7159 }
0x1f6b   :  { %4290 = vrot.lane.b32.xlu0 %v7160_v45, %s7352_s3 }
0x1f81   :  { %v4176_v61 = vpop.f32.mrb[36].mxu0 }
0x1f82   :  { %v4180_v53 = vadd.f32 %v6940_v27, %v4176_v61  ;;  %v6448_v24 = vpop.f32.mrb[37].mxu0  ;;  %v6942_v27 = vadd.f32 %v8105_v17, %v8114_v43 }
0x1f84   :  { %7161 = vtanh.f32 %v4180_v53  ;;  %v6000_v3 = vmul.f32 -1.442695, %v4180_v53 }
0x1f85   :  { %7163 = vpow2.f32 %v6002_v6 }
0x1f8e   :  { %v7162_v7 = vpop.eup %7161 }
0x1f8f   :  { %4190 = vrot.lane.b32.xlu1 %v7162_v7, %s7352_s3  ;;  %v7164_v30 = vpop.eup %7163 }
0x1f90   :  { %v4284_v11 = vadd.f32 1.0, %v7164_v30 }
0x1f92   :  { %7165 = vrcp.f32 %v4284_v11 }
0x1f93   :  { %7167 = vpow2.f32 %v6000_v3 }
0x1f9c   :  { %v7166_v57 = vpop.eup %7165 }
0x1f9d   :  { %v7168_v29 = vpop.eup %7167  ;;  %v4288_v44 = vmul.f32 %v7166_v57, %v4098_v50 }
0x1f9e   :  { %v4184_v4 = vadd.f32 1.0, %v7168_v29 }
0x1fa0   :  { %7169 = vrcp.f32 %v4184_v4 }
0x1faa   :  { %v7170_v18 = vpop.eup %7169 }
0x1fab   :  { %v4188_v49 = vmul.f32 %v7170_v18, %v3998_v52 }
0x1fdd   :  { %v4291_v40 = vpop.permute.xlu0 %4290 }
0x1fde   :  { %v4293_v55 = vmul.f32 %v7166_v57, %v4291_v40 }
0x1fe0   :  { %4295 = vrot.lane.b32.xlu0 %v4293_v55, %s7353_s22 }
0x2001   :  { %v4191_v32 = vpop.permute.xlu1 %4190 }
0x2002   :  { %v4193_v12 = vmul.f32 %v7170_v18, %v4191_v32 }
0x2004   :  { %4195 = vrot.lane.b32.xlu1 %v4193_v12, %s7353_s22 }
0x2052   :  { %v4296_v47 = vpop.permute.xlu0 %4295 }
0x2053   :  { %v4298_v23 = vadd.f32 %v4296_v47, %v4288_v44 }
0x2055   :  { %7171 = vtanh.f32 %v4298_v23 }
0x205f   :  { %v7172_v48 = vpop.eup %7171 }
0x2060   :  { %4301 = vrot.lane.b32.xlu0 %v7172_v48, %s7352_s3 }
0x2076   :  { %v4196_v21 = vpop.permute.xlu1 %4195 }
0x2077   :  { %v4198_v31 = vadd.f32 %v4196_v21, %v4188_v49 }
0x2079   :  { %7173 = vtanh.f32 %v4198_v31 }
0x2083   :  { %v7174_v35 = vpop.eup %7173 }
0x2084   :  { %4201 = vrot.lane.b32.xlu1 %v7174_v35, %s7352_s3 }
0x20d2   :  { %v4302_v51 = vpop.permute.xlu0 %4301 }
0x20d3   :  { %v8235_v20 = vmul.f32 %v7166_v57, %v4302_v51 }
0x20d5   :  { %4406 = vrot.lane.b32.xlu0 %v8235_v20, %s7353_s22 }
0x20f6   :  { %v4202_v50 = vpop.permute.xlu1 %4201 }
0x20f7   :  { %v8239_v36 = vmul.f32 %v7170_v18, %v4202_v50 }
0x20f9   :  { %4306 = vrot.lane.b32.xlu1 %v8239_v36, %s7353_s22 }
0x2147   :  { %v8243_v33 = vpop.permute.xlu0 %4406 }
0x2148   :  { %6480 = vmatmul.mubr.msk.f32.vlgmr.msra.gmra.mrb[42].mxu1 %vm701_vm2, %v8243_v33 }
0x2149   :  { %6894 = vmatpush3.bf16.msra.mxu1 %v8003_v39  ;;  %6501 = vmatprep.mubr.msk.f32.mxu1 %vm7351_vm1, %v7349_v1 }
0x214a   :  { %6895 = vmatprep.subr.bf16.mxu1 %v7350_v16 }
0x214d   :  { %6897 = vmatpush3.bf16.msra.mxu1 %v8018_v10 }
0x214e   :  { %6904 = vmatprep.subr.bf16.mxu1 %v7350_v16 }
0x216b   :  { %v8253_v52 = vpop.permute.xlu1 %4306 }
0x216c   :  { %6469 = vmatmul.mubr.msk.f32.vlgmr.msra.gmra.mrb[38].mxu0 %vm701_vm2, %v8253_v52 }
0x216d   :  { %6888 = vmatpush3.bf16.msra.mxu0 %v8066_v59  ;;  %6490 = vmatprep.mubr.msk.f32.mxu0 %vm7351_vm1, %v7349_v1 }
0x216e   :  { %6889 = vmatprep.subr.bf16.mxu0 %v7350_v16 }
0x2171   :  { %6891 = vmatpush3.bf16.msra.mxu0 %v8078_v26 }
0x2172   :  { %6898 = vmatprep.subr.bf16.mxu0 %v7350_v16 }
0x221b   :  { %v4476_v2 = vpop.f32.mrb[42].mxu1 }
0x221c   :  { %v4480_v34 = vadd.f32 %v6941_v62, %v4476_v2  ;;  %v6481_v28 = vpop.f32.mrb[43].mxu1 }
0x221e   :  { %7175 = vtanh.f32 %v4480_v34  ;;  %v6006_v6 = vmul.f32 -1.442695, %v4480_v34  ;;  %v6939_v34 = vadd.f32 %v8102_v5, %v8100_v13 }
0x2228   :  { %v7176_v45 = vpop.eup %7175 }
0x2229   :  { %4490 = vrot.lane.b32.xlu0 %v7176_v45, %s7352_s3 }
0x223f   :  { %v4376_v61 = vpop.f32.mrb[38].mxu0 }
0x2240   :  { %v4380_v53 = vadd.f32 %v6942_v27, %v4376_v61  ;;  %v6470_v24 = vpop.f32.mrb[39].mxu0 }
0x2242   :  { %7177 = vtanh.f32 %v4380_v53  ;;  %v6004_v55 = vmul.f32 -1.442695, %v4380_v53  ;;  %v6944_v53 = vadd.f32 %v7971_v38, %v8114_v43 }
0x2243   :  { %7179 = vpow2.f32 %v6006_v6 }
0x224c   :  { %v7178_v7 = vpop.eup %7177 }
0x224d   :  { %4390 = vrot.lane.b32.xlu1 %v7178_v7, %s7352_s3  ;;  %v7180_v46 = vpop.eup %7179 }
0x224e   :  { %v4484_v30 = vadd.f32 1.0, %v7180_v46 }
0x2250   :  { %7181 = vrcp.f32 %v4484_v30 }
0x2251   :  { %7183 = vpow2.f32 %v6004_v55 }
0x225a   :  { %v7182_v11 = vpop.eup %7181 }
0x225b   :  { %v7184_v17 = vpop.eup %7183  ;;  %v4488_v32 = vmul.f32 %v7182_v11, %v4298_v23 }
0x225c   :  { %v4384_v3 = vadd.f32 1.0, %v7184_v17 }
0x225e   :  { %7185 = vrcp.f32 %v4384_v3 }
0x2268   :  { %v7186_v29 = vpop.eup %7185 }
0x2269   :  { %v4388_v48 = vmul.f32 %v7186_v29, %v4198_v31 }
0x229b   :  { %v4491_v57 = vpop.permute.xlu0 %4490 }
0x229c   :  { %v4493_v40 = vmul.f32 %v7182_v11, %v4491_v57 }
0x229e   :  { %4495 = vrot.lane.b32.xlu0 %v4493_v40, %s7353_s22 }
0x22bf   :  { %v4391_v4 = vpop.permute.xlu1 %4390 }
0x22c0   :  { %v4393_v18 = vmul.f32 %v7186_v29, %v4391_v4 }
0x22c2   :  { %4395 = vrot.lane.b32.xlu1 %v4393_v18, %s7353_s22 }
0x2310   :  { %v4496_v12 = vpop.permute.xlu0 %4495 }
0x2311   :  { %v4498_v44 = vadd.f32 %v4496_v12, %v4488_v32 }
0x2313   :  { %7187 = vtanh.f32 %v4498_v44 }
0x231d   :  { %v7188_v47 = vpop.eup %7187 }
0x231e   :  { %4501 = vrot.lane.b32.xlu0 %v7188_v47, %s7352_s3 }
0x2334   :  { %v4396_v49 = vpop.permute.xlu1 %4395 }
0x2335   :  { %v4398_v21 = vadd.f32 %v4396_v49, %v4388_v48 }
0x2337   :  { %7189 = vtanh.f32 %v4398_v21 }
0x2341   :  { %v7190_v35 = vpop.eup %7189 }
0x2342   :  { %4401 = vrot.lane.b32.xlu1 %v7190_v35, %s7352_s3 }
0x2390   :  { %v4502_v51 = vpop.permute.xlu0 %4501 }
0x2391   :  { %v8273_v50 = vmul.f32 %v7182_v11, %v4502_v51 }
0x2393   :  { %4606 = vrot.lane.b32.xlu0 %v8273_v50, %s7353_s22 }
0x23b4   :  { %v4402_v23 = vpop.permute.xlu1 %4401 }
0x23b5   :  { %v8277_v62 = vmul.f32 %v7186_v29, %v4402_v23 }
0x23b7   :  { %4506 = vrot.lane.b32.xlu1 %v8277_v62, %s7353_s22 }
0x2405   :  { %v8281_v2 = vpop.permute.xlu0 %4606 }
0x2406   :  { %6502 = vmatmul.mubr.msk.f32.vlgmr.msra.gmra.mrb[44].mxu1 %vm701_vm2, %v8281_v2 }
0x2407   :  { %6906 = vmatpush3.bf16.msra.mxu1 %v8003_v39  ;;  %6523 = vmatprep.mubr.msk.f32.mxu1 %vm7351_vm1, %v7349_v1 }
0x2408   :  { %6907 = vmatprep.subr.bf16.mxu1 %v7350_v16 }
0x240b   :  { %6909 = vmatpush3.bf16.msra.mxu1 %v8018_v10 }
0x240c   :  { %6916 = vmatprep.subr.bf16.mxu1 %v7350_v16 }
0x2429   :  { %v8291_v31 = vpop.permute.xlu1 %4506 }
0x242a   :  { %6491 = vmatmul.mubr.msk.f32.vlgmr.msra.gmra.mrb[40].mxu0 %vm701_vm2, %v8291_v31 }
0x242b   :  { %6900 = vmatpush3.bf16.msra.mxu0 %v8066_v59  ;;  %6512 = vmatprep.mubr.msk.f32.mxu0 %vm7351_vm1, %v7349_v1 }
0x242c   :  { %6901 = vmatprep.subr.bf16.mxu0 %v7350_v16 }
0x242f   :  { %6903 = vmatpush3.bf16.msra.mxu0 %v8078_v26 }
0x2430   :  { %6910 = vmatprep.subr.bf16.mxu0 %v7350_v16 }
0x24d9   :  { %v4676_v28 = vpop.f32.mrb[44].mxu1 }
0x24da   :  { %v4680_v45 = vadd.f32 %v6939_v34, %v4676_v28  ;;  %v6503_v27 = vpop.f32.mrb[45].mxu1 }
0x24dc   :  { %7191 = vtanh.f32 %v4680_v45  ;;  %v6010_v30 = vmul.f32 -1.442695, %v4680_v45 }
0x24e6   :  { %v7192_v61 = vpop.eup %7191 }
0x24e7   :  { %4690 = vrot.lane.b32.xlu0 %v7192_v61, %s7352_s3 }
0x24fd   :  { %v4576_v24 = vpop.f32.mrb[40].mxu0 }
0x24fe   :  { %v4580_v7 = vadd.f32 %v6944_v53, %v4576_v24  ;;  %v6492_v6 = vpop.f32.mrb[41].mxu0 }
0x2500   :  { %7193 = vtanh.f32 %v4580_v7  ;;  %v6008_v17 = vmul.f32 -1.442695, %v4580_v7 }
0x2501   :  { %7195 = vpow2.f32 %v6010_v30 }
0x250a   :  { %v7194_v46 = vpop.eup %7193 }
0x250b   :  { %4590 = vrot.lane.b32.xlu1 %v7194_v46, %s7352_s3  ;;  %v7196_v5 = vpop.eup %7195 }
0x250c   :  { %v4684_v11 = vadd.f32 1.0, %v7196_v5 }
0x250e   :  { %7197 = vrcp.f32 %v4684_v11 }
0x250f   :  { %7199 = vpow2.f32 %v6008_v17 }
0x2518   :  { %v7198_v57 = vpop.eup %7197 }
0x2519   :  { %v7200_v38 = vpop.eup %7199  ;;  %v4688_v32 = vmul.f32 %v7198_v57, %v4498_v44 }
0x251a   :  { %v4584_v3 = vadd.f32 1.0, %v7200_v38 }
0x251c   :  { %7201 = vrcp.f32 %v4584_v3 }
0x2526   :  { %v7202_v29 = vpop.eup %7201 }
0x2527   :  { %v4588_v49 = vmul.f32 %v7202_v29, %v4398_v21 }
0x2559   :  { %v4691_v40 = vpop.permute.xlu0 %4690 }
0x255a   :  { %v4693_v55 = vmul.f32 %v7198_v57, %v4691_v40 }
0x255c   :  { %4695 = vrot.lane.b32.xlu0 %v4693_v55, %s7353_s22 }
0x257d   :  { %v4591_v4 = vpop.permute.xlu1 %4590 }
0x257e   :  { %v4593_v18 = vmul.f32 %v7202_v29, %v4591_v4 }
0x2580   :  { %4595 = vrot.lane.b32.xlu1 %v4593_v18, %s7353_s22 }
0x25ce   :  { %v4696_v12 = vpop.permute.xlu0 %4695 }
0x25cf   :  { %v4698_v47 = vadd.f32 %v4696_v12, %v4688_v32 }
0x25d1   :  { %7203 = vtanh.f32 %v4698_v47 }
0x25db   :  { %v7204_v48 = vpop.eup %7203 }
0x25dc   :  { %4701 = vrot.lane.b32.xlu0 %v7204_v48, %s7352_s3 }
0x25f2   :  { %v4596_v35 = vpop.permute.xlu1 %4595 }
0x25f3   :  { %v4598_v51 = vadd.f32 %v4596_v35, %v4588_v49 }
0x25f5   :  { %7205 = vtanh.f32 %v4598_v51 }
0x25ff   :  { %v7206_v23 = vpop.eup %7205 }
0x2600   :  { %4601 = vrot.lane.b32.xlu1 %v7206_v23, %s7352_s3 }
0x264e   :  { %v4702_v34 = vpop.permute.xlu0 %4701 }
0x264f   :  { %v8311_v28 = vmul.f32 %v7198_v57, %v4702_v34 }
0x2651   :  { %4806 = vrot.lane.b32.xlu0 %v8311_v28, %s7353_s22 }
0x2672   :  { %v4602_v44 = vpop.permute.xlu1 %4601 }
0x2673   :  { %v8315_v45 = vmul.f32 %v7202_v29, %v4602_v44 }
0x2675   :  { %4706 = vrot.lane.b32.xlu1 %v8315_v45, %s7353_s22 }
0x26c3   :  { %v8319_v27 = vpop.permute.xlu0 %4806 }
0x26c4   :  { %6524 = vmatmul.mubr.msk.f32.vlgmr.msra.gmra.mrb[46].mxu1 %vm701_vm2, %v8319_v27 }
0x26c5   :  { %6918 = vmatpush3.bf16.msra.mxu1 %v8003_v39  ;;  %6545 = vmatprep.mubr.msk.f32.mxu1 %vm7351_vm1, %v7349_v1  ;;  %v6937_v39 = vadd.f32 %v7964_v41, %v8100_v13 }
0x26c6   :  { %6919 = vmatprep.subr.bf16.mxu1 %v7350_v16 }
0x26c9   :  { %6921 = vmatpush3.bf16.msra.mxu1 %v8018_v10 }
0x26e7   :  { %v8328_v21 = vpop.permute.xlu1 %4706 }
0x26e8   :  { %6513 = vmatmul.mubr.msk.f32.vlgmr.msra.gmra.mrb[42].mxu0 %vm701_vm2, %v8328_v21 }
0x26e9   :  { %6912 = vmatpush3.bf16.msra.mxu0 %v8066_v59  ;;  %6534 = vmatprep.mubr.msk.f32.mxu0 %vm7351_vm1, %v7349_v1  ;;  %v6946_v59 = vadd.f32 %v8110_v42, %v8114_v43 }
0x26ea   :  { %6913 = vmatprep.subr.bf16.mxu0 %v7350_v16 }
0x26ed   :  { %6915 = vmatpush3.bf16.msra.mxu0 %v8078_v26 }
0x26ee   :  { %6922 = vmatprep.subr.bf16.mxu0 %v7350_v16 }
0x2797   :  { %v4876_v10 = vpop.f32.mrb[46].mxu1 }
0x2798   :  { %v4880_v61 = vadd.f32 %v6937_v39, %v4876_v10  ;;  %v6525_v53 = vpop.f32.mrb[47].mxu1 }
0x279a   :  { %7207 = vtanh.f32 %v4880_v61  ;;  %v6014_v30 = vmul.f32 -1.442695, %v4880_v61  ;;  %v6935_v61 = vadd.f32 %v8092_v58, %v8100_v13  ;;  %v6019_v58 = vld [vmem:[%s8794_s7] ss:$0 sm:$0xff] }
0x279b   :  { %v6020_v13 = vld [vmem:[%s8795_s8] ss:$0 sm:$0xff] }
0x27a4   :  { %v7208_v24 = vpop.eup %7207 }
0x27a5   :  { %4890 = vrot.lane.b32.xlu0 %v7208_v24, %s7352_s3 }
0x27bb   :  { %v4776_v7 = vpop.f32.mrb[42].mxu0 }
0x27bc   :  { %v4780_v6 = vadd.f32 %v6946_v59, %v4776_v7  ;;  %v6514_v46 = vpop.f32.mrb[43].mxu0 }
0x27be   :  { %7209 = vtanh.f32 %v4780_v6  ;;  %v6012_v55 = vmul.f32 -1.442695, %v4780_v6  ;;  %v6948_v6 = vadd.f32 %v8094_v15, %v8114_v43  ;;  %v6021_v15 = vld [vmem:[%s8796_s9] ss:$0 sm:$0xff]  ;;  %v5211_v43 = vsel %vm5110_vm3, %v8177_v19, 0.0 }
0x27bf   :  { %7211 = vpow2.f32 %v6014_v30 }
0x27c8   :  { %v7210_v26 = vpop.eup %7209 }
0x27c9   :  { %4790 = vrot.lane.b32.xlu1 %v7210_v26, %s7352_s3  ;;  %v7212_v41 = vpop.eup %7211 }
0x27ca   :  { %v4884_v5 = vadd.f32 1.0, %v7212_v41 }
0x27cc   :  { %7213 = vrcp.f32 %v4884_v5 }
0x27cd   :  { %7215 = vpow2.f32 %v6012_v55 }
0x27d6   :  { %v7214_v11 = vpop.eup %7213 }
0x27d7   :  { %v7216_v42 = vpop.eup %7215  ;;  %v4888_v4 = vmul.f32 %v7214_v11, %v4698_v47 }
0x27d8   :  { %v4784_v17 = vadd.f32 1.0, %v7216_v42 }
0x27da   :  { %7217 = vrcp.f32 %v4784_v17 }
0x27e4   :  { %v7218_v38 = vpop.eup %7217 }
0x27e5   :  { %v4788_v48 = vmul.f32 %v7218_v38, %v4598_v51 }
0x2817   :  { %v4891_v57 = vpop.permute.xlu0 %4890 }
0x2818   :  { %v4893_v40 = vmul.f32 %v7214_v11, %v4891_v57 }
0x281a   :  { %4895 = vrot.lane.b32.xlu0 %v4893_v40, %s7353_s22 }
0x283b   :  { %v4791_v3 = vpop.permute.xlu1 %4790 }
0x283c   :  { %v4793_v29 = vmul.f32 %v7218_v38, %v4791_v3 }
0x283e   :  { %4795 = vrot.lane.b32.xlu1 %v4793_v29, %s7353_s22 }
0x288c   :  { %v4896_v18 = vpop.permute.xlu0 %4895 }
0x288d   :  { %v8346_v32 = vadd.f32 %v4896_v18, %v4888_v4  ;;  %v5111_v18 = vsel %vm5110_vm3, %v8140_v37, 0.0 }
0x288f   :  { %7219 = vtanh.f32 %v8346_v32 }
0x2899   :  { %v7220_v12 = vpop.eup %7219 }
0x289a   :  { %4901 = vrot.lane.b32.xlu0 %v7220_v12, %s7352_s3 }
0x28b0   :  { %v4796_v49 = vpop.permute.xlu1 %4795 }
0x28b1   :  { %v8350_v35 = vadd.f32 %v4796_v49, %v4788_v48 }
0x28b3   :  { %7221 = vtanh.f32 %v8350_v35 }
0x28bd   :  { %v7222_v23 = vpop.eup %7221 }
0x28be   :  { %4801 = vrot.lane.b32.xlu1 %v7222_v23, %s7352_s3 }
0x290c   :  { %v4902_v34 = vpop.permute.xlu0 %4901 }
0x290d   :  { %v8354_v44 = vmul.f32 %v7214_v11, %v4902_v34 }
0x290f   :  { %5006 = vrot.lane.b32.xlu0 %v8354_v44, %s7353_s22 }
0x2930   :  { %v4802_v47 = vpop.permute.xlu1 %4801 }
0x2931   :  { %v8358_v39 = vmul.f32 %v7218_v38, %v4802_v47 }
0x2933   :  { %4906 = vrot.lane.b32.xlu1 %v8358_v39, %s7353_s22 }
0x2981   :  { %v5007_v51 = vpop.permute.xlu0 %5006 }
0x2982   :  { %6546 = vmatmul.mubr.msk.f32.vlgmr.msra.gmra.mrb[48].mxu1 %vm701_vm2, %v5007_v51  ;;  %v5216_v12 = vsel %vm5110_vm3, %v5007_v51, 0.0 }
0x29a5   :  { %v8363_v10 = vpop.permute.xlu1 %4906 }
0x29a6   :  { %6535 = vmatmul.mubr.msk.f32.vlgmr.msra.gmra.mrb[44].mxu0 %vm701_vm2, %v8363_v10 }
0x29a7   :  { %6556 = vmatprep.mubr.msk.f32.mxu0 %vm7351_vm1, %v7349_v1 }
0x2a55   :  { %v5076_v53 = vpop.f32.mrb[48].mxu1 }
0x2a56   :  { %v5080_v24 = vadd.f32 %v6935_v61, %v5076_v53  ;;  %v6547_v59 = vpop.f32.mrb[49].mxu1 }
0x2a58   :  { %7223 = vtanh.f32 %v5080_v24  ;;  %v6018_v11 = vmul.f32 -1.442695, %v5080_v24 }
0x2a62   :  { %v7224_v7 = vpop.eup %7223 }
0x2a63   :  { %5090 = vrot.lane.b32.xlu0 %v7224_v7, %s7352_s3 }
0x2a79   :  { %v4976_v46 = vpop.f32.mrb[44].mxu0 }
0x2a7a   :  { %v4980_v26 = vadd.f32 %v6948_v6, %v4976_v46  ;;  %v6536_v30 = vpop.f32.mrb[45].mxu0 }
0x2a7c   :  { %7225 = vtanh.f32 %v4980_v26  ;;  %v6016_v5 = vmul.f32 -1.442695, %v4980_v26 }
0x2a7e   :  { %7227 = vpow2.f32 %v6016_v5  ;;  %v5274_v5 = vsel %vm5110_vm3, %v8319_v27, 0.0  ;;  %v5448_v27 = vsel %vm5110_vm3, %v8205_v60, 0.0 }
0x2a7f   :  { %7229 = vpow2.f32 %v6018_v11  ;;  %v5327_v11 = vsel %vm5110_vm3, %v8253_v52, 0.0  ;;  %v5506_v52 = vsel %vm5110_vm3, %v8167_v8, 0.0 }
0x2a86   :  { %v7226_v41 = vpop.eup %7225 }
0x2a87   :  { %4990 = vrot.lane.b32.xlu1 %v7226_v41, %s7352_s3 }
0x2a88   :  { %v7228_v57 = vpop.eup %7227 }
0x2a89   :  { %v4984_v40 = vadd.f32 1.0, %v7228_v57  ;;  %v7230_v55 = vpop.eup %7229  ;;  %v5332_v57 = vsel %vm5110_vm3, %v8281_v2, 0.0  ;;  %v5567_v2 = vsel %vm5110_vm3, %v8130_v0, 0.0 }
0x2a8a   :  { %v5084_v42 = vadd.f32 1.0, %v7230_v55 }
0x2a8b   :  { %5153 = vrot.lane.b32.xlu1 %v6019_v58, %s7354_s28  ;;  %7231 = vrcp.f32 %v4984_v40 }
0x2a8c   :  { %7233 = vrcp.f32 %v5084_v42 }
0x2a8f   :  { %5162 = vrot.lane.b32.xlu1 %v6020_v13, %s7354_s28 }
0x2a93   :  { %5171 = vrot.lane.b32.xlu1 %v6021_v15, %s7354_s28 }
0x2a95   :  { %v8386_v17 = vpop.eup %7231 }
0x2a96   :  { %v8390_v19 = vpop.eup %7233 }
0x2ab7   :  { %5212 = vadd.xlane.f32.xlu1 %v5211_v43 }
0x2ad5   :  { %v5091_v29 = vpop.permute.xlu0 %5090 }
0x2ad6   :  { %v5093_v4 = vmul.f32 %v8390_v19, %v5091_v29  ;;  %v4988_v29 = vmul.f32 %v8386_v17, %v8350_v35 }
0x2af9   :  { %v4991_v38 = vpop.permute.xlu1 %4990 }
0x2afa   :  { %v4993_v3 = vmul.f32 %v8386_v17, %v4991_v38 }
0x2afc   :  { %4995 = vrot.lane.b32.xlu0 %v4993_v3, %s7353_s22 }
0x2afd   :  { %v8402_v34 = vpop.permute.xlu1 %5153 }
0x2b00   :  { %5095 = vrot.lane.b32.xlu0 %v5093_v4, %s7353_s22 }
0x2b01   :  { %v8406_v61 = vpop.permute.xlu1 %5162 }
0x2b05   :  { %v8410_v53 = vpop.permute.xlu1 %5171 }
0x2b1f   :  { %5112 = vadd.xlane.f32.xlu0 %v5111_v18 }
0x2b35   :  { %5190 = vrot.lane.b32.xlu0 %v6019_v58, %s7352_s3 }
0x2b39   :  { %5194 = vrot.lane.b32.xlu0 %v6020_v13, %s7352_s3 }
0x2b3d   :  { %5198 = vrot.lane.b32.xlu0 %v6021_v15, %s7352_s3 }
0x2b44   :  { %v5213_v59 = vpop.xlane.xlu1 %5212 }
0x2b5c   :  { %5217 = vadd.xlane.f32.xlu0 %v5216_v12 }
0x2b6e   :  { %v4996_v48 = vpop.permute.xlu0 %4995 }
0x2b6f   :  { %v4998_v4 = vadd.f32 %v4996_v48, %v4988_v29 }
0x2b72   :  { %v5096_v49 = vpop.permute.xlu0 %5095 }
0x2bac   :  { %v8400_v23 = vpop.xlane.xlu0 %5112 }
0x2bb0   :  { %v8404_v47 = vpop.permute.xlu0 %5190 }
0x2bb4   :  { %v8408_v37 = vpop.permute.xlu0 %5194 }
0x2bb8   :  { %v8412_v24 = vpop.permute.xlu0 %5198 }
0x2be9   :  { %v5218_v7 = vpop.xlane.xlu0 %5217 }
0x2bea   :  { %v5219_v51 = vadd.f32 %v5218_v7, %v5213_v59 }
0x2bec   :  { %v5220_v6 = vmul.f32 0.015625, %v5219_v51 }
0x2bee   :  { %v5221_v46 = vsub.f32 %v8163_v25, %v5220_v6  ;;  %v8416_v26 = vsub.f32 %v8354_v44, %v5220_v6  ;;  %v5443_v25 = vsel %vm5110_vm3, %v8328_v21, 0.0  ;;  %v5269_v44 = vsel %vm5110_vm3, %v8215_v22, 0.0 }
0x2bef   :  { %v5385_v21 = vsel %vm5110_vm3, %v8291_v31, 0.0  ;;  %v5390_v22 = vsel %vm5110_vm3, %v8243_v33, 0.0  ;;  %v5088_v33 = vmul.f32 %v8390_v19, %v8346_v32 }
0x2bf0   :  { %v5223_v30 = vmul.f32 %v5221_v46, %v5221_v46  ;;  %v5232_v41 = vmul.f32 %v8416_v26, %v8416_v26 }
0x2bf1   :  { %v5098_v3 = vadd.f32 %v5096_v49, %v5088_v33 }
0x2bf2   :  { %5225 = vrot.lane.b32.xlu0 %v5223_v30, %s7353_s22  ;;  %v5501_v30 = vsel %vm5110_vm3, %v8363_v10, 0.0 }
0x2bf6   :  { %5234 = vrot.lane.b32.xlu0 %v5232_v41, %s7353_s22 }
0x2c64   :  { %v5226_v58 = vpop.permute.xlu0 %5225 }
0x2c65   :  { %v5228_v13 = vsel %vm5110_vm3, %v5226_v58, 0.0 }
0x2c66   :  { %5229 = vadd.xlane.f32.xlu1 %v5228_v13 }
0x2c68   :  { %v5235_v15 = vpop.permute.xlu0 %5234 }
0x2c69   :  { %v5237_v43 = vsel %vm5110_vm3, %v5235_v15, 0.0 }
0x2c6a   :  { %5444 = vadd.xlane.f32.xlu1 %v5443_v25  ;;  %5238 = vadd.xlane.f32.xlu0 %v5237_v43 }
0x2c6e   :  { %5270 = vadd.xlane.f32.xlu0 %v5269_v44 }
0x2c72   :  { %5275 = vadd.xlane.f32.xlu0 %v5274_v5 }
0x2c76   :  { %5328 = vadd.xlane.f32.xlu0 %v5327_v11 }
0x2c7a   :  { %5333 = vadd.xlane.f32.xlu0 %v5332_v57 }
0x2c7e   :  { %5386 = vadd.xlane.f32.xlu0 %v5385_v21 }
0x2c82   :  { %5391 = vadd.xlane.f32.xlu0 %v5390_v22 }
0x2c86   :  { %5449 = vadd.xlane.f32.xlu0 %v5448_v27 }
0x2c8a   :  { %5507 = vadd.xlane.f32.xlu0 %v5506_v52 }
0x2c8e   :  { %5568 = vadd.xlane.f32.xlu0 %v5567_v2 }
0x2cf3   :  { %v5230_v40 = vpop.xlane.xlu1 %5229 }
0x2cf7   :  { %v5239_v55 = vpop.xlane.xlu0 %5238  ;;  %v5445_v35 = vpop.xlane.xlu1 %5444 }
0x2cf8   :  { %v5240_v31 = vadd.f32 %v5239_v55, %v5230_v40 }
0x2cfa   :  { %v5241_v42 = vmul.f32 0.015625, %v5240_v31 }
0x2cfb   :  { %v5271_v5 = vpop.xlane.xlu0 %5270 }
0x2cfc   :  { %v5242_v38 = vadd.f32 1e-05, %v5241_v42 }
0x2cfe   :  { %7235 = vrsqrt.f32 %v5242_v38 }
0x2cff   :  { %7237 = vtanh.f32 %v5098_v3  ;;  %v5276_v57 = vpop.xlane.xlu0 %5275 }
0x2d00   :  { %7239 = vtanh.f32 %v4998_v4  ;;  %v5277_v21 = vadd.f32 %v5276_v57, %v5271_v5  ;;  %v8558_v57 = vld [vmem:[#allocation2] ss:$0 sm:$0xff] }
0x2d02   :  { %v5278_v22 = vmul.f32 0.015625, %v5277_v21 }
0x2d03   :  { %v5329_v2 = vpop.xlane.xlu0 %5328 }
0x2d04   :  { %v8481_v27 = vsub.f32 %v8201_v56, %v5278_v22  ;;  %v8493_v56 = vsub.f32 %v8311_v28, %v5278_v22 }
0x2d06   :  { %v5281_v52 = vmul.f32 %v8481_v27, %v8481_v27 }
0x2d07   :  { %v5334_v40 = vpop.xlane.xlu0 %5333 }
0x2d08   :  { %v7236_v60 = vpop.eup %7235  ;;  %v5335_v38 = vadd.f32 %v5334_v40, %v5329_v2 }
0x2d09   :  { %v5244_v8 = vmul.f32 %v7236_v60, %v5221_v46  ;;  %v7238_v32 = vpop.eup %7237  ;;  %v5256_v41 = vmul.f32 %v7236_v60, %v8416_v26 }
0x2d0a   :  { %v7240_v49 = vpop.eup %7239  ;;  %v5336_v29 = vmul.f32 0.015625, %v5335_v38 }
0x2d0b   :  { %v5245_v0 = vmul.f32 %v5244_v8, %v8402_v34  ;;  %v5257_v58 = vmul.f32 %v5256_v41, %v8404_v47  ;;  %v5387_v42 = vpop.xlane.xlu0 %5386 }
0x2d0d   :  { %v8450_v18 = vadd.f32 %v5245_v0, %v8406_v61  ;;  %v8470_v13 = vadd.f32 %v5257_v58, %v8408_v37 }
0x2d0f   :  { %v5247_v12 = vmul.f32 %v8450_v18, %v8410_v53  ;;  %v5392_v0 = vpop.xlane.xlu0 %5391 }
0x2d10   :  { %v5393_v28 = vadd.f32 %v5392_v0, %v5387_v42 }
0x2d11   :  { %5249 = vrot.lane.b32.xlu1 %v5247_v12, %s7353_s22  ;;  %v8508_v12 = vsub.f32 %v8273_v50, %v5336_v29 }
0x2d15   :  { %5101 = vrot.lane.b32.xlu1 %v7238_v32, %s7352_s3 }
0x2d19   :  { %5001 = vrot.lane.b32.xlu1 %v7240_v49, %s7352_s3  ;;  %v5394_v49 = vmul.f32 0.015625, %v5393_v28 }
0x2d83   :  { %v5250_v48 = vpop.permute.xlu1 %5249 }
0x2d84   :  { %v5252_v59 = vsel %vm5110_vm3, %v5250_v48, 0.0  ;;  %v5450_v48 = vpop.xlane.xlu0 %5449 }
0x2d85   :  { %5253 = vadd.xlane.f32.xlu1 %v5252_v59  ;;  %v5348_v59 = vmul.f32 %v8508_v12, %v8508_v12 }
0x2d87   :  { %v5102_v7 = vpop.permute.xlu1 %5101 }
0x2d88   :  { %v5104_v51 = vmul.f32 %v8390_v19, %v5102_v7  ;;  %v5259_v19 = vmul.f32 %v8470_v13, %v8412_v24  ;;  %v8516_v7 = vsub.f32 %v8277_v62, %v5394_v49 }
0x2d8a   :  { %v5397_v50 = vmul.f32 %v8516_v7, %v8516_v7 }
0x2d8b   :  { %v5002_v6 = vpop.permute.xlu1 %5001 }
0x2d8c   :  { %v8461_v46 = vmul.f32 %v8386_v17, %v5002_v6 }
0x2d96   :  { %5116 = vrot.lane.b32.xlu1 %v5104_v51, %s7353_s22 }
0x2d9a   :  { %5559 = vrot.lane.b32.xlu1 %v8461_v46, %s7353_s22 }
0x2dbe   :  { %5502 = vadd.xlane.f32.xlu1 %v5501_v30  ;;  %v5508_v30 = vpop.xlane.xlu0 %5507 }
0x2dcf   :  { %5261 = vrot.lane.b32.xlu1 %v5259_v19, %s7353_s22  ;;  %v5569_v19 = vpop.xlane.xlu0 %5568 }
0x2e12   :  { %v8475_v17 = vpop.xlane.xlu1 %5253 }
0x2e16   :  { %v5117_v15 = vpop.permute.xlu1 %5116 }
0x2e17   :  { %v5119_v43 = vsel %vm5110_vm3, %v5117_v15, 0.0 }
0x2e18   :  { %5120 = vadd.xlane.f32.xlu1 %v5119_v43 }
0x2e1a   :  { %v5560_v10 = vpop.permute.xlu1 %5559 }
0x2e1b   :  { %v5562_v25 = vsel %vm5110_vm3, %v5560_v10, 0.0 }
0x2e1c   :  { %5563 = vadd.xlane.f32.xlu1 %v5562_v25 }
0x2e4b   :  { %v5503_v26 = vpop.xlane.xlu1 %5502 }
0x2e4c   :  { %v5509_v62 = vadd.f32 %v5508_v30, %v5503_v26 }
0x2e4e   :  { %v5510_v43 = vmul.f32 0.015625, %v5509_v62 }
0x2e4f   :  { %v5262_v44 = vpop.permute.xlu1 %5261 }
0x2e50   :  { %v5264_v11 = vsel %vm5110_vm3, %v5262_v44, 0.0  ;;  %v8566_v2 = vsub.f32 %v8358_v39, %v5510_v43 }
0x2e51   :  { %5265 = vadd.xlane.f32.xlu0 %v5264_v11 }
0x2e52   :  { %v5513_v40 = vmul.f32 %v8566_v2, %v8566_v2 }
0x2e67   :  { %5283 = vrot.lane.b32.xlu0 %v5281_v52, %s7353_s22 }
0x2ea5   :  { %v5121_v55 = vpop.xlane.xlu1 %5120 }
0x2ea6   :  { %v5122_v31 = vadd.f32 %v5121_v55, %v8400_v23  ;;  %v8504_v23 = vsub.f32 %v8239_v36, %v5336_v29  ;;  %v5451_v36 = vadd.f32 %v5450_v48, %v5445_v35 }
0x2ea8   :  { %v5123_v33 = vmul.f32 0.015625, %v5122_v31  ;;  %v5339_v32 = vmul.f32 %v8504_v23, %v8504_v23  ;;  %v5452_v6 = vmul.f32 0.015625, %v5451_v36 }
0x2ea9   :  { %v5564_v35 = vpop.xlane.xlu1 %5563 }
0x2eaa   :  { %v8488_v3 = vsub.f32 %v8126_v9, %v5123_v33  ;;  %v8490_v60 = vsub.f32 %v5104_v51, %v5123_v33  ;;  %v5290_v9 = vmul.f32 %v8493_v56, %v8493_v56  ;;  %v8520_v51 = vsub.f32 %v8235_v20, %v5394_v49 }
0x2eab   :  { %v8528_v58 = vsub.f32 %v8315_v45, %v5452_v6  ;;  %v8532_v20 = vsub.f32 %v8197_v54, %v5452_v6  ;;  %v5570_v10 = vadd.f32 %v5569_v19, %v5564_v35  ;;  %v8540_v45 = vsub.f32 %v8159_v63, %v5510_v43 }
0x2eac   :  { %v5126_v8 = vmul.f32 %v8488_v3, %v8488_v3  ;;  %v5135_v4 = vmul.f32 %v8490_v60, %v8490_v60  ;;  %v5406_v41 = vmul.f32 %v8520_v51, %v8520_v51 }
0x2ead   :  { %v5455_v15 = vmul.f32 %v8528_v58, %v8528_v58  ;;  %v5464_v25 = vmul.f32 %v8532_v20, %v8532_v20  ;;  %v5571_v26 = vmul.f32 0.015625, %v5570_v10  ;;  %v5522_v54 = vmul.f32 %v8540_v45, %v8540_v45 }
0x2eae   :  { %5137 = vrot.lane.b32.xlu1 %v5135_v4, %s7353_s22  ;;  %5128 = vrot.lane.b32.xlu0 %v5126_v8, %s7353_s22 }
0x2eaf   :  { %v8546_v44 = vsub.f32 %v8461_v46, %v5571_v26  ;;  %v8550_v5 = vsub.f32 %v8122_v14, %v5571_v26  ;;  %v5255_v46 = vadd.f32 %v8558_v57, %v8475_v17 }
0x2eb1   :  { %v5574_v11 = vmul.f32 %v8546_v44, %v8546_v44  ;;  %v5583_v63 = vmul.f32 %v8550_v5, %v8550_v5 }
0x2eb2   :  { %5292 = vrot.lane.b32.xlu0 %v5290_v9, %s7353_s22 }
0x2eb6   :  { %5341 = vrot.lane.b32.xlu0 %v5339_v32, %s7353_s22 }
0x2eba   :  { %5350 = vrot.lane.b32.xlu0 %v5348_v59, %s7353_s22 }
0x2ebe   :  { %5399 = vrot.lane.b32.xlu0 %v5397_v50, %s7353_s22 }
0x2ec2   :  { %5408 = vrot.lane.b32.xlu0 %v5406_v41, %s7353_s22 }
0x2ec6   :  { %5457 = vrot.lane.b32.xlu0 %v5455_v15, %s7353_s22 }
0x2eca   :  { %5466 = vrot.lane.b32.xlu0 %v5464_v25, %s7353_s22 }
0x2ece   :  { %5524 = vrot.lane.b32.xlu0 %v5522_v54, %s7353_s22 }
0x2ed2   :  { %5576 = vrot.lane.b32.xlu0 %v5574_v11, %s7353_s22 }
0x2ed6   :  { %5585 = vrot.lane.b32.xlu0 %v5583_v63, %s7353_s22 }
0x2ede   :  { %v5266_v21 = vpop.xlane.xlu0 %5265 }
0x2edf   :  { %v8562_v22 = vadd.f32 %v5266_v21, %v5255_v46 }
0x2ee2   :  { %v5284_v14 = vpop.permute.xlu0 %5283 }
0x2ee3   :  { %v5286_v52 = vsel %vm5110_vm3, %v5284_v14, 0.0 }
0x2ee4   :  { %5287 = vadd.xlane.f32.xlu1 %v5286_v52 }
0x2ef5   :  { %5515 = vrot.lane.b32.xlu1 %v5513_v40, %s7353_s22 }
0x2f20   :  { %v5129_v55 = vpop.permute.xlu0 %5128  ;;  %v5138_v0 = vpop.permute.xlu1 %5137 }
0x2f21   :  { %v5140_v28 = vsel %vm5110_vm3, %v5138_v0, 0.0 }
0x2f24   :  { %v5293_v31 = vpop.permute.xlu0 %5292 }
0x2f25   :  { %v5295_v42 = vsel %vm5110_vm3, %v5293_v31, 0.0 }
0x2f26   :  { %5296 = vadd.xlane.f32.xlu0 %v5295_v42 }
0x2f28   :  { %v5342_v17 = vpop.permute.xlu0 %5341 }
0x2f2c   :  { %v5351_v38 = vpop.permute.xlu0 %5350 }
0x2f2d   :  { %v5353_v33 = vsel %vm5110_vm3, %v5351_v38, 0.0 }
0x2f2e   :  { %5354 = vadd.xlane.f32.xlu0 %v5353_v33 }
0x2f30   :  { %v5400_v29 = vpop.permute.xlu0 %5399 }
0x2f31   :  { %v5402_v8 = vsel %vm5110_vm3, %v5400_v29, 0.0 }
0x2f32   :  { %5403 = vadd.xlane.f32.xlu0 %v5402_v8 }
0x2f34   :  { %v5409_v39 = vpop.permute.xlu0 %5408 }
0x2f35   :  { %v5411_v4 = vsel %vm5110_vm3, %v5409_v39, 0.0 }
0x2f36   :  { %5412 = vadd.xlane.f32.xlu0 %v5411_v4 }
0x2f38   :  { %v5458_v9 = vpop.permute.xlu0 %5457 }
0x2f39   :  { %v5460_v31 = vsel %vm5110_vm3, %v5458_v9, 0.0 }
0x2f3a   :  { %5141 = vadd.xlane.f32.xlu0 %v5140_v28 }
0x2f3c   :  { %v5467_v32 = vpop.permute.xlu0 %5466 }
0x2f3d   :  { %v5469_v49 = vsel %vm5110_vm3, %v5467_v32, 0.0 }
0x2f3e   :  { %5470 = vadd.xlane.f32.xlu0 %v5469_v49 }
0x2f40   :  { %v5525_v48 = vpop.permute.xlu0 %5524 }
0x2f41   :  { %v5527_v59 = vsel %vm5110_vm3, %v5525_v48, 0.0 }
0x2f42   :  { %5528 = vadd.xlane.f32.xlu0 %v5527_v59 }
0x2f44   :  { %v5577_v36 = vpop.permute.xlu0 %5576 }
0x2f45   :  { %v5579_v33 = vsel %vm5110_vm3, %v5577_v36, 0.0 }
0x2f48   :  { %v5586_v50 = vpop.permute.xlu0 %5585 }
0x2f49   :  { %v5588_v6 = vsel %vm5110_vm3, %v5586_v50, 0.0 }
0x2f4a   :  { %5589 = vadd.xlane.f32.xlu0 %v5588_v6 }
0x2f71   :  { %v5288_v30 = vpop.xlane.xlu1 %5287 }
0x2f75   :  { %v5516_v42 = vpop.permute.xlu1 %5515 }
0x2f76   :  { %v5518_v38 = vsel %vm5110_vm3, %v5516_v42, 0.0 }
0x2fb3   :  { %v5297_v41 = vpop.xlane.xlu0 %5296 }
0x2fb4   :  { %v5298_v62 = vadd.f32 %v5297_v41, %v5288_v30 }
0x2fb6   :  { %v5299_v35 = vmul.f32 0.015625, %v5298_v62 }
0x2fb8   :  { %v5300_v19 = vadd.f32 1e-05, %v5299_v35 }
0x2fba   :  { %7241 = vrsqrt.f32 %v5300_v19 }
0x2fbb   :  { %v5355_v15 = vpop.xlane.xlu0 %5354 }
0x2fbf   :  { %v5404_v43 = vpop.xlane.xlu0 %5403 }
0x2fc3   :  { %v5413_v10 = vpop.xlane.xlu0 %5412 }
0x2fc4   :  { %v7242_v25 = vpop.eup %7241  ;;  %v5414_v26 = vadd.f32 %v5413_v10, %v5404_v43 }
0x2fc5   :  { %v5302_v54 = vmul.f32 %v7242_v25, %v8481_v27  ;;  %v5314_v11 = vmul.f32 %v7242_v25, %v8493_v56  ;;  %v5344_v27 = vsel %vm5110_vm3, %v5342_v17, 0.0  ;;  %v5131_v56 = vsel %vm5110_vm3, %v5129_v55, 0.0 }
0x2fc6   :  { %v5415_v9 = vmul.f32 0.015625, %v5414_v26 }
0x2fc7   :  { %v5315_v63 = vmul.f32 %v5314_v11, %v8404_v47  ;;  %v5303_v46 = vmul.f32 %v5302_v54, %v8402_v34  ;;  %v5142_v29 = vpop.xlane.xlu0 %5141 }
0x2fc8   :  { %v5416_v48 = vadd.f32 1e-05, %v5415_v9 }
0x2fc9   :  { %v8584_v21 = vadd.f32 %v5315_v63, %v8408_v37  ;;  %v8587_v14 = vadd.f32 %v5303_v46, %v8406_v61 }
0x2fca   :  { %7243 = vrsqrt.f32 %v5416_v48 }
0x2fcb   :  { %v5317_v52 = vmul.f32 %v8584_v21, %v8412_v24  ;;  %v5305_v40 = vmul.f32 %v8587_v14, %v8410_v53  ;;  %v5471_v8 = vpop.xlane.xlu0 %5470 }
0x2fcd   :  { %5319 = vrot.lane.b32.xlu0 %v5317_v52, %s7353_s22  ;;  %5307 = vrot.lane.b32.xlu1 %v5305_v40, %s7353_s22 }
0x2fcf   :  { %v5529_v39 = vpop.xlane.xlu0 %5528 }
0x2fd4   :  { %v7244_v43 = vpop.eup %7243 }
0x2fd5   :  { %v5418_v63 = vmul.f32 %v7244_v43, %v8516_v7 }
0x2fd7   :  { %v5590_v4 = vpop.xlane.xlu0 %5589  ;;  %v5419_v7 = vmul.f32 %v5418_v63, %v8402_v34 }
0x2ff1   :  { %5345 = vadd.xlane.f32.xlu1 %v5344_v27 }
0x2ff5   :  { %5132 = vadd.xlane.f32.xlu1 %v5131_v56  ;;  %v5430_v56 = vmul.f32 %v7244_v43, %v8520_v51  ;;  %v8622_v51 = vadd.f32 %v5419_v7, %v8406_v61 }
0x2ff9   :  { %5461 = vadd.xlane.f32.xlu1 %v5460_v31 }
0x2ffd   :  { %5519 = vadd.xlane.f32.xlu1 %v5518_v38 }
0x3001   :  { %5580 = vadd.xlane.f32.xlu1 %v5579_v33 }
0x303f   :  { %v5308_v0 = vpop.permute.xlu1 %5307  ;;  %v5320_v28 = vpop.permute.xlu0 %5319 }
0x3040   :  { %v5310_v17 = vsel %vm5110_vm3, %v5308_v0, 0.0  ;;  %v5322_v55 = vsel %vm5110_vm3, %v5320_v28, 0.0  ;;  %v5421_v28 = vmul.f32 %v8622_v51, %v8410_v53 }
0x3041   :  { %5311 = vadd.xlane.f32.xlu1 %v5310_v17 }
0x3045   :  { %5323 = vadd.xlane.f32.xlu1 %v5322_v55 }
0x307e   :  { %v5346_v32 = vpop.xlane.xlu1 %5345 }
0x307f   :  { %v5356_v49 = vadd.f32 %v5355_v15, %v5346_v32 }
0x3081   :  { %v5357_v59 = vmul.f32 0.015625, %v5356_v49 }
0x3082   :  { %v5133_v50 = vpop.xlane.xlu1 %5132 }
0x3083   :  { %v5358_v36 = vadd.f32 1e-05, %v5357_v59  ;;  %v5143_v41 = vadd.f32 %v5142_v29, %v5133_v50 }
0x3085   :  { %7245 = vrsqrt.f32 %v5358_v36  ;;  %v5144_v19 = vmul.f32 0.015625, %v5143_v41 }
0x3086   :  { %v5462_v6 = vpop.xlane.xlu1 %5461 }
0x3087   :  { %v5472_v30 = vadd.f32 %v5471_v8, %v5462_v6  ;;  %v5145_v54 = vadd.f32 1e-05, %v5144_v19 }
0x3089   :  { %v5473_v62 = vmul.f32 0.015625, %v5472_v30 }
0x308a   :  { %v5520_v10 = vpop.xlane.xlu1 %5519 }
0x308b   :  { %v5474_v35 = vadd.f32 1e-05, %v5473_v62  ;;  %v5530_v11 = vadd.f32 %v5529_v39, %v5520_v10  ;;  %v5431_v39 = vmul.f32 %v5430_v56, %v8404_v47 }
0x308d   :  { %7247 = vrsqrt.f32 %v5474_v35  ;;  %v5531_v27 = vmul.f32 0.015625, %v5530_v11 }
0x308e   :  { %7249 = vrsqrt.f32 %v5145_v54  ;;  %v5581_v31 = vpop.xlane.xlu1 %5580 }
0x308f   :  { %v7246_v25 = vpop.eup %7245  ;;  %v5532_v38 = vadd.f32 1e-05, %v5531_v27  ;;  %v5591_v33 = vadd.f32 %v5590_v4, %v5581_v31  ;;  %v8630_v4 = vadd.f32 %v5431_v39, %v8408_v37 }
0x3090   :  { %v5360_v26 = vmul.f32 %v7246_v25, %v8504_v23  ;;  %v5372_v15 = vmul.f32 %v7246_v25, %v8508_v12 }
0x3091   :  { %7251 = vrsqrt.f32 %v5532_v38  ;;  %v5592_v0 = vmul.f32 0.015625, %v5591_v33  ;;  %v5433_v49 = vmul.f32 %v8630_v4, %v8412_v24 }
0x3092   :  { %v5361_v46 = vmul.f32 %v5360_v26, %v8402_v34  ;;  %v5373_v52 = vmul.f32 %v5372_v15, %v8404_v47 }
0x3093   :  { %v5593_v9 = vadd.f32 1e-05, %v5592_v0 }
0x3094   :  { %v8608_v40 = vadd.f32 %v5361_v46, %v8406_v61  ;;  %v8614_v12 = vadd.f32 %v5373_v52, %v8408_v37 }
0x3095   :  { %7253 = vrsqrt.f32 %v5593_v9 }
0x3096   :  { %v5363_v23 = vmul.f32 %v8608_v40, %v8410_v53  ;;  %v5375_v8 = vmul.f32 %v8614_v12, %v8412_v24 }
0x3097   :  { %v7248_v42 = vpop.eup %7247 }
0x3098   :  { %5365 = vrot.lane.b32.xlu1 %v5363_v23, %s7353_s22  ;;  %v5476_v29 = vmul.f32 %v7248_v42, %v8528_v58  ;;  %v5488_v17 = vmul.f32 %v7248_v42, %v8532_v20  ;;  %v7250_v55 = vpop.eup %7249 }
0x3099   :  { %v5147_v32 = vmul.f32 %v7250_v55, %v8488_v3  ;;  %v5189_v59 = vmul.f32 %v7250_v55, %v8490_v60 }
0x309a   :  { %v5477_v58 = vmul.f32 %v5476_v29, %v8402_v34  ;;  %v5489_v20 = vmul.f32 %v5488_v17, %v8404_v47 }
0x309b   :  { %v5156_v3 = vmul.f32 %v8402_v34, %v5147_v32  ;;  %v7252_v6 = vpop.eup %7251  ;;  %v5193_v60 = vmul.f32 %v8404_v47, %v5189_v59 }
0x309c   :  { %5377 = vrot.lane.b32.xlu1 %v5375_v8, %s7353_s22  ;;  %v8638_v48 = vadd.f32 %v5477_v58, %v8406_v61  ;;  %v8646_v36 = vadd.f32 %v5489_v20, %v8408_v37  ;;  %v5534_v30 = vmul.f32 %v7252_v6, %v8566_v2  ;;  %v5546_v35 = vmul.f32 %v7252_v6, %v8540_v45 }
0x309d   :  { %v8654_v62 = vadd.f32 %v8406_v61, %v5156_v3  ;;  %v8662_v43 = vadd.f32 %v8408_v37, %v5193_v60 }
0x309e   :  { %v5479_v50 = vmul.f32 %v8638_v48, %v8410_v53  ;;  %v5491_v41 = vmul.f32 %v8646_v36, %v8412_v24  ;;  %v5535_v2 = vmul.f32 %v5534_v30, %v8402_v34  ;;  %v5547_v45 = vmul.f32 %v5546_v35, %v8404_v47 }
0x309f   :  { %v5174_v19 = vmul.f32 %v8410_v53, %v8654_v62  ;;  %v7254_v10 = vpop.eup %7253  ;;  %v5201_v26 = vmul.f32 %v8412_v24, %v8662_v43 }
0x30a0   :  { %5423 = vrot.lane.b32.xlu1 %v5421_v28, %s7353_s22  ;;  %v5595_v25 = vmul.f32 %v7254_v10, %v8546_v44  ;;  %v8670_v15 = vadd.f32 %v5535_v2, %v8406_v61  ;;  %v8677_v11 = vadd.f32 %v5547_v45, %v8408_v37  ;;  %v5607_v33 = vmul.f32 %v7254_v10, %v8550_v5 }
0x30a2   :  { %v5537_v54 = vmul.f32 %v8670_v15, %v8410_v53  ;;  %v5596_v63 = vmul.f32 %v5595_v25, %v8402_v34  ;;  %v5549_v44 = vmul.f32 %v8677_v11, %v8412_v24  ;;  %v5608_v29 = vmul.f32 %v5607_v33, %v8404_v47 }
0x30a3   :  { %v7355_v25 = vmov 0  }
0x30a4   :  { %5435 = vrot.lane.b32.xlu1 %v5433_v49, %s7353_s22  ;;  %v8684_v46 = vadd.f32 %v5596_v63, %v8406_v61  ;;  %v8698_v39 = vadd.f32 %v5608_v29, %v8408_v37  ;;  %6982 = vset.pattern.permute.xlu0 %v7355_v25 }
0x30a5   :  { %6981 = vset.pattern.permute.xlu1 %v7355_v25 }
0x30a6   :  { %v5598_v52 = vmul.f32 %v8684_v46, %v8410_v53  ;;  %v5610_v17 = vmul.f32 %v8698_v39, %v8412_v24 }
0x30a8   :  { %5481 = vrot.lane.b32.xlu1 %v5479_v50, %s7353_s22 }
0x30ac   :  { %5493 = vrot.lane.b32.xlu1 %v5491_v41, %s7353_s22 }
0x30b0   :  { %5176 = vrot.lane.b32.xlu1 %v5174_v19, %s7353_s22 }
0x30b4   :  { %5203 = vrot.lane.b32.xlu1 %v5201_v26, %s7353_s22 }
0x30b8   :  { %5539 = vrot.lane.b32.xlu1 %v5537_v54, %s7353_s22 }
0x30bc   :  { %5551 = vrot.lane.b32.xlu1 %v5549_v44, %s7353_s22 }
0x30c0   :  { %5600 = vrot.lane.b32.xlu1 %v5598_v52, %s7353_s22 }
0x30ce   :  { %v5312_v27 = vpop.xlane.xlu1 %5311 }
0x30cf   :  { %v5313_v56 = vadd.f32 %v8558_v57, %v5312_v27 }
0x30d2   :  { %v5324_v31 = vpop.xlane.xlu1 %5323 }
0x30d3   :  { %v8691_v34 = vadd.f32 %v5324_v31, %v5313_v56 }
0x310a   :  { %v5366_v23 = vpop.permute.xlu1 %5365 }
0x310b   :  { %v5368_v7 = vsel %vm5110_vm3, %v5366_v23, 0.0 }
0x310c   :  { %5369 = vadd.xlane.f32.xlu0 %v5368_v7 }
0x310e   :  { %v5378_v42 = vpop.permute.xlu1 %5377 }
0x310f   :  { %v5380_v61 = vsel %vm5110_vm3, %v5378_v42, 0.0 }
0x3110   :  { %5381 = vadd.xlane.f32.xlu1 %v5380_v61 }
0x3112   :  { %v5424_v38 = vpop.permute.xlu1 %5423 }
0x3113   :  { %v5426_v50 = vsel %vm5110_vm3, %v5424_v38, 0.0 }
0x3116   :  { %v5436_v53 = vpop.permute.xlu1 %5435 }
0x3117   :  { %v5438_v5 = vsel %vm5110_vm3, %v5436_v53, 0.0 }
0x311a   :  { %v5482_v8 = vpop.permute.xlu1 %5481 }
0x311b   :  { %v5484_v47 = vsel %vm5110_vm3, %v5482_v8, 0.0 }
0x311e   :  { %v5494_v0 = vpop.permute.xlu1 %5493 }
0x311f   :  { %v5496_v32 = vsel %vm5110_vm3, %v5494_v0, 0.0 }
0x3122   :  { %5612 = vrot.lane.b32.xlu0 %v5610_v17, %s7353_s22  ;;  %v5177_v28 = vpop.permute.xlu1 %5176 }
0x3123   :  { %v5179_v58 = vsel %vm5110_vm3, %v5177_v28, 0.0 }
0x3124   :  { %5180 = vadd.xlane.f32.xlu1 %v5179_v58 }
0x3126   :  { %v5204_v55 = vpop.permute.xlu1 %5203 }
0x3127   :  { %v5206_v59 = vsel %vm5110_vm3, %v5204_v55, 0.0 }
0x3128   :  { %5439 = vadd.xlane.f32.xlu1 %v5438_v5 }
0x312a   :  { %v5540_v9 = vpop.permute.xlu1 %5539 }
0x312b   :  { %v5542_v24 = vsel %vm5110_vm3, %v5540_v9, 0.0 }
0x312c   :  { %5485 = vadd.xlane.f32.xlu1 %v5484_v47 }
0x312e   :  { %v5552_v37 = vpop.permute.xlu1 %5551 }
0x312f   :  { %v5554_v3 = vsel %vm5110_vm3, %v5552_v37, 0.0 }
0x3130   :  { %5497 = vadd.xlane.f32.xlu1 %v5496_v32 }
0x3132   :  { %v5601_v49 = vpop.permute.xlu1 %5600 }
0x3133   :  { %v5603_v20 = vsel %vm5110_vm3, %v5601_v49, 0.0 }
0x3134   :  { %5543 = vadd.xlane.f32.xlu1 %v5542_v24 }
0x3138   :  { %5604 = vadd.xlane.f32.xlu1 %v5603_v20 }
0x3141   :  { %5207 = vadd.xlane.f32.xlu0 %v5206_v59 }
0x3145   :  { %5427 = vadd.xlane.f32.xlu0 %v5426_v50 }
0x3149   :  { %5555 = vadd.xlane.f32.xlu0 %v5554_v3 }
0x3199   :  { %v5370_v6 = vpop.xlane.xlu0 %5369 }
0x319a   :  { %v5371_v26 = vadd.f32 %v8558_v57, %v5370_v6 }
0x319d   :  { %v5613_v30 = vpop.permute.xlu0 %5612  ;;  %v5382_v60 = vpop.xlane.xlu1 %5381 }
0x319e   :  { %v5615_v41 = vsel %vm5110_vm3, %v5613_v30, 0.0  ;;  %v5383_v54 = vadd.f32 %v5382_v60, %v5371_v26 }
0x319f   :  { %5616 = vadd.xlane.f32.xlu0 %v5615_v41 }
0x31b1   :  { %v5181_v35 = vpop.xlane.xlu1 %5180 }
0x31b2   :  { %v5188_v19 = vadd.f32 %v8558_v57, %v5181_v35 }
0x31b5   :  { %v5440_v52 = vpop.xlane.xlu1 %5439 }
0x31b9   :  { %v5486_v27 = vpop.xlane.xlu1 %5485 }
0x31ba   :  { %v5487_v61 = vadd.f32 %v8558_v57, %v5486_v27 }
0x31bd   :  { %v5498_v31 = vpop.xlane.xlu1 %5497 }
0x31be   :  { %v5499_v33 = vadd.f32 %v5498_v31, %v5487_v61 }
0x31c1   :  { %v5544_v42 = vpop.xlane.xlu1 %5543 }
0x31c2   :  { %v5545_v8 = vadd.f32 %v8558_v57, %v5544_v42 }
0x31c5   :  { %v5605_v53 = vpop.xlane.xlu1 %5604 }
0x31c6   :  { %v5606_v17 = vadd.f32 %v8558_v57, %v5605_v53 }
0x31ce   :  { %v5208_v2 = vpop.xlane.xlu0 %5207 }
0x31cf   :  { %v5209_v10 = vadd.f32 %v5208_v2, %v5188_v19 }
0x31d1   :  { %v5619_v45 = vmax.f32 %v5209_v10, %v8562_v22 }
0x31d2   :  { %v5428_v56 = vpop.xlane.xlu0 %5427 }
0x31d3   :  { %v5620_v63 = vmax.f32 %v5619_v45, %v8691_v34  ;;  %v5429_v23 = vadd.f32 %v8558_v57, %v5428_v56 }
0x31d5   :  { %v5621_v44 = vmax.f32 %v5620_v63, %v5383_v54  ;;  %v5441_v7 = vadd.f32 %v5440_v52, %v5429_v23 }
0x31d6   :  { %v5556_v29 = vpop.xlane.xlu0 %5555 }
0x31d7   :  { %v5622_v38 = vmax.f32 %v5621_v44, %v5441_v7  ;;  %v5557_v28 = vadd.f32 %v5556_v29, %v5545_v8 }
0x31d9   :  { %v5623_v0 = vmax.f32 %v5622_v38, %v5499_v33 }
0x31db   :  { %v5624_v55 = vmax.f32 %v5623_v0, %v5557_v28 }
0x322c   :  { %v5617_v58 = vpop.xlane.xlu0 %5616 }
0x322d   :  { %v5618_v5 = vadd.f32 %v5617_v58, %v5606_v17  ;;  %v5722_v17 = vld [vmem:[%s8798_s11] sm:$0xff]  ;;  %v5724_v58 = vld [vmem:[%s8798_s11 + $0x10] sm:$0xff] }
0x322f   :  { %v5625_v9 = vmax.f32 %v5624_v55, %v5618_v5 }
0x3231   :  { %v5626_v47 = vsub.f32 %v5209_v10, %v5625_v9  ;;  %v5629_v37 = vsub.f32 %v8562_v22, %v5625_v9  ;;  %v5632_v32 = vsub.f32 %v8691_v34, %v5625_v9  ;;  %v5635_v24 = vsub.f32 %v5383_v54, %v5625_v9 }
0x3232   :  { %v5638_v50 = vsub.f32 %v5441_v7, %v5625_v9  ;;  %v5641_v6 = vsub.f32 %v5499_v33, %v5625_v9  ;;  %v5644_v30 = vsub.f32 %v5557_v28, %v5625_v9  ;;  %v5647_v60 = vsub.f32 %v5618_v5, %v5625_v9  ;;  %v5723_v28 = vld [vmem:[%s8798_s11 + $0x8] sm:$0xff]  ;;  %v5725_v5 = vld [vmem:[%s8798_s11 + $0x18] sm:$0xff] }
0x3233   :  { %v5627_v49 = vmul.f32 1.442695, %v5626_v47  ;;  %v5630_v20 = vmul.f32 1.442695, %v5629_v37  ;;  %v5633_v59 = vmul.f32 1.442695, %v5632_v32  ;;  %v6923_v55 = vpack.c.bf16 %v5723_v28, %v5722_v17 }
0x3234   :  { %v5636_v3 = vmul.f32 1.442695, %v5635_v24  ;;  %v5639_v57 = vmul.f32 1.442695, %v5638_v50  ;;  %v5642_v41 = vmul.f32 1.442695, %v5641_v6  ;;  %v6926_v9 = vpack.c.bf16 %v5725_v5, %v5724_v58 }
0x3235   :  { %7255 = vpow2.f32 %v5627_v49  ;;  %v5645_v35 = vmul.f32 1.442695, %v5644_v30  ;;  %v5648_v22 = vmul.f32 1.442695, %v5647_v60  ;;  %6924 = vmatpush3.bf16.msra.mxu0 %v6923_v55 }
0x3236   :  { %7257 = vpow2.f32 %v5630_v20  ;;  %6925 = vmatprep.subr.bf16.mxu0 %v7350_v16 }
0x3237   :  { %7259 = vpow2.f32 %v5633_v59 }
0x3238   :  { %7261 = vpow2.f32 %v5636_v3 }
0x3239   :  { %7263 = vpow2.f32 %v5639_v57  ;;  %6927 = vmatpush3.bf16.msra.mxu0 %v6926_v9 }
0x323a   :  { %7265 = vpow2.f32 %v5642_v41  ;;  %6928 = vmatprep.subr.bf16.mxu0 %v7350_v16 }
0x323b   :  { %7267 = vpow2.f32 %v5645_v35 }
0x323c   :  { %7269 = vpow2.f32 %v5648_v22 }
0x323f   :  { %v7256_v34 = vpop.eup %7255 }
0x3240   :  { %v7258_v19 = vpop.eup %7257 }
0x3241   :  { %v5650_v2 = vadd.f32 %v7258_v19, %v7256_v34  ;;  %v7260_v10 = vpop.eup %7259 }
0x3242   :  { %v7262_v26 = vpop.eup %7261 }
0x3243   :  { %v5651_v25 = vadd.f32 %v7260_v10, %v5650_v2  ;;  %v7264_v54 = vpop.eup %7263 }
0x3244   :  { %v7266_v44 = vpop.eup %7265 }
0x3245   :  { %v5652_v45 = vadd.f32 %v7262_v26, %v5651_v25  ;;  %v7268_v27 = vpop.eup %7267 }
0x3246   :  { %v7270_v31 = vpop.eup %7269 }
0x3247   :  { %v5653_v63 = vadd.f32 %v7264_v54, %v5652_v45 }
0x3249   :  { %v5654_v52 = vadd.f32 %v7266_v44, %v5653_v63 }
0x324b   :  { %v5655_v56 = vadd.f32 %v7268_v27, %v5654_v52 }
0x324d   :  { %v5656_v23 = vadd.f32 %v7270_v31, %v5655_v56 }
0x324f   :  { %7271 = vrcp.f32 %v5656_v23  ;;  %v6024_v23 = vld [vmem:[%s8799_s12] ss:$0 sm:$0xff] }
0x3259   :  { %v7272_v7 = vpop.eup %7271 }
0x325a   :  { %v5659_v42 = vmul.f32 %v7272_v7, %v7258_v19  ;;  %v5658_v61 = vmul.f32 %v7272_v7, %v7256_v34  ;;  %v5660_v38 = vmul.f32 %v7272_v7, %v7260_v10  ;;  %v5661_v33 = vmul.f32 %v7272_v7, %v7262_v26 }
0x325b   :  { %v5662_v53 = vmul.f32 %v7272_v7, %v7264_v54  ;;  %v5663_v29 = vmul.f32 %v7272_v7, %v7266_v44  ;;  %v5664_v8 = vmul.f32 %v7272_v7, %v7268_v27  ;;  %v5665_v0 = vmul.f32 %v7272_v7, %v7270_v31 }
0x325c   :  { %5675 = vperm.xlu0 %6982, %v5659_v42   ;;  %5669 = vperm.xlu1 %6981, %v5658_v61  }
0x3260   :  { %5682 = vperm.xlu1 %6981, %v5660_v38  }
0x3264   :  { %5689 = vperm.xlu1 %6981, %v5661_v33  }
0x3268   :  { %5696 = vperm.xlu1 %6981, %v5662_v53  }
0x326c   :  { %5703 = vperm.xlu1 %6981, %v5663_v29  }
0x3270   :  { %5710 = vperm.xlu1 %6981, %v5664_v8  }
0x3274   :  { %5717 = vperm.xlu1 %6981, %v5665_v0  }
0x32db   :  { %v5670_v47 = vpop.permute.xlu1 %5669  ;;  %v5676_v32 = vpop.permute.xlu0 %5675 }
0x32dc   :  { %v5678_v49 = vmul.f32 %v5676_v32, %v8450_v18  ;;  %v5672_v20 = vmul.f32 %v5670_v47, %v8654_v62  ;;  %v5809_v3 = vmul.f32 %v5676_v32, %v8470_v13  ;;  %v5808_v57 = vmul.f32 %v5670_v47, %v8662_v43 }
0x32de   :  { %v5679_v6 = vadd.f32 %v5678_v49, %v5672_v20  ;;  %v5810_v34 = vadd.f32 %v5809_v3, %v5808_v57 }
0x32df   :  { %v5683_v37 = vpop.permute.xlu1 %5682 }
0x32e0   :  { %v5685_v50 = vmul.f32 %v5683_v37, %v8587_v14  ;;  %v5811_v35 = vmul.f32 %v5683_v37, %v8584_v21 }
0x32e2   :  { %v5686_v60 = vadd.f32 %v5685_v50, %v5679_v6  ;;  %v5812_v2 = vadd.f32 %v5811_v35, %v5810_v34 }
0x32e3   :  { %v5690_v24 = vpop.permute.xlu1 %5689 }
0x32e4   :  { %v5692_v30 = vmul.f32 %v5690_v24, %v8608_v40  ;;  %v5813_v62 = vmul.f32 %v5690_v24, %v8614_v12 }
0x32e6   :  { %v5693_v18 = vadd.f32 %v5692_v30, %v5686_v60  ;;  %v5814_v40 = vadd.f32 %v5813_v62, %v5812_v2 }
0x32e7   :  { %v5697_v59 = vpop.permute.xlu1 %5696 }
0x32e8   :  { %v5699_v22 = vmul.f32 %v5697_v59, %v8622_v51  ;;  %v5815_v10 = vmul.f32 %v5697_v59, %v8630_v4 }
0x32ea   :  { %v5700_v13 = vadd.f32 %v5699_v22, %v5693_v18  ;;  %v5816_v45 = vadd.f32 %v5815_v10, %v5814_v40 }
0x32eb   :  { %v5704_v41 = vpop.permute.xlu1 %5703 }
0x32ec   :  { %v5706_v19 = vmul.f32 %v5704_v41, %v8638_v48  ;;  %v5817_v26 = vmul.f32 %v5704_v41, %v8646_v36  ;;  %v5823_v36 = vld [vmem:[%s8798_s11 + $0x20] sm:$0xff] }
0x32ee   :  { %v5707_v25 = vadd.f32 %v5706_v19, %v5700_v13  ;;  %v5818_v63 = vadd.f32 %v5817_v26, %v5816_v45 }
0x32ef   :  { %v5711_v14 = vpop.permute.xlu1 %5710 }
0x32f0   :  { %v5713_v43 = vmul.f32 %v5711_v14, %v8670_v15  ;;  %v5819_v54 = vmul.f32 %v5711_v14, %v8677_v11  ;;  %v5824_v15 = vld [vmem:[%s8798_s11 + $0x28] sm:$0xff] }
0x32f1   :  { %v6929_v11 = vpack.c.bf16 %v5824_v15, %v5823_v36 }
0x32f2   :  { %v5714_v51 = vadd.f32 %v5713_v43, %v5707_v25  ;;  %v5820_v52 = vadd.f32 %v5819_v54, %v5818_v63 }
0x32f3   :  { %v5718_v21 = vpop.permute.xlu1 %5717 }
0x32f4   :  { %v5720_v12 = vmul.f32 %v5718_v21, %v8684_v46  ;;  %v5821_v44 = vmul.f32 %v5718_v21, %v8698_v39  ;;  %v5825_v46 = vld [vmem:[%s8798_s11 + $0x30] sm:$0xff]  ;;  %v5826_v39 = vld [vmem:[%s8798_s11 + $0x38] sm:$0xff]  ;;  %s5910_s11 = sshll.u32 %s7356_s14, 4  ;;  %s5911_s11 = int_to_ptr.vmem [resolvable:$true] %s5910_s11 }
0x32f5   :  { %v6932_v56 = vpack.c.bf16 %v5826_v39, %v5825_v46  ;;  %s7317_s15 = scalar_lea.vmem %s5911_s11, 32  ;;  %p7322_p3 = scmp.lt.s32.totalorder %s5911_s11, %s5911_s11 }
0x32f6   :  { %v5721_v48 = vadd.f32 %v5720_v12, %v5714_v51  ;;  %v5822_v4 = vadd.f32 %v5821_v44, %v5820_v52  ;;  %p7318_p2 = scmp.ne.s32.totalorder %s5911_s11, %s7317_s15  ;;  %p7323_p4 = scmp.lt.s32.totalorder %s7317_s15, %s7317_s15 }
0x32f8   :  { %5727 = vrot.lane.b32.xlu1 %v5721_v48, %s7353_s22  ;;  %p7324_p5 = por %p7323_p4, %p7322_p3 }
0x32fa   :  { %p7325_p6 = pnand %p7324_p5, %p7318_p2 }
0x32fc   :  { %5828 = vrot.lane.b32.xlu1 %v5822_v4, %s7353_s22 }
0x336a   :  { %v5728_v27 = vpop.permute.xlu1 %5727 }
0x336b   :  { %6557 = vmatmul.mubr.msk.f32.vlgmr.msra.gmra.mrb[46].mxu0 %vm701_vm2, %v5728_v27 }
0x336c   :  { %6930 = vmatpush3.bf16.msra.mxu0 %v6929_v11  ;;  %6567 = vmatprep.mubr.msk.f32.mxu0 %vm7351_vm1, %v7349_v1 }
0x336d   :  { %6931 = vmatprep.subr.bf16.mxu0 %v7350_v16 }
0x336e   :  { %v5829_v31 = vpop.permute.xlu1 %5828 }
0x3370   :  { %6933 = vmatpush3.bf16.msra.mxu0 %v6932_v56 }
0x3373   :  { %6568 = vmatmul.mubr.msk.f32.vlgmr.msra.gmra.mrb[46].mxu0 %vm701_vm2, %v5829_v31 }
0x3446   :  { %v5898_v7 = vpop.f32.mrb[46].mxu0 }
0x3447   :  { %v6950_v42 = vadd.f32 %v6024_v23, %v5898_v7  ;;  %v6569_v61 = vpop.f32.mrb[47].mxu0 }
0x3449   :  { %5903 = vst [vmem:[#allocation8] sm:$0x3] %v6950_v42 }
0x344a   :  { %7328 = shalt.err (!%p7325_p6)
}
0x344b   :  { %s7329_s1 = scalar_lea.hbm %s8800_s13, 32 }
0x344c   :  { %p7330_p7 = scmp.ne.s32.totalorder %s8800_s13, %s7329_s1  ;;  %p7333_p8 = scmp.lt.u32.totalorder %s7329_s1, %s8800_s13 }
0x344e   :  { %p7335_p9 = pnand %p7333_p8, %p7330_p7 }
0x3450   :  { %7338 = shalt.err (!%p7335_p9)
}
0x3451   :  { %5913 = dma.vmem_to_hbm [thread:$0]  %s5911_s11, 32, %s8800_s13, [#allocation5]  }
0x3452   :  { %7343 = dma.done.wait [#allocation5], 32  }
0x3453   :  { %7344 = vsyncadd [#allocation5], 4294967264 }
0x3454   :  { %5917 = vsyncpa [#allocation4], 1 }
0x3455   :  { %5918 = vsyncpa [#allocation7], 1 }
0x3456   :  { %5919 = vsyncpa [#allocation5], 1 }

</bundles_post_ra>
